<compile_context>
chip_gen: v6e
topology: v6e:2x2x1
jax: 0.10.0
libtpu: 0.0.40
codegen_flags: <defaults>
</compile_context>

<pallas_src>
import jax
import jax.numpy as jnp
from jax.experimental import pallas as pl
from jax.experimental.pallas import tpu as pltpu


# ----------------------- conv3x3 + ReLU + global-avg-pool --------------------

def conv_relu_pool_kernel(x_ref, w_ref, b_ref, sel_ref, pool_ref, out_ref):
    """Single-GEMM 3x3 conv + bias + ReLU + global average pool.

    x_ref:    (Fb*H, 3*(W+2)*C)   bf16  row-stacked, kh-packed padded frames.
    w_ref:    (3*(W+2)*C, W*Cout) bf16  banded weight folding all 9 taps.
    b_ref:    (1, W*Cout)         f32   bias tiled W times.
    sel_ref:  (Fb, Fb*H)          f32   frame selector (sums the H rows/frame).
    pool_ref: (W*Cout, Cout)      f32   stacked identity / (H*W).
    out_ref:  (Bp, T, Cout)       f32   pooled features (Bp*T == Fb frames).
    """
    # One MXU pass covers all 9 taps, all frames and all rows of this block.
    acc = jnp.dot(x_ref[...], w_ref[...], preferred_element_type=jnp.float32)
    y = jnp.maximum(acc + b_ref[...], 0.0)                       # (Fb*H, W*Cout)
    # Global average pool as two small matmuls (MXU has slack; no lane rolls).
    hsum = jnp.dot(sel_ref[...], y, preferred_element_type=jnp.float32)      # (Fb, W*Cout)
    pooled = jnp.dot(hsum, pool_ref[...], preferred_element_type=jnp.float32)  # (Fb, Cout)
    out_ref[...] = pooled.reshape(out_ref.shape)


def _batches_per_conv_step(bsz):
    """v7x has 2 TensorCores -> keep grid=2 'parallel'; single-TC chips
    (v5e/v6e) prefer one grid step with a taller GEMM (M = B*T*H)."""
    try:
        kind = jax.devices()[0].device_kind.lower()
    except Exception:
        kind = ""
    n_steps = 2 if (("v7" in kind or "7x" in kind) and bsz % 2 == 0) else 1
    return max(bsz // n_steps, 1)


def conv_features(x, conv_w, conv_b):
    """x: (B, T, C, H, W); conv_w: (3,3,C,Cout); conv_b: (1,Cout) -> (B, T, Cout)."""
    bsz, t, c, h, w = x.shape
    n = bsz * t
    cout = conv_w.shape[-1]
    kdim = 3 * (w + 2) * c
    assert (t * h) % 8 == 0, "T*H must be a multiple of 8 for the conv block"

    bpp = _batches_per_conv_step(bsz)          # batches per grid step
    fb = bpp * t                               # frames per grid step

    # NHWC + zero padding; flatten (W+2, C) into one lane axis (all XLA side).
    x_nhwc = jnp.transpose(x.reshape(n, c, h, w), (0, 2, 3, 1))
    xpad = jnp.pad(x_nhwc, ((0, 0), (1, 1), (1, 1), (0, 0)))
    xpad = xpad.reshape(n, h + 2, (w + 2) * c)
    # Stack the 3 kh-shifted row views along lanes -> single K for one GEMM;
    # pre-cast to bf16 (halves the HBM->VMEM DMA bytes of the input).
    xrows = jnp.concatenate([xpad[:, kh:kh + h, :] for kh in range(3)], axis=-1)
    xrows = xrows.reshape(n * h, kdim).astype(jnp.bfloat16)

    # Banded weight folding all 9 taps:
    #   w_full[kh*(W+2)*C + u*C + ci, v*Cout + o] = conv_w[kh, kw, ci, o] iff u == v + kw
    kw_i = jnp.arange(3)
    u_i = jnp.arange(w + 2)
    v_i = jnp.arange(w)
    band = (u_i[None, :, None] == (v_i[None, None, :] + kw_i[:, None, None]))
    band = band.astype(conv_w.dtype)                               # (3, W+2, W)
    w_full = jnp.einsum("xuv,hxco->hucvo", band, conv_w)           # (3, W+2, C, W, Cout)
    w_full = w_full.reshape(kdim, w * cout).astype(jnp.bfloat16)

    b_tiled = jnp.tile(conv_b.reshape(1, cout), (1, w)).astype(jnp.float32)
    # Frame selector (sums the H rows of each frame) and pooling matrix
    # (sums the W pixel groups and applies the 1/(H*W) scale).
    sel_rows = (jnp.arange(fb)[:, None] == (jnp.arange(fb * h)[None, :] // h))
    sel_rows = sel_rows.astype(jnp.float32)                        # (Fb, Fb*H)
    pool_mat = jnp.tile(jnp.eye(cout, dtype=jnp.float32), (w, 1)) / float(h * w)

    return pl.pallas_call(
        conv_relu_pool_kernel,
        out_shape=jax.ShapeDtypeStruct((bsz, t, cout), jnp.float32),
        grid=(bsz // bpp,),
        in_specs=[
            pl.BlockSpec((fb * h, kdim), lambda i: (i, 0)),
            pl.BlockSpec(w_full.shape, lambda i: (0, 0)),
            pl.BlockSpec(b_tiled.shape, lambda i: (0, 0)),
            pl.BlockSpec(sel_rows.shape, lambda i: (0, 0)),
            pl.BlockSpec(pool_mat.shape, lambda i: (0, 0)),
        ],
        out_specs=pl.BlockSpec((bpp, t, cout), lambda i: (i, 0, 0)),
        compiler_params=pltpu.CompilerParams(dimension_semantics=("parallel",)),
    )(xrows, w_full, b_tiled, sel_rows, pool_mat)


# ------------------- fused multi-layer LSTM + regressor head -----------------

def make_lstm_head_kernel(num_layers, hdim):
    def kernel(*refs):
        x_ref = refs[0]
        pos = 1
        layers = []
        for _ in range(num_layers):
            layers.append((refs[pos], refs[pos + 1]))            # (w_packed, bias)
            pos += 2
        w1_ref, b1_ref, w2_ref, b2_ref, out_ref = refs[pos:pos + 5]

        xs = x_ref[...]                                          # (B, T, F)
        bsz, t_steps = xs.shape[0], xs.shape[1]

        # Register-carried per-layer state (no VMEM scratch, no per-step init).
        hs = [jnp.zeros((bsz, hdim), jnp.float32) for _ in range(num_layers)]
        cs = [jnp.zeros((bsz, hdim), jnp.float32) for _ in range(num_layers)]

        inp = xs[:, 0, :]
        for tt in range(t_steps):                                # T small & static: unrolled
            inp = xs[:, tt, :]                                   # (B, F)
            for li, (w_ref, b_ref) in enumerate(layers):
                # Single packed matmul on concat([x_t, h]) (K doubled).
                xh = jnp.concatenate([inp, hs[li]], axis=-1).astype(jnp.bfloat16)
                gates = (jnp.dot(xh, w_ref[...], preferred_element_type=jnp.float32)
                         + b_ref[...])                           # (B, 4H), order (i, f, o, g)
                sig = jax.nn.sigmoid(gates[:, :3 * hdim])        # one EUP call, contiguous
                g_g = jnp.tanh(gates[:, 3 * hdim:])
                i_g = sig[:, 0 * hdim:1 * hdim]
                f_g = sig[:, 1 * hdim:2 * hdim]
                o_g = sig[:, 2 * hdim:3 * hdim]
                c_new = f_g * cs[li] + i_g * g_g
                h_new = o_g * jnp.tanh(c_new)
                cs[li] = c_new
                hs[li] = h_new
                inp = h_new

        # Regressor head fused on the last timestep of the top layer.
        y = (jnp.dot(inp.astype(jnp.bfloat16), w1_ref[...],
                     preferred_element_type=jnp.float32) + b1_ref[...])
        y = jnp.maximum(y, 0.0)
        # TODO(synk): Dropout(reg_dropout) is inference-mode identity here.
        out_ref[...] = (jnp.sum(y * w2_ref[...], axis=-1, keepdims=True)
                        + b2_ref[...])                           # (B, 1); N=1 matmul avoided
    return kernel


def _reorder_gates(a, hdim):
    """PyTorch LSTM gate order (i, f, g, o) -> (i, f, o, g) along the last axis."""
    i, f, g, o = (a[..., 0:hdim], a[..., hdim:2 * hdim],
                  a[..., 2 * hdim:3 * hdim], a[..., 3 * hdim:4 * hdim])
    return jnp.concatenate([i, f, o, g], axis=-1)


def lstm_head(feats, lstm_params, w1, b1, w2, b2):
    """feats: (B, T, F) -> (B, 1) prediction."""
    bsz, t, f = feats.shape
    num_layers = len(lstm_params)
    hdim = lstm_params[0][1].shape[0]

    args = [feats]
    for w_ih, w_hh, bias in lstm_params:
        w_pack = jnp.concatenate([w_ih, w_hh], axis=0)           # (F+H, 4H), PyTorch (i,f,g,o)
        args.append(_reorder_gates(w_pack, hdim).astype(jnp.bfloat16))
        args.append(_reorder_gates(bias, hdim).astype(jnp.float32))
    args += [w1.astype(jnp.bfloat16), b1.astype(jnp.float32),
             w2.T.astype(jnp.float32), b2.astype(jnp.float32)]

    in_specs = [pl.BlockSpec(a.shape, lambda i, nd=a.ndim: (0,) * nd) for a in args]

    return pl.pallas_call(
        make_lstm_head_kernel(num_layers, hdim),
        out_shape=jax.ShapeDtypeStruct((bsz, 1), jnp.float32),
        grid=(1,),
        in_specs=in_specs,
        out_specs=pl.BlockSpec((bsz, 1), lambda i: (0, 0)),
        compiler_params=pltpu.CompilerParams(dimension_semantics=("arbitrary",)),
    )(*args)


# --------------------------------- forward -----------------------------------

@jax.jit
def cnn_lstm_forward(x, params):
    # TODO(synk): pretrained torchvision backbone (resnet*) is replaced by a
    # minimal Conv3x3 + ReLU + global-average-pool feature extractor producing
    # the same (B, T, feat_dim) sequence; the full residual stack is not reproduced.
    feats = conv_features(x, params["conv_w"], params["conv_b"])        # (B, T, F)
    out = lstm_head(feats, params["lstm"], params["w1"], params["b1"],
                    params["w2"], params["b2"])                          # (B, 1)
    return out[:, 0]                                                     # .squeeze(1)


def make_params(key, c_in, feat_dim, lstm_hidden, lstm_layers):
    keys = iter(jax.random.split(key, 2 + 3 * lstm_layers + 4))

    def nrm(shape, scale):
        return jax.random.normal(next(keys), shape, jnp.float32) * scale

    params = {
        "conv_w": nrm((3, 3, c_in, feat_dim), 1.0 / float(jnp.sqrt(9.0 * c_in))),
        "conv_b": nrm((1, feat_dim), 0.01),
    }
    lstm = []
    f_in = feat_dim
    for _ in range(lstm_layers):
        wih = nrm((f_in, 4 * lstm_hidden), 1.0 / float(jnp.sqrt(f_in)))
        whh = nrm((lstm_hidden, 4 * lstm_hidden), 1.0 / float(jnp.sqrt(lstm_hidden)))
        bb = nrm((1, 4 * lstm_hidden), 0.01)   # = b_ih + b_hh in PyTorch terms
        lstm.append((wih, whh, bb))
        f_in = lstm_hidden
    params["lstm"] = lstm

    h2 = lstm_hidden // 2
    params["w1"] = nrm((lstm_hidden, h2), 1.0 / float(jnp.sqrt(lstm_hidden)))
    params["b1"] = nrm((1, h2), 0.01)
    params["w2"] = nrm((h2, 1), 1.0 / float(jnp.sqrt(h2)))
    params["b2"] = nrm((1, 1), 0.01)
    return params


if __name__ == "__main__":
    B, T, C, H, W = 2, 8, 4, 16, 16
    FEAT_DIM, LSTM_HIDDEN, LSTM_LAYERS = 32, 32, 2

    key = jax.random.PRNGKey(0)
    kx, kp = jax.random.split(key)
    x = jax.random.normal(kx, (B, T, C, H, W), jnp.float32)
    params = make_params(kp, C, FEAT_DIM, LSTM_HIDDEN, LSTM_LAYERS)

    y = cnn_lstm_forward(x, params)
    jax.block_until_ready(y)
    assert y.shape == (B,), y.shape
    assert y.dtype == jnp.float32
    print("KERNEL_OK")
</pallas_src>

<mosaic_0001>
module attributes {stable_mosaic.version = 11 : i64} {
  func.func @conv_relu_pool_kernel(%arg0: i32, %arg1: memref<256x216xbf16, #tpu.memory_space<vmem>>, %arg2: memref<216x512xbf16, #tpu.memory_space<vmem>>, %arg3: memref<1x512xf32, #tpu.memory_space<vmem>>, %arg4: memref<16x256xf32, #tpu.memory_space<vmem>>, %arg5: memref<512x32xf32, #tpu.memory_space<vmem>>, %arg6: memref<2x8x32xf32, #tpu.memory_space<vmem>>) attributes {dimension_semantics = [#tpu.dimension_semantics<parallel>], iteration_bounds = array<i64: 1>, scalar_prefetch = 0 : i64, scratch_operands = 0 : i64, tpu.core_type = #tpu.core_type<tc>, window_params = [{transform_indices = @transform_0, window_bounds = array<i64: 256, 216>}, {pipeline_mode = #tpu.pipeline_mode<synchronous>, transform_indices = @transform_1, window_bounds = array<i64: 216, 512>}, {pipeline_mode = #tpu.pipeline_mode<synchronous>, transform_indices = @transform_2, window_bounds = array<i64: 1, 512>}, {pipeline_mode = #tpu.pipeline_mode<synchronous>, transform_indices = @transform_3, window_bounds = array<i64: 16, 256>}, {pipeline_mode = #tpu.pipeline_mode<synchronous>, transform_indices = @transform_4, window_bounds = array<i64: 512, 32>}, {transform_indices = @transform_5, window_bounds = array<i64: 2, 8, 32>}]} {
    %c0 = arith.constant 0 : index
    %c0_0 = arith.constant 0 : index
    %0 = vector.load %arg1[%c0, %c0_0] : memref<256x216xbf16, #tpu.memory_space<vmem>>, vector<256x216xbf16>
    %c0_1 = arith.constant 0 : index
    %c0_2 = arith.constant 0 : index
    %1 = vector.load %arg2[%c0_1, %c0_2] : memref<216x512xbf16, #tpu.memory_space<vmem>>, vector<216x512xbf16>
    %cst = arith.constant dense<0.000000e+00> : vector<256x512xf32>
    %2 = tpu.matmul %0, %1, %cst {dimension_numbers = #tpu.dot_dimension_numbers<[1], [0], [0], [1], [0, 0, 1, 1], [], []>} : vector<256x216xbf16>, vector<216x512xbf16>, vector<256x512xf32> -> vector<256x512xf32>
    %c0_3 = arith.constant 0 : index
    %c0_4 = arith.constant 0 : index
    %3 = vector.load %arg3[%c0_3, %c0_4] : memref<1x512xf32, #tpu.memory_space<vmem>>, vector<1x512xf32>
    %4 = vector.broadcast %3 : vector<1x512xf32> to vector<256x512xf32>
    %5 = arith.addf %2, %4 : vector<256x512xf32>
    %cst_5 = arith.constant 0.000000e+00 : f32
    %6 = vector.broadcast %cst_5 : f32 to vector<256x512xf32>
    %7 = arith.maximumf %5, %6 : vector<256x512xf32>
    %c0_6 = arith.constant 0 : index
    %c0_7 = arith.constant 0 : index
    %8 = vector.load %arg4[%c0_6, %c0_7] : memref<16x256xf32, #tpu.memory_space<vmem>>, vector<16x256xf32>
    %cst_8 = arith.constant dense<0.000000e+00> : vector<16x512xf32>
    %9 = tpu.matmul %8, %7, %cst_8 {dimension_numbers = #tpu.dot_dimension_numbers<[1], [0], [0], [1], [0, 0, 1, 1], [], []>} : vector<16x256xf32>, vector<256x512xf32>, vector<16x512xf32> -> vector<16x512xf32>
    %c0_9 = arith.constant 0 : index
    %c0_10 = arith.constant 0 : index
    %10 = vector.load %arg5[%c0_9, %c0_10] : memref<512x32xf32, #tpu.memory_space<vmem>>, vector<512x32xf32>
    %cst_11 = arith.constant dense<0.000000e+00> : vector<16x32xf32>
    %11 = tpu.matmul %9, %10, %cst_11 {dimension_numbers = #tpu.dot_dimension_numbers<[1], [0], [0], [1], [0, 0, 1, 1], [], []>} : vector<16x512xf32>, vector<512x32xf32>, vector<16x32xf32> -> vector<16x32xf32>
    %12 = vector.shape_cast %11 : vector<16x32xf32> to vector<2x8x32xf32>
    %c0_12 = arith.constant 0 : index
    %c0_13 = arith.constant 0 : index
    %c0_14 = arith.constant 0 : index
    %13 = vector.load %arg6[%c0_12, %c0_13, %c0_14] : memref<2x8x32xf32, #tpu.memory_space<vmem>>, vector<2x8x32xf32>
    tpu.vector_store %arg6[%c0_12, %c0_13, %c0_14], %12 {strides = array<i32>} : memref<2x8x32xf32, #tpu.memory_space<vmem>>, vector<2x8x32xf32>,
    return
  }
  func.func @transform_0(%arg0: i32) -> (i32, i32) {
    %c0_i32 = arith.constant 0 : i32
    %c0_i32_0 = arith.constant 0 : i32
    return %arg0, %c0_i32 : i32, i32
  }
  func.func @transform_1(%arg0: i32) -> (i32, i32) {
    %c0_i32 = arith.constant 0 : i32
    %c0_i32_0 = arith.constant 0 : i32
    %c0_i32_1 = arith.constant 0 : i32
    return %c0_i32, %c0_i32_0 : i32, i32
  }
  func.func @transform_2(%arg0: i32) -> (i32, i32) {
    %c0_i32 = arith.constant 0 : i32
    %c0_i32_0 = arith.constant 0 : i32
    %c0_i32_1 = arith.constant 0 : i32
    return %c0_i32, %c0_i32_0 : i32, i32
  }
  func.func @transform_3(%arg0: i32) -> (i32, i32) {
    %c0_i32 = arith.constant 0 : i32
    %c0_i32_0 = arith.constant 0 : i32
    %c0_i32_1 = arith.constant 0 : i32
    return %c0_i32, %c0_i32_0 : i32, i32
  }
  func.func @transform_4(%arg0: i32) -> (i32, i32) {
    %c0_i32 = arith.constant 0 : i32
    %c0_i32_0 = arith.constant 0 : i32
    %c0_i32_1 = arith.constant 0 : i32
    return %c0_i32, %c0_i32_0 : i32, i32
  }
  func.func @transform_5(%arg0: i32) -> (i32, i32, i32) {
    %c0_i32 = arith.constant 0 : i32
    %c0_i32_0 = arith.constant 0 : i32
    %c0_i32_1 = arith.constant 0 : i32
    return %arg0, %c0_i32, %c0_i32_0 : i32, i32, i32
  }
}

module attributes {stable_mosaic.version = 11 : i64} {
  func.func @kernel(%arg0: i32, %arg1: memref<2x8x32xf32, #tpu.memory_space<vmem>>, %arg2: memref<64x128xbf16, #tpu.memory_space<vmem>>, %arg3: memref<1x128xf32, #tpu.memory_space<vmem>>, %arg4: memref<64x128xbf16, #tpu.memory_space<vmem>>, %arg5: memref<1x128xf32, #tpu.memory_space<vmem>>, %arg6: memref<32x16xbf16, #tpu.memory_space<vmem>>, %arg7: memref<1x16xf32, #tpu.memory_space<vmem>>, %arg8: memref<1x16xf32, #tpu.memory_space<vmem>>, %arg9: memref<1x1xf32, #tpu.memory_space<vmem>>, %arg10: memref<2x1xf32, #tpu.memory_space<vmem>>) attributes {dimension_semantics = [#tpu.dimension_semantics<arbitrary>], iteration_bounds = array<i64: 1>, scalar_prefetch = 0 : i64, scratch_operands = 0 : i64, tpu.core_type = #tpu.core_type<tc>, window_params = [{pipeline_mode = #tpu.pipeline_mode<synchronous>, transform_indices = @transform_0, window_bounds = array<i64: 2, 8, 32>}, {pipeline_mode = #tpu.pipeline_mode<synchronous>, transform_indices = @transform_1, window_bounds = array<i64: 64, 128>}, {pipeline_mode = #tpu.pipeline_mode<synchronous>, transform_indices = @transform_2, window_bounds = array<i64: 1, 128>}, {pipeline_mode = #tpu.pipeline_mode<synchronous>, transform_indices = @transform_3, window_bounds = array<i64: 64, 128>}, {pipeline_mode = #tpu.pipeline_mode<synchronous>, transform_indices = @transform_4, window_bounds = array<i64: 1, 128>}, {pipeline_mode = #tpu.pipeline_mode<synchronous>, transform_indices = @transform_5, window_bounds = array<i64: 32, 16>}, {pipeline_mode = #tpu.pipeline_mode<synchronous>, transform_indices = @transform_6, window_bounds = array<i64: 1, 16>}, {pipeline_mode = #tpu.pipeline_mode<synchronous>, transform_indices = @transform_7, window_bounds = array<i64: 1, 16>}, {pipeline_mode = #tpu.pipeline_mode<synchronous>, transform_indices = @transform_8, window_bounds = array<i64: 1, 1>}, {pipeline_mode = #tpu.pipeline_mode<synchronous>, transform_indices = @transform_9, window_bounds = array<i64: 2, 1>}]} {
    %c0 = arith.constant 0 : index
    %c0_0 = arith.constant 0 : index
    %c0_1 = arith.constant 0 : index
    %0 = vector.load %arg1[%c0, %c0_0, %c0_1] : memref<2x8x32xf32, #tpu.memory_space<vmem>>, vector<2x8x32xf32>
    %cst = arith.constant 0.000000e+00 : f32
    %1 = vector.broadcast %cst : f32 to vector<2x32xf32>
    %cst_2 = arith.constant 0.000000e+00 : f32
    %2 = vector.broadcast %cst_2 : f32 to vector<2x32xf32>
    %cst_3 = arith.constant 0.000000e+00 : f32
    %3 = vector.broadcast %cst_3 : f32 to vector<2x32xf32>
    %cst_4 = arith.constant 0.000000e+00 : f32
    %4 = vector.broadcast %cst_4 : f32 to vector<2x32xf32>
    %5 = vector.extract_strided_slice %0 {offsets = [0, 0, 0], sizes = [2, 1, 32], strides = [1, 1, 1]} : vector<2x8x32xf32> to vector<2x1x32xf32>
    %6 = vector.shape_cast %5 : vector<2x1x32xf32> to vector<2x32xf32>
    %7 = tpu.concatenate %6, %1 in 1 : vector<2x32xf32>, vector<2x32xf32> -> vector<2x64xf32>
    %8 = arith.truncf %7 : vector<2x64xf32> to vector<2x64xbf16>
    %c0_5 = arith.constant 0 : index
    %c0_6 = arith.constant 0 : index
    %9 = vector.load %arg2[%c0_5, %c0_6] : memref<64x128xbf16, #tpu.memory_space<vmem>>, vector<64x128xbf16>
    %cst_7 = arith.constant dense<0.000000e+00> : vector<2x128xf32>
    %10 = tpu.matmul %8, %9, %cst_7 {dimension_numbers = #tpu.dot_dimension_numbers<[1], [0], [0], [1], [0, 0, 1, 1], [], []>} : vector<2x64xbf16>, vector<64x128xbf16>, vector<2x128xf32> -> vector<2x128xf32>
    %c0_8 = arith.constant 0 : index
    %c0_9 = arith.constant 0 : index
    %11 = vector.load %arg3[%c0_8, %c0_9] : memref<1x128xf32, #tpu.memory_space<vmem>>, vector<1x128xf32>
    %12 = vector.broadcast %11 : vector<1x128xf32> to vector<2x128xf32>
    %13 = arith.addf %10, %12 : vector<2x128xf32>
    %14 = vector.extract_strided_slice %13 {offsets = [0, 0], sizes = [2, 96], strides = [1, 1]} : vector<2x128xf32> to vector<2x96xf32>
    %15 = arith.negf %14 : vector<2x96xf32>
    %16 = math.exp %15 : vector<2x96xf32>
    %cst_10 = arith.constant 1.000000e+00 : f32
    %17 = vector.broadcast %cst_10 : f32 to vector<2x96xf32>
    %18 = arith.addf %17, %16 : vector<2x96xf32>
    %19 = arith.divf %17, %18 : vector<2x96xf32>
    %20 = vector.extract_strided_slice %13 {offsets = [0, 96], sizes = [2, 32], strides = [1, 1]} : vector<2x128xf32> to vector<2x32xf32>
    %21 = math.tanh %20 : vector<2x32xf32>
    %22 = vector.extract_strided_slice %19 {offsets = [0, 0], sizes = [2, 32], strides = [1, 1]} : vector<2x96xf32> to vector<2x32xf32>
    %23 = vector.extract_strided_slice %19 {offsets = [0, 32], sizes = [2, 32], strides = [1, 1]} : vector<2x96xf32> to vector<2x32xf32>
    %24 = vector.extract_strided_slice %19 {offsets = [0, 64], sizes = [2, 32], strides = [1, 1]} : vector<2x96xf32> to vector<2x32xf32>
    %25 = arith.mulf %23, %3 : vector<2x32xf32>
    %26 = arith.mulf %22, %21 : vector<2x32xf32>
    %27 = arith.addf %25, %26 : vector<2x32xf32>
    %28 = math.tanh %27 : vector<2x32xf32>
    %29 = arith.mulf %24, %28 : vector<2x32xf32>
    %30 = tpu.concatenate %29, %2 in 1 : vector<2x32xf32>, vector<2x32xf32> -> vector<2x64xf32>
    %31 = arith.truncf %30 : vector<2x64xf32> to vector<2x64xbf16>
    %c0_11 = arith.constant 0 : index
    %c0_12 = arith.constant 0 : index
    %32 = vector.load %arg4[%c0_11, %c0_12] : memref<64x128xbf16, #tpu.memory_space<vmem>>, vector<64x128xbf16>
    %cst_13 = arith.constant dense<0.000000e+00> : vector<2x128xf32>
    %33 = tpu.matmul %31, %32, %cst_13 {dimension_numbers = #tpu.dot_dimension_numbers<[1], [0], [0], [1], [0, 0, 1, 1], [], []>} : vector<2x64xbf16>, vector<64x128xbf16>, vector<2x128xf32> -> vector<2x128xf32>
    %c0_14 = arith.constant 0 : index
    %c0_15 = arith.constant 0 : index
    %34 = vector.load %arg5[%c0_14, %c0_15] : memref<1x128xf32, #tpu.memory_space<vmem>>, vector<1x128xf32>
    %35 = vector.broadcast %34 : vector<1x128xf32> to vector<2x128xf32>
    %36 = arith.addf %33, %35 : vector<2x128xf32>
    %37 = vector.extract_strided_slice %36 {offsets = [0, 0], sizes = [2, 96], strides = [1, 1]} : vector<2x128xf32> to vector<2x96xf32>
    %38 = arith.negf %37 : vector<2x96xf32>
    %39 = math.exp %38 : vector<2x96xf32>
    %cst_16 = arith.constant 1.000000e+00 : f32
    %40 = vector.broadcast %cst_16 : f32 to vector<2x96xf32>
    %41 = arith.addf %40, %39 : vector<2x96xf32>
    %42 = arith.divf %40, %41 : vector<2x96xf32>
    %43 = vector.extract_strided_slice %36 {offsets = [0, 96], sizes = [2, 32], strides = [1, 1]} : vector<2x128xf32> to vector<2x32xf32>
    %44 = math.tanh %43 : vector<2x32xf32>
    %45 = vector.extract_strided_slice %42 {offsets = [0, 0], sizes = [2, 32], strides = [1, 1]} : vector<2x96xf32> to vector<2x32xf32>
    %46 = vector.extract_strided_slice %42 {offsets = [0, 32], sizes = [2, 32], strides = [1, 1]} : vector<2x96xf32> to vector<2x32xf32>
    %47 = vector.extract_strided_slice %42 {offsets = [0, 64], sizes = [2, 32], strides = [1, 1]} : vector<2x96xf32> to vector<2x32xf32>
    %48 = arith.mulf %46, %4 : vector<2x32xf32>
    %49 = arith.mulf %45, %44 : vector<2x32xf32>
    %50 = arith.addf %48, %49 : vector<2x32xf32>
    %51 = math.tanh %50 : vector<2x32xf32>
    %52 = arith.mulf %47, %51 : vector<2x32xf32>
    %53 = vector.extract_strided_slice %0 {offsets = [0, 1, 0], sizes = [2, 1, 32], strides = [1, 1, 1]} : vector<2x8x32xf32> to vector<2x1x32xf32>
    %54 = vector.shape_cast %53 : vector<2x1x32xf32> to vector<2x32xf32>
    %55 = tpu.concatenate %54, %29 in 1 : vector<2x32xf32>, vector<2x32xf32> -> vector<2x64xf32>
    %56 = arith.truncf %55 : vector<2x64xf32> to vector<2x64xbf16>
    %c0_17 = arith.constant 0 : index
    %c0_18 = arith.constant 0 : index
    %57 = vector.load %arg2[%c0_17, %c0_18] : memref<64x128xbf16, #tpu.memory_space<vmem>>, vector<64x128xbf16>
    %cst_19 = arith.constant dense<0.000000e+00> : vector<2x128xf32>
    %58 = tpu.matmul %56, %57, %cst_19 {dimension_numbers = #tpu.dot_dimension_numbers<[1], [0], [0], [1], [0, 0, 1, 1], [], []>} : vector<2x64xbf16>, vector<64x128xbf16>, vector<2x128xf32> -> vector<2x128xf32>
    %c0_20 = arith.constant 0 : index
    %c0_21 = arith.constant 0 : index
    %59 = vector.load %arg3[%c0_20, %c0_21] : memref<1x128xf32, #tpu.memory_space<vmem>>, vector<1x128xf32>
    %60 = vector.broadcast %59 : vector<1x128xf32> to vector<2x128xf32>
    %61 = arith.addf %58, %60 : vector<2x128xf32>
    %62 = vector.extract_strided_slice %61 {offsets = [0, 0], sizes = [2, 96], strides = [1, 1]} : vector<2x128xf32> to vector<2x96xf32>
    %63 = arith.negf %62 : vector<2x96xf32>
    %64 = math.exp %63 : vector<2x96xf32>
    %cst_22 = arith.constant 1.000000e+00 : f32
    %65 = vector.broadcast %cst_22 : f32 to vector<2x96xf32>
    %66 = arith.addf %65, %64 : vector<2x96xf32>
    %67 = arith.divf %65, %66 : vector<2x96xf32>
    %68 = vector.extract_strided_slice %61 {offsets = [0, 96], sizes = [2, 32], strides = [1, 1]} : vector<2x128xf32> to vector<2x32xf32>
    %69 = math.tanh %68 : vector<2x32xf32>
    %70 = vector.extract_strided_slice %67 {offsets = [0, 0], sizes = [2, 32], strides = [1, 1]} : vector<2x96xf32> to vector<2x32xf32>
    %71 = vector.extract_strided_slice %67 {offsets = [0, 32], sizes = [2, 32], strides = [1, 1]} : vector<2x96xf32> to vector<2x32xf32>
    %72 = vector.extract_strided_slice %67 {offsets = [0, 64], sizes = [2, 32], strides = [1, 1]} : vector<2x96xf32> to vector<2x32xf32>
    %73 = arith.mulf %71, %27 : vector<2x32xf32>
    %74 = arith.mulf %70, %69 : vector<2x32xf32>
    %75 = arith.addf %73, %74 : vector<2x32xf32>
    %76 = math.tanh %75 : vector<2x32xf32>
    %77 = arith.mulf %72, %76 : vector<2x32xf32>
    %78 = tpu.concatenate %77, %52 in 1 : vector<2x32xf32>, vector<2x32xf32> -> vector<2x64xf32>
    %79 = arith.truncf %78 : vector<2x64xf32> to vector<2x64xbf16>
    %c0_23 = arith.constant 0 : index
    %c0_24 = arith.constant 0 : index
    %80 = vector.load %arg4[%c0_23, %c0_24] : memref<64x128xbf16, #tpu.memory_space<vmem>>, vector<64x128xbf16>
    %cst_25 = arith.constant dense<0.000000e+00> : vector<2x128xf32>
    %81 = tpu.matmul %79, %80, %cst_25 {dimension_numbers = #tpu.dot_dimension_numbers<[1], [0], [0], [1], [0, 0, 1, 1], [], []>} : vector<2x64xbf16>, vector<64x128xbf16>, vector<2x128xf32> -> vector<2x128xf32>
    %c0_26 = arith.constant 0 : index
    %c0_27 = arith.constant 0 : index
    %82 = vector.load %arg5[%c0_26, %c0_27] : memref<1x128xf32, #tpu.memory_space<vmem>>, vector<1x128xf32>
    %83 = vector.broadcast %82 : vector<1x128xf32> to vector<2x128xf32>
    %84 = arith.addf %81, %83 : vector<2x128xf32>
    %85 = vector.extract_strided_slice %84 {offsets = [0, 0], sizes = [2, 96], strides = [1, 1]} : vector<2x128xf32> to vector<2x96xf32>
    %86 = arith.negf %85 : vector<2x96xf32>
    %87 = math.exp %86 : vector<2x96xf32>
    %cst_28 = arith.constant 1.000000e+00 : f32
    %88 = vector.broadcast %cst_28 : f32 to vector<2x96xf32>
    %89 = arith.addf %88, %87 : vector<2x96xf32>
    %90 = arith.divf %88, %89 : vector<2x96xf32>
    %91 = vector.extract_strided_slice %84 {offsets = [0, 96], sizes = [2, 32], strides = [1, 1]} : vector<2x128xf32> to vector<2x32xf32>
    %92 = math.tanh %91 : vector<2x32xf32>
    %93 = vector.extract_strided_slice %90 {offsets = [0, 0], sizes = [2, 32], strides = [1, 1]} : vector<2x96xf32> to vector<2x32xf32>
    %94 = vector.extract_strided_slice %90 {offsets = [0, 32], sizes = [2, 32], strides = [1, 1]} : vector<2x96xf32> to vector<2x32xf32>
    %95 = vector.extract_strided_slice %90 {offsets = [0, 64], sizes = [2, 32], strides = [1, 1]} : vector<2x96xf32> to vector<2x32xf32>
    %96 = arith.mulf %94, %50 : vector<2x32xf32>
    %97 = arith.mulf %93, %92 : vector<2x32xf32>
    %98 = arith.addf %96, %97 : vector<2x32xf32>
    %99 = math.tanh %98 : vector<2x32xf32>
    %100 = arith.mulf %95, %99 : vector<2x32xf32>
    %101 = vector.extract_strided_slice %0 {offsets = [0, 2, 0], sizes = [2, 1, 32], strides = [1, 1, 1]} : vector<2x8x32xf32> to vector<2x1x32xf32>
    %102 = vector.shape_cast %101 : vector<2x1x32xf32> to vector<2x32xf32>
    %103 = tpu.concatenate %102, %77 in 1 : vector<2x32xf32>, vector<2x32xf32> -> vector<2x64xf32>
    %104 = arith.truncf %103 : vector<2x64xf32> to vector<2x64xbf16>
    %c0_29 = arith.constant 0 : index
    %c0_30 = arith.constant 0 : index
    %105 = vector.load %arg2[%c0_29, %c0_30] : memref<64x128xbf16, #tpu.memory_space<vmem>>, vector<64x128xbf16>
    %cst_31 = arith.constant dense<0.000000e+00> : vector<2x128xf32>
    %106 = tpu.matmul %104, %105, %cst_31 {dimension_numbers = #tpu.dot_dimension_numbers<[1], [0], [0], [1], [0, 0, 1, 1], [], []>} : vector<2x64xbf16>, vector<64x128xbf16>, vector<2x128xf32> -> vector<2x128xf32>
    %c0_32 = arith.constant 0 : index
    %c0_33 = arith.constant 0 : index
    %107 = vector.load %arg3[%c0_32, %c0_33] : memref<1x128xf32, #tpu.memory_space<vmem>>, vector<1x128xf32>
    %108 = vector.broadcast %107 : vector<1x128xf32> to vector<2x128xf32>
    %109 = arith.addf %106, %108 : vector<2x128xf32>
    %110 = vector.extract_strided_slice %109 {offsets = [0, 0], sizes = [2, 96], strides = [1, 1]} : vector<2x128xf32> to vector<2x96xf32>
    %111 = arith.negf %110 : vector<2x96xf32>
    %112 = math.exp %111 : vector<2x96xf32>
    %cst_34 = arith.constant 1.000000e+00 : f32
    %113 = vector.broadcast %cst_34 : f32 to vector<2x96xf32>
    %114 = arith.addf %113, %112 : vector<2x96xf32>
    %115 = arith.divf %113, %114 : vector<2x96xf32>
    %116 = vector.extract_strided_slice %109 {offsets = [0, 96], sizes = [2, 32], strides = [1, 1]} : vector<2x128xf32> to vector<2x32xf32>
    %117 = math.tanh %116 : vector<2x32xf32>
    %118 = vector.extract_strided_slice %115 {offsets = [0, 0], sizes = [2, 32], strides = [1, 1]} : vector<2x96xf32> to vector<2x32xf32>
    %119 = vector.extract_strided_slice %115 {offsets = [0, 32], sizes = [2, 32], strides = [1, 1]} : vector<2x96xf32> to vector<2x32xf32>
    %120 = vector.extract_strided_slice %115 {offsets = [0, 64], sizes = [2, 32], strides = [1, 1]} : vector<2x96xf32> to vector<2x32xf32>
    %121 = arith.mulf %119, %75 : vector<2x32xf32>
    %122 = arith.mulf %118, %117 : vector<2x32xf32>
    %123 = arith.addf %121, %122 : vector<2x32xf32>
    %124 = math.tanh %123 : vector<2x32xf32>
    %125 = arith.mulf %120, %124 : vector<2x32xf32>
    %126 = tpu.concatenate %125, %100 in 1 : vector<2x32xf32>, vector<2x32xf32> -> vector<2x64xf32>
    %127 = arith.truncf %126 : vector<2x64xf32> to vector<2x64xbf16>
    %c0_35 = arith.constant 0 : index
    %c0_36 = arith.constant 0 : index
    %128 = vector.load %arg4[%c0_35, %c0_36] : memref<64x128xbf16, #tpu.memory_space<vmem>>, vector<64x128xbf16>
    %cst_37 = arith.constant dense<0.000000e+00> : vector<2x128xf32>
    %129 = tpu.matmul %127, %128, %cst_37 {dimension_numbers = #tpu.dot_dimension_numbers<[1], [0], [0], [1], [0, 0, 1, 1], [], []>} : vector<2x64xbf16>, vector<64x128xbf16>, vector<2x128xf32> -> vector<2x128xf32>
    %c0_38 = arith.constant 0 : index
    %c0_39 = arith.constant 0 : index
    %130 = vector.load %arg5[%c0_38, %c0_39] : memref<1x128xf32, #tpu.memory_space<vmem>>, vector<1x128xf32>
    %131 = vector.broadcast %130 : vector<1x128xf32> to vector<2x128xf32>
    %132 = arith.addf %129, %131 : vector<2x128xf32>
    %133 = vector.extract_strided_slice %132 {offsets = [0, 0], sizes = [2, 96], strides = [1, 1]} : vector<2x128xf32> to vector<2x96xf32>
    %134 = arith.negf %133 : vector<2x96xf32>
    %135 = math.exp %134 : vector<2x96xf32>
    %cst_40 = arith.constant 1.000000e+00 : f32
    %136 = vector.broadcast %cst_40 : f32 to vector<2x96xf32>
    %137 = arith.addf %136, %135 : vector<2x96xf32>
    %138 = arith.divf %136, %137 : vector<2x96xf32>
    %139 = vector.extract_strided_slice %132 {offsets = [0, 96], sizes = [2, 32], strides = [1, 1]} : vector<2x128xf32> to vector<2x32xf32>
    %140 = math.tanh %139 : vector<2x32xf32>
    %141 = vector.extract_strided_slice %138 {offsets = [0, 0], sizes = [2, 32], strides = [1, 1]} : vector<2x96xf32> to vector<2x32xf32>
    %142 = vector.extract_strided_slice %138 {offsets = [0, 32], sizes = [2, 32], strides = [1, 1]} : vector<2x96xf32> to vector<2x32xf32>
    %143 = vector.extract_strided_slice %138 {offsets = [0, 64], sizes = [2, 32], strides = [1, 1]} : vector<2x96xf32> to vector<2x32xf32>
    %144 = arith.mulf %142, %98 : vector<2x32xf32>
    %145 = arith.mulf %141, %140 : vector<2x32xf32>
    %146 = arith.addf %144, %145 : vector<2x32xf32>
    %147 = math.tanh %146 : vector<2x32xf32>
    %148 = arith.mulf %143, %147 : vector<2x32xf32>
    %149 = vector.extract_strided_slice %0 {offsets = [0, 3, 0], sizes = [2, 1, 32], strides = [1, 1, 1]} : vector<2x8x32xf32> to vector<2x1x32xf32>
    %150 = vector.shape_cast %149 : vector<2x1x32xf32> to vector<2x32xf32>
    %151 = tpu.concatenate %150, %125 in 1 : vector<2x32xf32>, vector<2x32xf32> -> vector<2x64xf32>
    %152 = arith.truncf %151 : vector<2x64xf32> to vector<2x64xbf16>
    %c0_41 = arith.constant 0 : index
    %c0_42 = arith.constant 0 : index
    %153 = vector.load %arg2[%c0_41, %c0_42] : memref<64x128xbf16, #tpu.memory_space<vmem>>, vector<64x128xbf16>
    %cst_43 = arith.constant dense<0.000000e+00> : vector<2x128xf32>
    %154 = tpu.matmul %152, %153, %cst_43 {dimension_numbers = #tpu.dot_dimension_numbers<[1], [0], [0], [1], [0, 0, 1, 1], [], []>} : vector<2x64xbf16>, vector<64x128xbf16>, vector<2x128xf32> -> vector<2x128xf32>
    %c0_44 = arith.constant 0 : index
    %c0_45 = arith.constant 0 : index
    %155 = vector.load %arg3[%c0_44, %c0_45] : memref<1x128xf32, #tpu.memory_space<vmem>>, vector<1x128xf32>
    %156 = vector.broadcast %155 : vector<1x128xf32> to vector<2x128xf32>
    %157 = arith.addf %154, %156 : vector<2x128xf32>
    %158 = vector.extract_strided_slice %157 {offsets = [0, 0], sizes = [2, 96], strides = [1, 1]} : vector<2x128xf32> to vector<2x96xf32>
    %159 = arith.negf %158 : vector<2x96xf32>
    %160 = math.exp %159 : vector<2x96xf32>
    %cst_46 = arith.constant 1.000000e+00 : f32
    %161 = vector.broadcast %cst_46 : f32 to vector<2x96xf32>
    %162 = arith.addf %161, %160 : vector<2x96xf32>
    %163 = arith.divf %161, %162 : vector<2x96xf32>
    %164 = vector.extract_strided_slice %157 {offsets = [0, 96], sizes = [2, 32], strides = [1, 1]} : vector<2x128xf32> to vector<2x32xf32>
    %165 = math.tanh %164 : vector<2x32xf32>
    %166 = vector.extract_strided_slice %163 {offsets = [0, 0], sizes = [2, 32], strides = [1, 1]} : vector<2x96xf32> to vector<2x32xf32>
    %167 = vector.extract_strided_slice %163 {offsets = [0, 32], sizes = [2, 32], strides = [1, 1]} : vector<2x96xf32> to vector<2x32xf32>
    %168 = vector.extract_strided_slice %163 {offsets = [0, 64], sizes = [2, 32], strides = [1, 1]} : vector<2x96xf32> to vector<2x32xf32>
    %169 = arith.mulf %167, %123 : vector<2x32xf32>
    %170 = arith.mulf %166, %165 : vector<2x32xf32>
    %171 = arith.addf %169, %170 : vector<2x32xf32>
    %172 = math.tanh %171 : vector<2x32xf32>
    %173 = arith.mulf %168, %172 : vector<2x32xf32>
    %174 = tpu.concatenate %173, %148 in 1 : vector<2x32xf32>, vector<2x32xf32> -> vector<2x64xf32>
    %175 = arith.truncf %174 : vector<2x64xf32> to vector<2x64xbf16>
    %c0_47 = arith.constant 0 : index
    %c0_48 = arith.constant 0 : index
    %176 = vector.load %arg4[%c0_47, %c0_48] : memref<64x128xbf16, #tpu.memory_space<vmem>>, vector<64x128xbf16>
    %cst_49 = arith.constant dense<0.000000e+00> : vector<2x128xf32>
    %177 = tpu.matmul %175, %176, %cst_49 {dimension_numbers = #tpu.dot_dimension_numbers<[1], [0], [0], [1], [0, 0, 1, 1], [], []>} : vector<2x64xbf16>, vector<64x128xbf16>, vector<2x128xf32> -> vector<2x128xf32>
    %c0_50 = arith.constant 0 : index
    %c0_51 = arith.constant 0 : index
    %178 = vector.load %arg5[%c0_50, %c0_51] : memref<1x128xf32, #tpu.memory_space<vmem>>, vector<1x128xf32>
    %179 = vector.broadcast %178 : vector<1x128xf32> to vector<2x128xf32>
    %180 = arith.addf %177, %179 : vector<2x128xf32>
    %181 = vector.extract_strided_slice %180 {offsets = [0, 0], sizes = [2, 96], strides = [1, 1]} : vector<2x128xf32> to vector<2x96xf32>
    %182 = arith.negf %181 : vector<2x96xf32>
    %183 = math.exp %182 : vector<2x96xf32>
    %cst_52 = arith.constant 1.000000e+00 : f32
    %184 = vector.broadcast %cst_52 : f32 to vector<2x96xf32>
    %185 = arith.addf %184, %183 : vector<2x96xf32>
    %186 = arith.divf %184, %185 : vector<2x96xf32>
    %187 = vector.extract_strided_slice %180 {offsets = [0, 96], sizes = [2, 32], strides = [1, 1]} : vector<2x128xf32> to vector<2x32xf32>
    %188 = math.tanh %187 : vector<2x32xf32>
    %189 = vector.extract_strided_slice %186 {offsets = [0, 0], sizes = [2, 32], strides = [1, 1]} : vector<2x96xf32> to vector<2x32xf32>
    %190 = vector.extract_strided_slice %186 {offsets = [0, 32], sizes = [2, 32], strides = [1, 1]} : vector<2x96xf32> to vector<2x32xf32>
    %191 = vector.extract_strided_slice %186 {offsets = [0, 64], sizes = [2, 32], strides = [1, 1]} : vector<2x96xf32> to vector<2x32xf32>
    %192 = arith.mulf %190, %146 : vector<2x32xf32>
    %193 = arith.mulf %189, %188 : vector<2x32xf32>
    %194 = arith.addf %192, %193 : vector<2x32xf32>
    %195 = math.tanh %194 : vector<2x32xf32>
    %196 = arith.mulf %191, %195 : vector<2x32xf32>
    %197 = vector.extract_strided_slice %0 {offsets = [0, 4, 0], sizes = [2, 1, 32], strides = [1, 1, 1]} : vector<2x8x32xf32> to vector<2x1x32xf32>
    %198 = vector.shape_cast %197 : vector<2x1x32xf32> to vector<2x32xf32>
    %199 = tpu.concatenate %198, %173 in 1 : vector<2x32xf32>, vector<2x32xf32> -> vector<2x64xf32>
    %200 = arith.truncf %199 : vector<2x64xf32> to vector<2x64xbf16>
    %c0_53 = arith.constant 0 : index
    %c0_54 = arith.constant 0 : index
    %201 = vector.load %arg2[%c0_53, %c0_54] : memref<64x128xbf16, #tpu.memory_space<vmem>>, vector<64x128xbf16>
    %cst_55 = arith.constant dense<0.000000e+00> : vector<2x128xf32>
    %202 = tpu.matmul %200, %201, %cst_55 {dimension_numbers = #tpu.dot_dimension_numbers<[1], [0], [0], [1], [0, 0, 1, 1], [], []>} : vector<2x64xbf16>, vector<64x128xbf16>, vector<2x128xf32> -> vector<2x128xf32>
    %c0_56 = arith.constant 0 : index
    %c0_57 = arith.constant 0 : index
    %203 = vector.load %arg3[%c0_56, %c0_57] : memref<1x128xf32, #tpu.memory_space<vmem>>, vector<1x128xf32>
    %204 = vector.broadcast %203 : vector<1x128xf32> to vector<2x128xf32>
    %205 = arith.addf %202, %204 : vector<2x128xf32>
    %206 = vector.extract_strided_slice %205 {offsets = [0, 0], sizes = [2, 96], strides = [1, 1]} : vector<2x128xf32> to vector<2x96xf32>
    %207 = arith.negf %206 : vector<2x96xf32>
    %208 = math.exp %207 : vector<2x96xf32>
    %cst_58 = arith.constant 1.000000e+00 : f32
    %209 = vector.broadcast %cst_58 : f32 to vector<2x96xf32>
    %210 = arith.addf %209, %208 : vector<2x96xf32>
    %211 = arith.divf %209, %210 : vector<2x96xf32>
    %212 = vector.extract_strided_slice %205 {offsets = [0, 96], sizes = [2, 32], strides = [1, 1]} : vector<2x128xf32> to vector<2x32xf32>
    %213 = math.tanh %212 : vector<2x32xf32>
    %214 = vector.extract_strided_slice %211 {offsets = [0, 0], sizes = [2, 32], strides = [1, 1]} : vector<2x96xf32> to vector<2x32xf32>
    %215 = vector.extract_strided_slice %211 {offsets = [0, 32], sizes = [2, 32], strides = [1, 1]} : vector<2x96xf32> to vector<2x32xf32>
    %216 = vector.extract_strided_slice %211 {offsets = [0, 64], sizes = [2, 32], strides = [1, 1]} : vector<2x96xf32> to vector<2x32xf32>
    %217 = arith.mulf %215, %171 : vector<2x32xf32>
    %218 = arith.mulf %214, %213 : vector<2x32xf32>
    %219 = arith.addf %217, %218 : vector<2x32xf32>
    %220 = math.tanh %219 : vector<2x32xf32>
    %221 = arith.mulf %216, %220 : vector<2x32xf32>
    %222 = tpu.concatenate %221, %196 in 1 : vector<2x32xf32>, vector<2x32xf32> -> vector<2x64xf32>
    %223 = arith.truncf %222 : vector<2x64xf32> to vector<2x64xbf16>
    %c0_59 = arith.constant 0 : index
    %c0_60 = arith.constant 0 : index
    %224 = vector.load %arg4[%c0_59, %c0_60] : memref<64x128xbf16, #tpu.memory_space<vmem>>, vector<64x128xbf16>
    %cst_61 = arith.constant dense<0.000000e+00> : vector<2x128xf32>
    %225 = tpu.matmul %223, %224, %cst_61 {dimension_numbers = #tpu.dot_dimension_numbers<[1], [0], [0], [1], [0, 0, 1, 1], [], []>} : vector<2x64xbf16>, vector<64x128xbf16>, vector<2x128xf32> -> vector<2x128xf32>
    %c0_62 = arith.constant 0 : index
    %c0_63 = arith.constant 0 : index
    %226 = vector.load %arg5[%c0_62, %c0_63] : memref<1x128xf32, #tpu.memory_space<vmem>>, vector<1x128xf32>
    %227 = vector.broadcast %226 : vector<1x128xf32> to vector<2x128xf32>
    %228 = arith.addf %225, %227 : vector<2x128xf32>
    %229 = vector.extract_strided_slice %228 {offsets = [0, 0], sizes = [2, 96], strides = [1, 1]} : vector<2x128xf32> to vector<2x96xf32>
    %230 = arith.negf %229 : vector<2x96xf32>
    %231 = math.exp %230 : vector<2x96xf32>
    %cst_64 = arith.constant 1.000000e+00 : f32
    %232 = vector.broadcast %cst_64 : f32 to vector<2x96xf32>
    %233 = arith.addf %232, %231 : vector<2x96xf32>
    %234 = arith.divf %232, %233 : vector<2x96xf32>
    %235 = vector.extract_strided_slice %228 {offsets = [0, 96], sizes = [2, 32], strides = [1, 1]} : vector<2x128xf32> to vector<2x32xf32>
    %236 = math.tanh %235 : vector<2x32xf32>
    %237 = vector.extract_strided_slice %234 {offsets = [0, 0], sizes = [2, 32], strides = [1, 1]} : vector<2x96xf32> to vector<2x32xf32>
    %238 = vector.extract_strided_slice %234 {offsets = [0, 32], sizes = [2, 32], strides = [1, 1]} : vector<2x96xf32> to vector<2x32xf32>
    %239 = vector.extract_strided_slice %234 {offsets = [0, 64], sizes = [2, 32], strides = [1, 1]} : vector<2x96xf32> to vector<2x32xf32>
    %240 = arith.mulf %238, %194 : vector<2x32xf32>
    %241 = arith.mulf %237, %236 : vector<2x32xf32>
    %242 = arith.addf %240, %241 : vector<2x32xf32>
    %243 = math.tanh %242 : vector<2x32xf32>
    %244 = arith.mulf %239, %243 : vector<2x32xf32>
    %245 = vector.extract_strided_slice %0 {offsets = [0, 5, 0], sizes = [2, 1, 32], strides = [1, 1, 1]} : vector<2x8x32xf32> to vector<2x1x32xf32>
    %246 = vector.shape_cast %245 : vector<2x1x32xf32> to vector<2x32xf32>
    %247 = tpu.concatenate %246, %221 in 1 : vector<2x32xf32>, vector<2x32xf32> -> vector<2x64xf32>
    %248 = arith.truncf %247 : vector<2x64xf32> to vector<2x64xbf16>
    %c0_65 = arith.constant 0 : index
    %c0_66 = arith.constant 0 : index
    %249 = vector.load %arg2[%c0_65, %c0_66] : memref<64x128xbf16, #tpu.memory_space<vmem>>, vector<64x128xbf16>
    %cst_67 = arith.constant dense<0.000000e+00> : vector<2x128xf32>
    %250 = tpu.matmul %248, %249, %cst_67 {dimension_numbers = #tpu.dot_dimension_numbers<[1], [0], [0], [1], [0, 0, 1, 1], [], []>} : vector<2x64xbf16>, vector<64x128xbf16>, vector<2x128xf32> -> vector<2x128xf32>
    %c0_68 = arith.constant 0 : index
    %c0_69 = arith.constant 0 : index
    %251 = vector.load %arg3[%c0_68, %c0_69] : memref<1x128xf32, #tpu.memory_space<vmem>>, vector<1x128xf32>
    %252 = vector.broadcast %251 : vector<1x128xf32> to vector<2x128xf32>
    %253 = arith.addf %250, %252 : vector<2x128xf32>
    %254 = vector.extract_strided_slice %253 {offsets = [0, 0], sizes = [2, 96], strides = [1, 1]} : vector<2x128xf32> to vector<2x96xf32>
    %255 = arith.negf %254 : vector<2x96xf32>
    %256 = math.exp %255 : vector<2x96xf32>
    %cst_70 = arith.constant 1.000000e+00 : f32
    %257 = vector.broadcast %cst_70 : f32 to vector<2x96xf32>
    %258 = arith.addf %257, %256 : vector<2x96xf32>
    %259 = arith.divf %257, %258 : vector<2x96xf32>
    %260 = vector.extract_strided_slice %253 {offsets = [0, 96], sizes = [2, 32], strides = [1, 1]} : vector<2x128xf32> to vector<2x32xf32>
    %261 = math.tanh %260 : vector<2x32xf32>
    %262 = vector.extract_strided_slice %259 {offsets = [0, 0], sizes = [2, 32], strides = [1, 1]} : vector<2x96xf32> to vector<2x32xf32>
    %263 = vector.extract_strided_slice %259 {offsets = [0, 32], sizes = [2, 32], strides = [1, 1]} : vector<2x96xf32> to vector<2x32xf32>
    %264 = vector.extract_strided_slice %259 {offsets = [0, 64], sizes = [2, 32], strides = [1, 1]} : vector<2x96xf32> to vector<2x32xf32>
    %265 = arith.mulf %263, %219 : vector<2x32xf32>
    %266 = arith.mulf %262, %261 : vector<2x32xf32>
    %267 = arith.addf %265, %266 : vector<2x32xf32>
    %268 = math.tanh %267 : vector<2x32xf32>
    %269 = arith.mulf %264, %268 : vector<2x32xf32>
    %270 = tpu.concatenate %269, %244 in 1 : vector<2x32xf32>, vector<2x32xf32> -> vector<2x64xf32>
    %271 = arith.truncf %270 : vector<2x64xf32> to vector<2x64xbf16>
    %c0_71 = arith.constant 0 : index
    %c0_72 = arith.constant 0 : index
    %272 = vector.load %arg4[%c0_71, %c0_72] : memref<64x128xbf16, #tpu.memory_space<vmem>>, vector<64x128xbf16>
    %cst_73 = arith.constant dense<0.000000e+00> : vector<2x128xf32>
    %273 = tpu.matmul %271, %272, %cst_73 {dimension_numbers = #tpu.dot_dimension_numbers<[1], [0], [0], [1], [0, 0, 1, 1], [], []>} : vector<2x64xbf16>, vector<64x128xbf16>, vector<2x128xf32> -> vector<2x128xf32>
    %c0_74 = arith.constant 0 : index
    %c0_75 = arith.constant 0 : index
    %274 = vector.load %arg5[%c0_74, %c0_75] : memref<1x128xf32, #tpu.memory_space<vmem>>, vector<1x128xf32>
    %275 = vector.broadcast %274 : vector<1x128xf32> to vector<2x128xf32>
    %276 = arith.addf %273, %275 : vector<2x128xf32>
    %277 = vector.extract_strided_slice %276 {offsets = [0, 0], sizes = [2, 96], strides = [1, 1]} : vector<2x128xf32> to vector<2x96xf32>
    %278 = arith.negf %277 : vector<2x96xf32>
    %279 = math.exp %278 : vector<2x96xf32>
    %cst_76 = arith.constant 1.000000e+00 : f32
    %280 = vector.broadcast %cst_76 : f32 to vector<2x96xf32>
    %281 = arith.addf %280, %279 : vector<2x96xf32>
    %282 = arith.divf %280, %281 : vector<2x96xf32>
    %283 = vector.extract_strided_slice %276 {offsets = [0, 96], sizes = [2, 32], strides = [1, 1]} : vector<2x128xf32> to vector<2x32xf32>
    %284 = math.tanh %283 : vector<2x32xf32>
    %285 = vector.extract_strided_slice %282 {offsets = [0, 0], sizes = [2, 32], strides = [1, 1]} : vector<2x96xf32> to vector<2x32xf32>
    %286 = vector.extract_strided_slice %282 {offsets = [0, 32], sizes = [2, 32], strides = [1, 1]} : vector<2x96xf32> to vector<2x32xf32>
    %287 = vector.extract_strided_slice %282 {offsets = [0, 64], sizes = [2, 32], strides = [1, 1]} : vector<2x96xf32> to vector<2x32xf32>
    %288 = arith.mulf %286, %242 : vector<2x32xf32>
    %289 = arith.mulf %285, %284 : vector<2x32xf32>
    %290 = arith.addf %288, %289 : vector<2x32xf32>
    %291 = math.tanh %290 : vector<2x32xf32>
    %292 = arith.mulf %287, %291 : vector<2x32xf32>
    %293 = vector.extract_strided_slice %0 {offsets = [0, 6, 0], sizes = [2, 1, 32], strides = [1, 1, 1]} : vector<2x8x32xf32> to vector<2x1x32xf32>
    %294 = vector.shape_cast %293 : vector<2x1x32xf32> to vector<2x32xf32>
    %295 = tpu.concatenate %294, %269 in 1 : vector<2x32xf32>, vector<2x32xf32> -> vector<2x64xf32>
    %296 = arith.truncf %295 : vector<2x64xf32> to vector<2x64xbf16>
    %c0_77 = arith.constant 0 : index
    %c0_78 = arith.constant 0 : index
    %297 = vector.load %arg2[%c0_77, %c0_78] : memref<64x128xbf16, #tpu.memory_space<vmem>>, vector<64x128xbf16>
    %cst_79 = arith.constant dense<0.000000e+00> : vector<2x128xf32>
    %298 = tpu.matmul %296, %297, %cst_79 {dimension_numbers = #tpu.dot_dimension_numbers<[1], [0], [0], [1], [0, 0, 1, 1], [], []>} : vector<2x64xbf16>, vector<64x128xbf16>, vector<2x128xf32> -> vector<2x128xf32>
    %c0_80 = arith.constant 0 : index
    %c0_81 = arith.constant 0 : index
    %299 = vector.load %arg3[%c0_80, %c0_81] : memref<1x128xf32, #tpu.memory_space<vmem>>, vector<1x128xf32>
    %300 = vector.broadcast %299 : vector<1x128xf32> to vector<2x128xf32>
    %301 = arith.addf %298, %300 : vector<2x128xf32>
    %302 = vector.extract_strided_slice %301 {offsets = [0, 0], sizes = [2, 96], strides = [1, 1]} : vector<2x128xf32> to vector<2x96xf32>
    %303 = arith.negf %302 : vector<2x96xf32>
    %304 = math.exp %303 : vector<2x96xf32>
    %cst_82 = arith.constant 1.000000e+00 : f32
    %305 = vector.broadcast %cst_82 : f32 to vector<2x96xf32>
    %306 = arith.addf %305, %304 : vector<2x96xf32>
    %307 = arith.divf %305, %306 : vector<2x96xf32>
    %308 = vector.extract_strided_slice %301 {offsets = [0, 96], sizes = [2, 32], strides = [1, 1]} : vector<2x128xf32> to vector<2x32xf32>
    %309 = math.tanh %308 : vector<2x32xf32>
    %310 = vector.extract_strided_slice %307 {offsets = [0, 0], sizes = [2, 32], strides = [1, 1]} : vector<2x96xf32> to vector<2x32xf32>
    %311 = vector.extract_strided_slice %307 {offsets = [0, 32], sizes = [2, 32], strides = [1, 1]} : vector<2x96xf32> to vector<2x32xf32>
    %312 = vector.extract_strided_slice %307 {offsets = [0, 64], sizes = [2, 32], strides = [1, 1]} : vector<2x96xf32> to vector<2x32xf32>
    %313 = arith.mulf %311, %267 : vector<2x32xf32>
    %314 = arith.mulf %310, %309 : vector<2x32xf32>
    %315 = arith.addf %313, %314 : vector<2x32xf32>
    %316 = math.tanh %315 : vector<2x32xf32>
    %317 = arith.mulf %312, %316 : vector<2x32xf32>
    %318 = tpu.concatenate %317, %292 in 1 : vector<2x32xf32>, vector<2x32xf32> -> vector<2x64xf32>
    %319 = arith.truncf %318 : vector<2x64xf32> to vector<2x64xbf16>
    %c0_83 = arith.constant 0 : index
    %c0_84 = arith.constant 0 : index
    %320 = vector.load %arg4[%c0_83, %c0_84] : memref<64x128xbf16, #tpu.memory_space<vmem>>, vector<64x128xbf16>
    %cst_85 = arith.constant dense<0.000000e+00> : vector<2x128xf32>
    %321 = tpu.matmul %319, %320, %cst_85 {dimension_numbers = #tpu.dot_dimension_numbers<[1], [0], [0], [1], [0, 0, 1, 1], [], []>} : vector<2x64xbf16>, vector<64x128xbf16>, vector<2x128xf32> -> vector<2x128xf32>
    %c0_86 = arith.constant 0 : index
    %c0_87 = arith.constant 0 : index
    %322 = vector.load %arg5[%c0_86, %c0_87] : memref<1x128xf32, #tpu.memory_space<vmem>>, vector<1x128xf32>
    %323 = vector.broadcast %322 : vector<1x128xf32> to vector<2x128xf32>
    %324 = arith.addf %321, %323 : vector<2x128xf32>
    %325 = vector.extract_strided_slice %324 {offsets = [0, 0], sizes = [2, 96], strides = [1, 1]} : vector<2x128xf32> to vector<2x96xf32>
    %326 = arith.negf %325 : vector<2x96xf32>
    %327 = math.exp %326 : vector<2x96xf32>
    %cst_88 = arith.constant 1.000000e+00 : f32
    %328 = vector.broadcast %cst_88 : f32 to vector<2x96xf32>
    %329 = arith.addf %328, %327 : vector<2x96xf32>
    %330 = arith.divf %328, %329 : vector<2x96xf32>
    %331 = vector.extract_strided_slice %324 {offsets = [0, 96], sizes = [2, 32], strides = [1, 1]} : vector<2x128xf32> to vector<2x32xf32>
    %332 = math.tanh %331 : vector<2x32xf32>
    %333 = vector.extract_strided_slice %330 {offsets = [0, 0], sizes = [2, 32], strides = [1, 1]} : vector<2x96xf32> to vector<2x32xf32>
    %334 = vector.extract_strided_slice %330 {offsets = [0, 32], sizes = [2, 32], strides = [1, 1]} : vector<2x96xf32> to vector<2x32xf32>
    %335 = vector.extract_strided_slice %330 {offsets = [0, 64], sizes = [2, 32], strides = [1, 1]} : vector<2x96xf32> to vector<2x32xf32>
    %336 = arith.mulf %334, %290 : vector<2x32xf32>
    %337 = arith.mulf %333, %332 : vector<2x32xf32>
    %338 = arith.addf %336, %337 : vector<2x32xf32>
    %339 = math.tanh %338 : vector<2x32xf32>
    %340 = arith.mulf %335, %339 : vector<2x32xf32>
    %341 = vector.extract_strided_slice %0 {offsets = [0, 7, 0], sizes = [2, 1, 32], strides = [1, 1, 1]} : vector<2x8x32xf32> to vector<2x1x32xf32>
    %342 = vector.shape_cast %341 : vector<2x1x32xf32> to vector<2x32xf32>
    %343 = tpu.concatenate %342, %317 in 1 : vector<2x32xf32>, vector<2x32xf32> -> vector<2x64xf32>
    %344 = arith.truncf %343 : vector<2x64xf32> to vector<2x64xbf16>
    %c0_89 = arith.constant 0 : index
    %c0_90 = arith.constant 0 : index
    %345 = vector.load %arg2[%c0_89, %c0_90] : memref<64x128xbf16, #tpu.memory_space<vmem>>, vector<64x128xbf16>
    %cst_91 = arith.constant dense<0.000000e+00> : vector<2x128xf32>
    %346 = tpu.matmul %344, %345, %cst_91 {dimension_numbers = #tpu.dot_dimension_numbers<[1], [0], [0], [1], [0, 0, 1, 1], [], []>} : vector<2x64xbf16>, vector<64x128xbf16>, vector<2x128xf32> -> vector<2x128xf32>
    %c0_92 = arith.constant 0 : index
    %c0_93 = arith.constant 0 : index
    %347 = vector.load %arg3[%c0_92, %c0_93] : memref<1x128xf32, #tpu.memory_space<vmem>>, vector<1x128xf32>
    %348 = vector.broadcast %347 : vector<1x128xf32> to vector<2x128xf32>
    %349 = arith.addf %346, %348 : vector<2x128xf32>
    %350 = vector.extract_strided_slice %349 {offsets = [0, 0], sizes = [2, 96], strides = [1, 1]} : vector<2x128xf32> to vector<2x96xf32>
    %351 = arith.negf %350 : vector<2x96xf32>
    %352 = math.exp %351 : vector<2x96xf32>
    %cst_94 = arith.constant 1.000000e+00 : f32
    %353 = vector.broadcast %cst_94 : f32 to vector<2x96xf32>
    %354 = arith.addf %353, %352 : vector<2x96xf32>
    %355 = arith.divf %353, %354 : vector<2x96xf32>
    %356 = vector.extract_strided_slice %349 {offsets = [0, 96], sizes = [2, 32], strides = [1, 1]} : vector<2x128xf32> to vector<2x32xf32>
    %357 = math.tanh %356 : vector<2x32xf32>
    %358 = vector.extract_strided_slice %355 {offsets = [0, 0], sizes = [2, 32], strides = [1, 1]} : vector<2x96xf32> to vector<2x32xf32>
    %359 = vector.extract_strided_slice %355 {offsets = [0, 32], sizes = [2, 32], strides = [1, 1]} : vector<2x96xf32> to vector<2x32xf32>
    %360 = vector.extract_strided_slice %355 {offsets = [0, 64], sizes = [2, 32], strides = [1, 1]} : vector<2x96xf32> to vector<2x32xf32>
    %361 = arith.mulf %359, %315 : vector<2x32xf32>
    %362 = arith.mulf %358, %357 : vector<2x32xf32>
    %363 = arith.addf %361, %362 : vector<2x32xf32>
    %364 = math.tanh %363 : vector<2x32xf32>
    %365 = arith.mulf %360, %364 : vector<2x32xf32>
    %366 = tpu.concatenate %365, %340 in 1 : vector<2x32xf32>, vector<2x32xf32> -> vector<2x64xf32>
    %367 = arith.truncf %366 : vector<2x64xf32> to vector<2x64xbf16>
    %c0_95 = arith.constant 0 : index
    %c0_96 = arith.constant 0 : index
    %368 = vector.load %arg4[%c0_95, %c0_96] : memref<64x128xbf16, #tpu.memory_space<vmem>>, vector<64x128xbf16>
    %cst_97 = arith.constant dense<0.000000e+00> : vector<2x128xf32>
    %369 = tpu.matmul %367, %368, %cst_97 {dimension_numbers = #tpu.dot_dimension_numbers<[1], [0], [0], [1], [0, 0, 1, 1], [], []>} : vector<2x64xbf16>, vector<64x128xbf16>, vector<2x128xf32> -> vector<2x128xf32>
    %c0_98 = arith.constant 0 : index
    %c0_99 = arith.constant 0 : index
    %370 = vector.load %arg5[%c0_98, %c0_99] : memref<1x128xf32, #tpu.memory_space<vmem>>, vector<1x128xf32>
    %371 = vector.broadcast %370 : vector<1x128xf32> to vector<2x128xf32>
    %372 = arith.addf %369, %371 : vector<2x128xf32>
    %373 = vector.extract_strided_slice %372 {offsets = [0, 0], sizes = [2, 96], strides = [1, 1]} : vector<2x128xf32> to vector<2x96xf32>
    %374 = arith.negf %373 : vector<2x96xf32>
    %375 = math.exp %374 : vector<2x96xf32>
    %cst_100 = arith.constant 1.000000e+00 : f32
    %376 = vector.broadcast %cst_100 : f32 to vector<2x96xf32>
    %377 = arith.addf %376, %375 : vector<2x96xf32>
    %378 = arith.divf %376, %377 : vector<2x96xf32>
    %379 = vector.extract_strided_slice %372 {offsets = [0, 96], sizes = [2, 32], strides = [1, 1]} : vector<2x128xf32> to vector<2x32xf32>
    %380 = math.tanh %379 : vector<2x32xf32>
    %381 = vector.extract_strided_slice %378 {offsets = [0, 0], sizes = [2, 32], strides = [1, 1]} : vector<2x96xf32> to vector<2x32xf32>
    %382 = vector.extract_strided_slice %378 {offsets = [0, 32], sizes = [2, 32], strides = [1, 1]} : vector<2x96xf32> to vector<2x32xf32>
    %383 = vector.extract_strided_slice %378 {offsets = [0, 64], sizes = [2, 32], strides = [1, 1]} : vector<2x96xf32> to vector<2x32xf32>
    %384 = arith.mulf %382, %338 : vector<2x32xf32>
    %385 = arith.mulf %381, %380 : vector<2x32xf32>
    %386 = arith.addf %384, %385 : vector<2x32xf32>
    %387 = math.tanh %386 : vector<2x32xf32>
    %388 = arith.mulf %383, %387 : vector<2x32xf32>
    %389 = arith.truncf %388 : vector<2x32xf32> to vector<2x32xbf16>
    %c0_101 = arith.constant 0 : index
    %c0_102 = arith.constant 0 : index
    %390 = vector.load %arg6[%c0_101, %c0_102] : memref<32x16xbf16, #tpu.memory_space<vmem>>, vector<32x16xbf16>
    %cst_103 = arith.constant dense<0.000000e+00> : vector<2x16xf32>
    %391 = tpu.matmul %389, %390, %cst_103 {dimension_numbers = #tpu.dot_dimension_numbers<[1], [0], [0], [1], [0, 0, 1, 1], [], []>} : vector<2x32xbf16>, vector<32x16xbf16>, vector<2x16xf32> -> vector<2x16xf32>
    %c0_104 = arith.constant 0 : index
    %c0_105 = arith.constant 0 : index
    %392 = vector.load %arg7[%c0_104, %c0_105] : memref<1x16xf32, #tpu.memory_space<vmem>>, vector<1x16xf32>
    %393 = vector.broadcast %392 : vector<1x16xf32> to vector<2x16xf32>
    %394 = arith.addf %391, %393 : vector<2x16xf32>
    %cst_106 = arith.constant 0.000000e+00 : f32
    %395 = vector.broadcast %cst_106 : f32 to vector<2x16xf32>
    %396 = arith.maximumf %394, %395 : vector<2x16xf32>
    %c0_107 = arith.constant 0 : index
    %c0_108 = arith.constant 0 : index
    %397 = vector.load %arg8[%c0_107, %c0_108] : memref<1x16xf32, #tpu.memory_space<vmem>>, vector<1x16xf32>
    %398 = vector.broadcast %397 : vector<1x16xf32> to vector<2x16xf32>
    %399 = arith.mulf %396, %398 : vector<2x16xf32>
    %cst_109 = arith.constant dense<0.000000e+00> : vector<2xf32>
    %400 = vector.multi_reduction <add>, %399, %cst_109 [1] : vector<2x16xf32> to vector<2xf32>
    %401 = vector.shape_cast %400 : vector<2xf32> to vector<2x1xf32>
    %c0_110 = arith.constant 0 : index
    %c0_111 = arith.constant 0 : index
    %402 = vector.load %arg9[%c0_110, %c0_111] : memref<1x1xf32, #tpu.memory_space<vmem>>, vector<1x1xf32>
    %403 = vector.broadcast %402 : vector<1x1xf32> to vector<2x1xf32>
    %404 = arith.addf %401, %403 : vector<2x1xf32>
    %c0_112 = arith.constant 0 : index
    %c0_113 = arith.constant 0 : index
    %405 = vector.load %arg10[%c0_112, %c0_113] : memref<2x1xf32, #tpu.memory_space<vmem>>, vector<2x1xf32>
    tpu.vector_store %arg10[%c0_112, %c0_113], %404 {strides = array<i32>} : memref<2x1xf32, #tpu.memory_space<vmem>>, vector<2x1xf32>,
    return
  }
  func.func @transform_0(%arg0: i32) -> (i32, i32, i32) {
    %c0_i32 = arith.constant 0 : i32
    %c0_i32_0 = arith.constant 0 : i32
    %c0_i32_1 = arith.constant 0 : i32
    %c0_i32_2 = arith.constant 0 : i32
    return %c0_i32, %c0_i32_0, %c0_i32_1 : i32, i32, i32
  }
  func.func @transform_1(%arg0: i32) -> (i32, i32) {
    %c0_i32 = arith.constant 0 : i32
    %c0_i32_0 = arith.constant 0 : i32
    %c0_i32_1 = arith.constant 0 : i32
    return %c0_i32, %c0_i32_0 : i32, i32
  }
  func.func @transform_2(%arg0: i32) -> (i32, i32) {
    %c0_i32 = arith.constant 0 : i32
    %c0_i32_0 = arith.constant 0 : i32
    %c0_i32_1 = arith.constant 0 : i32
    return %c0_i32, %c0_i32_0 : i32, i32
  }
  func.func @transform_3(%arg0: i32) -> (i32, i32) {
    %c0_i32 = arith.constant 0 : i32
    %c0_i32_0 = arith.constant 0 : i32
    %c0_i32_1 = arith.constant 0 : i32
    return %c0_i32, %c0_i32_0 : i32, i32
  }
  func.func @transform_4(%arg0: i32) -> (i32, i32) {
    %c0_i32 = arith.constant 0 : i32
    %c0_i32_0 = arith.constant 0 : i32
    %c0_i32_1 = arith.constant 0 : i32
    return %c0_i32, %c0_i32_0 : i32, i32
  }
  func.func @transform_5(%arg0: i32) -> (i32, i32) {
    %c0_i32 = arith.constant 0 : i32
    %c0_i32_0 = arith.constant 0 : i32
    %c0_i32_1 = arith.constant 0 : i32
    return %c0_i32, %c0_i32_0 : i32, i32
  }
  func.func @transform_6(%arg0: i32) -> (i32, i32) {
    %c0_i32 = arith.constant 0 : i32
    %c0_i32_0 = arith.constant 0 : i32
    %c0_i32_1 = arith.constant 0 : i32
    return %c0_i32, %c0_i32_0 : i32, i32
  }
  func.func @transform_7(%arg0: i32) -> (i32, i32) {
    %c0_i32 = arith.constant 0 : i32
    %c0_i32_0 = arith.constant 0 : i32
    %c0_i32_1 = arith.constant 0 : i32
    return %c0_i32, %c0_i32_0 : i32, i32
  }
  func.func @transform_8(%arg0: i32) -> (i32, i32) {
    %c0_i32 = arith.constant 0 : i32
    %c0_i32_0 = arith.constant 0 : i32
    %c0_i32_1 = arith.constant 0 : i32
    return %c0_i32, %c0_i32_0 : i32, i32
  }
  func.func @transform_9(%arg0: i32) -> (i32, i32) {
    %c0_i32 = arith.constant 0 : i32
    %c0_i32_0 = arith.constant 0 : i32
    %c0_i32_1 = arith.constant 0 : i32
    return %c0_i32, %c0_i32_0 : i32, i32
  }
}

</mosaic_0001>

<bundles_post_ra>
// kernel: cnn_lstm_forward.2
= control target key start
LH: loop header
LB: loop body
LE: loop exit
PB: predicated region body
PF: predicated region fallthrough
CT: control target
= control target key end

     0   :  { %vm592_vm0 = vcmask 1043456   ;;  %vm543_vm1 = vcmask 719872   ;;  %vm1491_vm2 = vcmask 261120   ;;  %s2765_s1 = inlined_call_operand.vmem [shape: bf16[216,512], index: 1, kind: input, shape index: {}]   ;;  %s2766_s0 = inlined_call_operand.vmem [shape: bf16[256,216], index: 0, kind: input, shape index: {}]   ;;  %s2767_s3 = inlined_call_operand.vmem [shape: f32[16,256], index: 3, kind: input, shape index: {}]   ;;  %s2768_s2 = inlined_call_operand.vmem [shape: f32[1,512], index: 2, kind: input, shape index: {}]   ;;  %s2769_s4 = inlined_call_operand.vmem [shape: f32[512,32], index: 4, kind: input, shape index: {}]   ;;  %s2770_s5 = inlined_call_operand.vmem [shape: f32[2,8,32], index: 5, kind: output, shape index: {}]  }
   0x1   :  { %v1696_v0 = vld [vmem:[%s2765_s1 + $0xe4] ss:$16 sps:$4 sm:$0xff]   ;;  %v1698_v1 = vld [vmem:[%s2765_s1 + $0xec] ss:$16 sps:$4 sm:$0xff]   ;;  %v1700_v2 = vld [vmem:[%s2765_s1 + $0xe0] ss:$16 sps:$4 sm:$0xff]  }
   0x2   :  { %605 = vmatprep.subr.bf16.mxu0 %v1696_v0  ;;  %v1701_v3 = vld [vmem:[%s2765_s1 + $0xe8] ss:$16 sps:$4 sm:$0xff]   ;;  %798 = vmatprep.subr.bf16.mxu1 %v1698_v1  ;;  %v1702_v4 = vld [vmem:[%s2765_s1 + $0xc4] ss:$16 sps:$4 sm:$0xff]   ;;  %v1704_v5 = vld [vmem:[%s2765_s1 + $0xcc] ss:$16 sps:$4 sm:$0xff]  }
   0x3   :  { %606 = vmatpush1.bf16.msra.mxu0 %v1700_v2  ;;  %799 = vmatpush1.bf16.msra.mxu1 %v1701_v3  ;;  %v1706_v6 = vld [vmem:[%s2765_s1 + $0xc0] ss:$16 sps:$4 sm:$0xff]   ;;  %v1707_v7 = vld [vmem:[%s2765_s1 + $0xc8] ss:$16 sps:$4 sm:$0xff]   ;;  %v1708_v8 = vld [vmem:[%s2765_s1 + $0xa4] ss:$16 sps:$4 sm:$0xff]  }
   0x4   :  { %607 = vmatprep.subr.bf16.mxu0 %v1702_v4  ;;  %800 = vmatprep.subr.bf16.mxu1 %v1704_v5  ;;  %v1710_v9 = vld [vmem:[%s2765_s1 + $0xac] ss:$16 sps:$4 sm:$0xff]   ;;  %v1712_v10 = vld [vmem:[%s2765_s1 + $0xa0] ss:$16 sps:$4 sm:$0xff]   ;;  %v1713_v11 = vld [vmem:[%s2765_s1 + $0xa8] ss:$16 sps:$4 sm:$0xff]  }
   0x5   :  { %v1714_v12 = vld [vmem:[%s2765_s1 + $0x84] ss:$16 sps:$4 sm:$0xff]   ;;  %v1716_v13 = vld [vmem:[%s2765_s1 + $0x8c] ss:$16 sps:$4 sm:$0xff]   ;;  %v1718_v14 = vld [vmem:[%s2765_s1 + $0x80] ss:$16 sps:$4 sm:$0xff]  }
   0x6   :  { %v1719_v15 = vld [vmem:[%s2765_s1 + $0x88] ss:$16 sps:$4 sm:$0xff]   ;;  %v1720_v16 = vld [vmem:[%s2765_s1 + $0x64] ss:$16 sps:$4 sm:$0xff]   ;;  %v1722_v17 = vld [vmem:[%s2765_s1 + $0x6c] ss:$16 sps:$4 sm:$0xff]  }
   0x7   :  { %608 = vmatpush1.bf16.msra.mxu0 %v1706_v6  ;;  %801 = vmatpush1.bf16.msra.mxu1 %v1707_v7  ;;  %v1724_v18 = vld [vmem:[%s2765_s1 + $0x60] ss:$16 sps:$4 sm:$0xff]   ;;  %v1725_v19 = vld [vmem:[%s2765_s1 + $0x68] ss:$16 sps:$4 sm:$0xff]   ;;  %v1726_v20 = vld [vmem:[%s2765_s1 + $0x44] ss:$16 sps:$4 sm:$0xff]  }
   0x8   :  { %609 = vmatprep.subr.bf16.mxu0 %v1708_v8  ;;  %802 = vmatprep.subr.bf16.mxu1 %v1710_v9  ;;  %v1728_v21 = vld [vmem:[%s2765_s1 + $0x4c] ss:$16 sps:$4 sm:$0xff]   ;;  %v1730_v22 = vld [vmem:[%s2765_s1 + $0x40] ss:$16 sps:$4 sm:$0xff]   ;;  %v1731_v23 = vld [vmem:[%s2765_s1 + $0x48] ss:$16 sps:$4 sm:$0xff]  }
   0x9   :  { %v1732_v24 = vld [vmem:[%s2765_s1 + $0x24] ss:$16 sps:$4 sm:$0xff]   ;;  %v1734_v25 = vld [vmem:[%s2765_s1 + $0x2c] ss:$16 sps:$4 sm:$0xff]   ;;  %v1736_v26 = vld [vmem:[%s2765_s1 + $0x20] ss:$16 sps:$4 sm:$0xff]  }
   0xa   :  { %v1737_v27 = vld [vmem:[%s2765_s1 + $0x28] ss:$16 sps:$4 sm:$0xff]   ;;  %v1738_v28 = vld [vmem:[%s2765_s1 + $0x4] ss:$16 sps:$4 sm:$0xff]   ;;  %v1740_v29 = vld [vmem:[%s2765_s1 + $0xc] ss:$16 sps:$4 sm:$0xff]  }
   0xb   :  { %610 = vmatpush1.bf16.msra.mxu0 %v1712_v10  ;;  %803 = vmatpush1.bf16.msra.mxu1 %v1713_v11  ;;  %v105_v30 = vld [vmem:[%s2765_s1 + $0x1a0] sm:$0xff]  ;;  %v106_v31 = vld [vmem:[%s2765_s1 + $0x1a8] sm:$0xff]  ;;  %v1781_v62 = vld [vmem:[%s2766_s0 + $0x14] ss:$8 sps:$4 sm:$0xff]  }
   0xc   :  { %611 = vmatprep.subr.bf16.mxu0 %v1714_v12  ;;  %804 = vmatprep.subr.bf16.mxu1 %v1716_v13  ;;  %v1742_v32 = vld [vmem:[%s2765_s1] ss:$16 sps:$4 sm:$0xff]   ;;  %v1743_v33 = vld [vmem:[%s2765_s1 + $0x8] ss:$16 sps:$4 sm:$0xff]   ;;  %v1583_v34 = vcombine.high %v105_v30, %v105_v30  ;;  %v1585_v35 = vcombine.high %v106_v31, %v106_v31  ;;  %v1582_v36 = vcombine.low %v105_v30, %v105_v30  ;;  %v1748_v38 = vld [vmem:[%s2765_s1 + $0x184] ss:$16 sps:$4 sm:$0xff]  }
   0xd   :  { %v1584_v37 = vcombine.low %v106_v31, %v106_v31  ;;  %v1750_v41 = vld [vmem:[%s2765_s1 + $0x18c] ss:$16 sps:$4 sm:$0xff]   ;;  %v1752_v42 = vld [vmem:[%s2765_s1 + $0x180] ss:$16 sps:$4 sm:$0xff]   ;;  %v1753_v43 = vld [vmem:[%s2765_s1 + $0x188] ss:$16 sps:$4 sm:$0xff]  }
   0xe   :  { %v594_v39 = vsel %vm592_vm0, %v1582_v36, 0  ;;  %v1754_v44 = vld [vmem:[%s2765_s1 + $0x164] ss:$16 sps:$4 sm:$0xff]   ;;  %v1756_v46 = vld [vmem:[%s2765_s1 + $0x16c] ss:$16 sps:$4 sm:$0xff]  }
   0xf   :  { %612 = vmatpush1.bf16.msra.mxu0 %v1718_v14  ;;  %805 = vmatpush1.bf16.msra.mxu1 %v1719_v15  ;;  %v600_v40 = vsel %vm592_vm0, %v1584_v37, 0  ;;  %v1780_v45 = vld [vmem:[%s2766_s0 + $0x4] ss:$8 sps:$4 sm:$0xff]   ;;  %v1758_v47 = vld [vmem:[%s2765_s1 + $0x160] ss:$16 sps:$4 sm:$0xff]  }
  0x10   :  { %613 = vmatprep.subr.bf16.mxu0 %v1720_v16  ;;  %806 = vmatprep.subr.bf16.mxu1 %v1722_v17  ;;  %v1759_v48 = vld [vmem:[%s2765_s1 + $0x168] ss:$16 sps:$4 sm:$0xff]   ;;  %v1760_v49 = vld [vmem:[%s2765_s1 + $0x144] ss:$16 sps:$4 sm:$0xff]   ;;  %v1762_v50 = vld [vmem:[%s2765_s1 + $0x14c] ss:$16 sps:$4 sm:$0xff]  }
  0x11   :  { %1587 = vmatprep.mubr.msk.bf16.mxu0 %vm543_vm1, %v1780_v45  ;;  %1604 = vmatprep.mubr.msk.bf16.mxu1 %vm543_vm1, %v1780_v45  ;;  %v1764_v51 = vld [vmem:[%s2765_s1 + $0x140] ss:$16 sps:$4 sm:$0xff]   ;;  %v1765_v52 = vld [vmem:[%s2765_s1 + $0x148] ss:$16 sps:$4 sm:$0xff]   ;;  %v1766_v53 = vld [vmem:[%s2765_s1 + $0x124] ss:$16 sps:$4 sm:$0xff]  }
  0x12   :  { %v1768_v54 = vld [vmem:[%s2765_s1 + $0x12c] ss:$16 sps:$4 sm:$0xff]   ;;  %v1770_v55 = vld [vmem:[%s2765_s1 + $0x120] ss:$16 sps:$4 sm:$0xff]   ;;  %v1771_v56 = vld [vmem:[%s2765_s1 + $0x128] ss:$16 sps:$4 sm:$0xff]  }
  0x13   :  { %614 = vmatpush1.bf16.msra.mxu0 %v1724_v18  ;;  %807 = vmatpush1.bf16.msra.mxu1 %v1725_v19  ;;  %v1772_v57 = vld [vmem:[%s2765_s1 + $0x104] ss:$16 sps:$4 sm:$0xff]   ;;  %v1774_v58 = vld [vmem:[%s2765_s1 + $0x10c] ss:$16 sps:$4 sm:$0xff]   ;;  %v1776_v59 = vld [vmem:[%s2765_s1 + $0x100] ss:$16 sps:$4 sm:$0xff]  }
  0x14   :  { %615 = vmatprep.subr.bf16.mxu0 %v1726_v20  ;;  %808 = vmatprep.subr.bf16.mxu1 %v1728_v21  ;;  %v1777_v60 = vld [vmem:[%s2765_s1 + $0x108] ss:$16 sps:$4 sm:$0xff]   ;;  %v1784_v0 = vld [vmem:[%s2766_s0 + $0x24] ss:$8 sps:$4 sm:$0xff]   ;;  %v1787_v2 = vld [vmem:[%s2766_s0 + $0x34] ss:$8 sps:$4 sm:$0xff]  }
  0x15   :  { %v1778_v61 = vld [vmem:[%s2766_s0] ss:$8 sps:$4 sm:$0xff]   ;;  %v1783_v63 = vld [vmem:[%s2766_s0 + $0x10] ss:$8 sps:$4 sm:$0xff]   ;;  %v1790_v4 = vld [vmem:[%s2766_s0 + $0x44] ss:$8 sps:$4 sm:$0xff]  }
  0x16   :  { %v1786_v1 = vld [vmem:[%s2766_s0 + $0x20] ss:$8 sps:$4 sm:$0xff]   ;;  %v1789_v3 = vld [vmem:[%s2766_s0 + $0x30] ss:$8 sps:$4 sm:$0xff]   ;;  %v1793_v6 = vld [vmem:[%s2766_s0 + $0x54] ss:$8 sps:$4 sm:$0xff]  }
  0x17   :  { %616 = vmatpush1.bf16.msra.mxu0 %v1730_v22  ;;  %809 = vmatpush1.bf16.msra.mxu1 %v1731_v23  ;;  %v1792_v5 = vld [vmem:[%s2766_s0 + $0x40] ss:$8 sps:$4 sm:$0xff]   ;;  %v1795_v7 = vld [vmem:[%s2766_s0 + $0x50] ss:$8 sps:$4 sm:$0xff]   ;;  %v1796_v8 = vld [vmem:[%s2766_s0 + $0x64] ss:$8 sps:$4 sm:$0xff]  }
  0x18   :  { %617 = vmatprep.subr.bf16.mxu0 %v1732_v24  ;;  %810 = vmatprep.subr.bf16.mxu1 %v1734_v25  ;;  %v1798_v9 = vld [vmem:[%s2766_s0 + $0x60] ss:$8 sps:$4 sm:$0xff]   ;;  %v1799_v10 = vld [vmem:[%s2766_s0 + $0x74] ss:$8 sps:$4 sm:$0xff]   ;;  %v1801_v11 = vld [vmem:[%s2766_s0 + $0x70] ss:$8 sps:$4 sm:$0xff]  }
  0x19   :  { %v1802_v12 = vld [vmem:[%s2766_s0 + $0x84] ss:$8 sps:$4 sm:$0xff]   ;;  %v1804_v13 = vld [vmem:[%s2766_s0 + $0x80] ss:$8 sps:$4 sm:$0xff]   ;;  %v1805_v14 = vld [vmem:[%s2766_s0 + $0x94] ss:$8 sps:$4 sm:$0xff]  }
  0x1a   :  { %v1807_v15 = vld [vmem:[%s2766_s0 + $0x90] ss:$8 sps:$4 sm:$0xff]   ;;  %v1808_v16 = vld [vmem:[%s2766_s0 + $0xa4] ss:$8 sps:$4 sm:$0xff]   ;;  %v1810_v17 = vld [vmem:[%s2766_s0 + $0xa0] ss:$8 sps:$4 sm:$0xff]  }
  0x1b   :  { %618 = vmatpush1.bf16.msra.mxu0 %v1736_v26  ;;  %811 = vmatpush1.bf16.msra.mxu1 %v1737_v27  ;;  %v1811_v18 = vld [vmem:[%s2766_s0 + $0xb4] ss:$8 sps:$4 sm:$0xff]   ;;  %v1813_v19 = vld [vmem:[%s2766_s0 + $0xb0] ss:$8 sps:$4 sm:$0xff]   ;;  %v1814_v20 = vld [vmem:[%s2766_s0 + $0xc4] ss:$8 sps:$4 sm:$0xff]  }
  0x1c   :  { %619 = vmatprep.subr.bf16.mxu0 %v1738_v28  ;;  %812 = vmatprep.subr.bf16.mxu1 %v1740_v29  ;;  %v1816_v21 = vld [vmem:[%s2766_s0 + $0xc0] ss:$8 sps:$4 sm:$0xff]   ;;  %v1817_v22 = vld [vmem:[%s2766_s0 + $0xd4] ss:$8 sps:$4 sm:$0xff]   ;;  %v1819_v23 = vld [vmem:[%s2766_s0 + $0xd0] ss:$8 sps:$4 sm:$0xff]  }
  0x1d   :  { %v1820_v24 = vld [vmem:[%s2766_s0 + $0xe4] ss:$8 sps:$4 sm:$0xff]   ;;  %v1822_v25 = vld [vmem:[%s2766_s0 + $0xe0] ss:$8 sps:$4 sm:$0xff]   ;;  %v1823_v26 = vld [vmem:[%s2766_s0 + $0xf4] ss:$8 sps:$4 sm:$0xff]  }
  0x1e   :  { %v1825_v27 = vld [vmem:[%s2766_s0 + $0xf0] ss:$8 sps:$4 sm:$0xff]  }
  0x1f   :  { %620 = vmatpush1.bf16.msra.mxu0 %v1742_v32  ;;  %813 = vmatpush1.bf16.msra.mxu1 %v1743_v33 }
  0x20   :  { %1586 = vmatprep.subr.msk.bf16.mxu0 %vm592_vm0, %v1583_v34  ;;  %1603 = vmatprep.subr.msk.bf16.mxu1 %vm592_vm0, %v1585_v35 }
  0x23   :  { %626 = vmatpush2.bf16.msra.mxu0 %v594_v39  ;;  %819 = vmatpush2.bf16.msra.mxu1 %v600_v40 }
  0x24   :  { %627 = vmatprep.subr.bf16.mxu0 %v1748_v38  ;;  %820 = vmatprep.subr.bf16.mxu1 %v1750_v41 }
  0x27   :  { %628 = vmatpush2.bf16.msra.mxu0 %v1752_v42  ;;  %821 = vmatpush2.bf16.msra.mxu1 %v1753_v43 }
  0x28   :  { %629 = vmatprep.subr.bf16.mxu0 %v1754_v44  ;;  %822 = vmatprep.subr.bf16.mxu1 %v1756_v46 }
  0x2b   :  { %630 = vmatpush2.bf16.msra.mxu0 %v1758_v47  ;;  %823 = vmatpush2.bf16.msra.mxu1 %v1759_v48 }
  0x2c   :  { %631 = vmatprep.subr.bf16.mxu0 %v1760_v49  ;;  %824 = vmatprep.subr.bf16.mxu1 %v1762_v50 }
  0x2f   :  { %632 = vmatpush2.bf16.msra.mxu0 %v1764_v51  ;;  %825 = vmatpush2.bf16.msra.mxu1 %v1765_v52 }
  0x30   :  { %633 = vmatprep.subr.bf16.mxu0 %v1766_v53  ;;  %826 = vmatprep.subr.bf16.mxu1 %v1768_v54 }
  0x33   :  { %634 = vmatpush2.bf16.msra.mxu0 %v1770_v55  ;;  %827 = vmatpush2.bf16.msra.mxu1 %v1771_v56 }
  0x34   :  { %635 = vmatprep.subr.bf16.mxu0 %v1772_v57  ;;  %828 = vmatprep.subr.bf16.mxu1 %v1774_v58 }
  0x37   :  { %636 = vmatpush2.bf16.msra.mxu0 %v1776_v59  ;;  %829 = vmatpush2.bf16.msra.mxu1 %v1777_v60 }
  0x3a   :  { %638 = vmatmul.mubr.bf16.vlgmr.msra.gmra.mxu0 %v1778_v61  ;;  %831 = vmatmul.mubr.bf16.vlgmr.msra.gmra.mxu1 %v1778_v61 }
  0x3b   :  { %1588 = vmatprep.mubr.msk.bf16.mxu0 %vm543_vm1, %v1781_v62  ;;  %1605 = vmatprep.mubr.msk.bf16.mxu1 %vm543_vm1, %v1781_v62  ;;  %v1120_v62 = vld [vmem:[%s2767_s3 + $0x8] sm:$0xff] }
  0x42   :  { %648 = vmatmul.mubr.bf16.gmra.mxu0 %v1783_v63  ;;  %841 = vmatmul.mubr.bf16.gmra.mxu1 %v1783_v63 }
  0x43   :  { %1589 = vmatprep.mubr.msk.bf16.mxu0 %vm543_vm1, %v1784_v0  ;;  %1606 = vmatprep.mubr.msk.bf16.mxu1 %vm543_vm1, %v1784_v0 }
  0x4a   :  { %658 = vmatmul.mubr.bf16.gmra.mxu0 %v1786_v1  ;;  %851 = vmatmul.mubr.bf16.gmra.mxu1 %v1786_v1 }
  0x4b   :  { %1590 = vmatprep.mubr.msk.bf16.mxu0 %vm543_vm1, %v1787_v2  ;;  %1607 = vmatprep.mubr.msk.bf16.mxu1 %vm543_vm1, %v1787_v2 }
  0x52   :  { %668 = vmatmul.mubr.bf16.gmra.mxu0 %v1789_v3  ;;  %861 = vmatmul.mubr.bf16.gmra.mxu1 %v1789_v3 }
  0x53   :  { %1591 = vmatprep.mubr.msk.bf16.mxu0 %vm543_vm1, %v1790_v4  ;;  %1608 = vmatprep.mubr.msk.bf16.mxu1 %vm543_vm1, %v1790_v4 }
  0x5a   :  { %678 = vmatmul.mubr.bf16.gmra.mxu0 %v1792_v5  ;;  %871 = vmatmul.mubr.bf16.gmra.mxu1 %v1792_v5 }
  0x5b   :  { %1592 = vmatprep.mubr.msk.bf16.mxu0 %vm543_vm1, %v1793_v6  ;;  %1609 = vmatprep.mubr.msk.bf16.mxu1 %vm543_vm1, %v1793_v6 }
  0x62   :  { %688 = vmatmul.mubr.bf16.gmra.mxu0 %v1795_v7  ;;  %881 = vmatmul.mubr.bf16.gmra.mxu1 %v1795_v7 }
  0x63   :  { %1593 = vmatprep.mubr.msk.bf16.mxu0 %vm543_vm1, %v1796_v8  ;;  %1610 = vmatprep.mubr.msk.bf16.mxu1 %vm543_vm1, %v1796_v8 }
  0x6a   :  { %698 = vmatmul.mubr.bf16.gmra.mxu0 %v1798_v9  ;;  %891 = vmatmul.mubr.bf16.gmra.mxu1 %v1798_v9 }
  0x6b   :  { %1594 = vmatprep.mubr.msk.bf16.mxu0 %vm543_vm1, %v1799_v10  ;;  %1611 = vmatprep.mubr.msk.bf16.mxu1 %vm543_vm1, %v1799_v10 }
  0x72   :  { %708 = vmatmul.mubr.bf16.gmra.mxu0 %v1801_v11  ;;  %901 = vmatmul.mubr.bf16.gmra.mxu1 %v1801_v11 }
  0x73   :  { %1595 = vmatprep.mubr.msk.bf16.mxu0 %vm543_vm1, %v1802_v12  ;;  %1612 = vmatprep.mubr.msk.bf16.mxu1 %vm543_vm1, %v1802_v12 }
  0x7a   :  { %718 = vmatmul.mubr.bf16.gmra.mxu0 %v1804_v13  ;;  %911 = vmatmul.mubr.bf16.gmra.mxu1 %v1804_v13  ;;  %v109_v13 = vlaneseq }
  0x7b   :  { %1596 = vmatprep.mubr.msk.bf16.mxu0 %vm543_vm1, %v1805_v14  ;;  %1613 = vmatprep.mubr.msk.bf16.mxu1 %vm543_vm1, %v1805_v14 }
  0x82   :  { %728 = vmatmul.mubr.bf16.gmra.mxu0 %v1807_v15  ;;  %921 = vmatmul.mubr.bf16.gmra.mxu1 %v1807_v15 }
  0x83   :  { %1597 = vmatprep.mubr.msk.bf16.mxu0 %vm543_vm1, %v1808_v16  ;;  %1614 = vmatprep.mubr.msk.bf16.mxu1 %vm543_vm1, %v1808_v16 }
  0x8a   :  { %738 = vmatmul.mubr.bf16.gmra.mxu0 %v1810_v17  ;;  %931 = vmatmul.mubr.bf16.gmra.mxu1 %v1810_v17 }
  0x8b   :  { %1598 = vmatprep.mubr.msk.bf16.mxu0 %vm543_vm1, %v1811_v18  ;;  %1615 = vmatprep.mubr.msk.bf16.mxu1 %vm543_vm1, %v1811_v18  ;;  %v110_v18 = vshrl.u32 %v109_v13, 7 }
  0x92   :  { %748 = vmatmul.mubr.bf16.gmra.mxu0 %v1813_v19  ;;  %941 = vmatmul.mubr.bf16.gmra.mxu1 %v1813_v19 }
  0x93   :  { %1599 = vmatprep.mubr.msk.bf16.mxu0 %vm543_vm1, %v1814_v20  ;;  %1616 = vmatprep.mubr.msk.bf16.mxu1 %vm543_vm1, %v1814_v20 }
  0x9a   :  { %758 = vmatmul.mubr.bf16.gmra.mxu0 %v1816_v21  ;;  %951 = vmatmul.mubr.bf16.gmra.mxu1 %v1816_v21 }
  0x9b   :  { %1600 = vmatprep.mubr.msk.bf16.mxu0 %vm543_vm1, %v1817_v22  ;;  %1617 = vmatprep.mubr.msk.bf16.mxu1 %vm543_vm1, %v1817_v22 }
  0xa2   :  { %768 = vmatmul.mubr.bf16.gmra.mxu0 %v1819_v23  ;;  %961 = vmatmul.mubr.bf16.gmra.mxu1 %v1819_v23  ;;  %v111_v23 = vsub.s32 0, %v110_v18 }
  0xa3   :  { %1601 = vmatprep.mubr.msk.bf16.mxu0 %vm543_vm1, %v1820_v24  ;;  %1618 = vmatprep.mubr.msk.bf16.mxu1 %vm543_vm1, %v1820_v24  ;;  %v119_v24 = vsub.s32 2, %v110_v18 }
  0xaa   :  { %778 = vmatmul.mubr.bf16.gmra.mxu0 %v1822_v25  ;;  %971 = vmatmul.mubr.bf16.gmra.mxu1 %v1822_v25 }
  0xab   :  { %1602 = vmatprep.mubr.msk.bf16.mxu0 %vm543_vm1, %v1823_v26  ;;  %1619 = vmatprep.mubr.msk.bf16.mxu1 %vm543_vm1, %v1823_v26 }
  0xb2   :  { %788 = vmatmul.mubr.bf16.gmra.mxu0 %v1825_v27  ;;  %981 = vmatmul.mubr.bf16.gmra.mxu1 %v1825_v27  ;;  %v107_v27 = vld [vmem:[%s2768_s2] sm:$0xf] }
  0xb3   :  { %1187 = vmatprep.mubr.f32.mxu0 %v1120_v62  ;;  %1264 = vmatprep.mubr.f32.mxu1 %v1120_v62  ;;  %v115_v62 = vsub.s32 1, %v110_v18 }
  0xfa   :  { %v2146_v28 = vpop.f32.mrf.mxu0  ;;  %v2148_v29 = vpop.f32.mrf.mxu1 }
  0xfb   :  { %2771 = vst [vmem:[#allocation2_spill] sm:$0xff] %v2146_v28  ;;  %2772 = vst [vmem:[#allocation3_spill] sm:$0xff] %v2148_v29  ;;  %v123_v29 = vsub.s32 3, %v110_v18 }
  0xfc   :  { %v2150_v30 = vpop.f32.mrf.mxu0  ;;  %v2152_v31 = vpop.f32.mrf.mxu1 }
  0xfd   :  { %2773 = vst [vmem:[#allocation4_spill] sm:$0xff] %v2150_v30  ;;  %2774 = vst [vmem:[#allocation5_spill] sm:$0xff] %v2152_v31  ;;  %v2248_v30 = vrot.slane %v107_v27, %v111_v23 }
  0xfe   :  { %v2154_v32 = vpop.f32.mrf.mxu0  ;;  %v2156_v33 = vpop.f32.mrf.mxu1 }
  0xff   :  { %2775 = vst [vmem:[#allocation6_spill] sm:$0xff] %v2154_v32  ;;  %2776 = vst [vmem:[#allocation7_spill] sm:$0xff] %v2156_v33  ;;  %v2250_v33 = vrot.slane %v107_v27, %v119_v24 }
 0x100   :  { %v2158_v34 = vpop.f32.mrf.mxu0  ;;  %v2160_v35 = vpop.f32.mrf.mxu1 }
 0x101   :  { %2777 = vst [vmem:[#allocation8_spill] sm:$0xff] %v2158_v34  ;;  %2778 = vst [vmem:[#allocation9_spill] sm:$0xff] %v2160_v35  ;;  %v2252_v35 = vrot.slane %v107_v27, %v115_v62  ;;  %v2254_v34 = vrot.slane %v107_v27, %v123_v29 }
 0x102   :  { %v2162_v36 = vpop.f32.mrf.mxu0  ;;  %v2164_v37 = vpop.f32.mrf.mxu1 }
 0x103   :  { %2779 = vst [vmem:[#allocation10_spill] sm:$0xff] %v2162_v36  ;;  %2780 = vst [vmem:[#allocation11_spill] sm:$0xff] %v2164_v37 }
 0x104   :  { %v2166_v38 = vpop.f32.mrf.mxu0  ;;  %v2168_v39 = vpop.f32.mrf.mxu1 }
 0x105   :  { %2781 = vst [vmem:[#allocation12_spill] sm:$0xff] %v2166_v38  ;;  %2782 = vst [vmem:[#allocation13_spill] sm:$0xff] %v2168_v39 }
 0x106   :  { %v2170_v40 = vpop.f32.mrf.mxu0  ;;  %v2172_v41 = vpop.f32.mrf.mxu1 }
 0x107   :  { %2783 = vst [vmem:[#allocation14_spill] sm:$0xff] %v2170_v40  ;;  %2784 = vst [vmem:[#allocation15_spill] sm:$0xff] %v2172_v41 }
 0x108   :  { %v2174_v42 = vpop.f32.mrf.mxu0  ;;  %v2176_v43 = vpop.f32.mrf.mxu1 }
 0x109   :  { %2785 = vst [vmem:[#allocation16_spill] sm:$0xff] %v2174_v42  ;;  %2786 = vst [vmem:[#allocation17_spill] sm:$0xff] %v2176_v43 }
 0x10a   :  { %v2178_v44 = vpop.f32.mrf.mxu0  ;;  %v2180_v45 = vpop.f32.mrf.mxu1 }
 0x10b   :  { %2787 = vst [vmem:[#allocation18_spill] sm:$0xff] %v2180_v45 }
 0x10c   :  { %v2182_v46 = vpop.f32.mrf.mxu0  ;;  %v2184_v47 = vpop.f32.mrf.mxu1 }
 0x10e   :  { %v2186_v48 = vpop.f32.mrf.mxu0  ;;  %v2188_v49 = vpop.f32.mrf.mxu1 }
 0x110   :  { %v2190_v50 = vpop.f32.mrf.mxu0  ;;  %v2192_v51 = vpop.f32.mrf.mxu1 }
 0x112   :  { %v2194_v52 = vpop.f32.mrf.mxu0  ;;  %v2196_v53 = vpop.f32.mrf.mxu1 }
 0x114   :  { %v2198_v54 = vpop.f32.mrf.mxu0  ;;  %v2200_v55 = vpop.f32.mrf.mxu1 }
 0x116   :  { %v2202_v56 = vpop.f32.mrf.mxu0  ;;  %v2204_v57 = vpop.f32.mrf.mxu1 }
 0x118   :  { %v2206_v58 = vpop.f32.mrf.mxu0  ;;  %v2208_v59 = vpop.f32.mrf.mxu1 }
 0x11a   :  { %v2210_v60 = vpop.f32.mrf.mxu0  ;;  %v2212_v61 = vpop.f32.mrf.mxu1 }
 0x11c   :  { %v2217_v63 = vpop.f32.mrf.mxu0  ;;  %v2219_v0 = vpop.f32.mrf.mxu1 }
 0x11e   :  { %v2221_v1 = vpop.f32.mrf.mxu0  ;;  %v2223_v2 = vpop.f32.mrf.mxu1 }
 0x120   :  { %v2225_v3 = vpop.f32.mrf.mxu0  ;;  %v2227_v4 = vpop.f32.mrf.mxu1 }
 0x122   :  { %v2229_v5 = vpop.f32.mrf.mxu0  ;;  %v2231_v6 = vpop.f32.mrf.mxu1 }
 0x124   :  { %v2233_v7 = vpop.f32.mrf.mxu0  ;;  %v2235_v8 = vpop.f32.mrf.mxu1 }
 0x126   :  { %v2237_v9 = vpop.f32.mrf.mxu0  ;;  %v2239_v10 = vpop.f32.mrf.mxu1 }
 0x128   :  { %v2241_v11 = vpop.f32.mrf.mxu0  ;;  %v2243_v12 = vpop.f32.mrf.mxu1 }
 0x12a   :  { %v699_v14 = vpop.f32.mrf.mxu0  ;;  %v892_v15 = vpop.f32.mrf.mxu1 }
 0x12c   :  { %v701_v16 = vpop.f32.mrf.mxu0  ;;  %v894_v17 = vpop.f32.mrf.mxu1 }
 0x12e   :  { %v703_v19 = vpop.f32.mrf.mxu0  ;;  %v896_v20 = vpop.f32.mrf.mxu1 }
 0x130   :  { %v705_v21 = vpop.f32.mrf.mxu0  ;;  %v898_v22 = vpop.f32.mrf.mxu1 }
 0x132   :  { %v709_v25 = vpop.f32.mrf.mxu0  ;;  %v902_v26 = vpop.f32.mrf.mxu1 }
 0x133   :  { %v710_v40 = vadd.f32 %v709_v25, %v2248_v30  ;;  %v903_v62 = vadd.f32 %v902_v26, %v2250_v33  ;;  %v702_v26 = vadd.f32 %v701_v16, %v2252_v35  ;;  %v696_v16 = vadd.f32 %v2241_v11, %v2252_v35 }
 0x134   :  { %v711_v28 = vpop.f32.mrf.mxu0  ;;  %v904_v31 = vpop.f32.mrf.mxu1  ;;  %v692_v11 = vadd.f32 %v2233_v7, %v2252_v35  ;;  %v686_v7 = vadd.f32 %v2225_v3, %v2252_v35  ;;  %v682_v3 = vadd.f32 %v2217_v63, %v2252_v35  ;;  %v676_v63 = vadd.f32 %v2206_v58, %v2252_v35 }
 0x135   :  { %v712_v18 = vadd.f32 %v711_v28, %v2252_v35  ;;  %v905_v41 = vadd.f32 %v904_v31, %v2254_v34  ;;  %v704_v31 = vadd.f32 %v703_v19, %v2248_v30  ;;  %v893_v19 = vadd.f32 %v892_v15, %v2250_v33 }
 0x136   :  { %v713_v13 = vpop.f32.mrf.mxu0  ;;  %v906_v32 = vpop.f32.mrf.mxu1  ;;  %v672_v58 = vadd.f32 %v2198_v54, %v2252_v35  ;;  %v666_v54 = vadd.f32 %v2190_v50, %v2252_v35  ;;  %v662_v50 = vadd.f32 %v2182_v46, %v2252_v35  ;;  %v2806_v46 = vld [vmem:[#allocation16_spill] sm:$0xff] }
 0x137   :  { %v714_v37 = vadd.f32 %v713_v13, %v2248_v30  ;;  %v907_v36 = vadd.f32 %v906_v32, %v2250_v33  ;;  %v706_v32 = vadd.f32 %v705_v21, %v2252_v35  ;;  %v899_v13 = vadd.f32 %v898_v22, %v2254_v34 }
 0x138   :  { %v715_v39 = vpop.f32.mrf.mxu0  ;;  %v908_v38 = vpop.f32.mrf.mxu1  ;;  %v1050_v21 = vmax.f32 %v905_v41, 0.0  ;;  %v700_v22 = vadd.f32 %v699_v14, %v2248_v30  ;;  %v889_v41 = vadd.f32 %v2243_v12, %v2254_v34  ;;  %v887_v14 = vadd.f32 %v2239_v10, %v2250_v33 }
 0x139   :  { %v716_v23 = vadd.f32 %v715_v39, %v2252_v35  ;;  %v909_v24 = vadd.f32 %v908_v38, %v2254_v34  ;;  %v897_v39 = vadd.f32 %v896_v20, %v2250_v33  ;;  %v1051_v42 = vmax.f32 %v714_v37, 0.0 }
 0x13a   :  { %v2264_v29 = vpop.f32.mrf.mxu0  ;;  %v2266_v27 = vpop.f32.mrf.mxu1  ;;  %v1053_v38 = vmax.f32 %v907_v36, 0.0  ;;  %v1049_v20 = vmax.f32 %v903_v62, 0.0  ;;  %v1043_v15 = vmax.f32 %v704_v31, 0.0  ;;  %v885_v12 = vadd.f32 %v2235_v8, %v2254_v34 }
 0x13b   :  { %2788 = vst [vmem:[#allocation19_spill] sm:$0xff] %v2264_v29  ;;  %2789 = vst [vmem:[#allocation20_spill] sm:$0xff] %v2266_v27  ;;  %v1052_v43 = vmax.f32 %v716_v23, 0.0  ;;  %v1054_v28 = vmax.f32 %v909_v24, 0.0  ;;  %v895_v27 = vadd.f32 %v894_v17, %v2254_v34  ;;  %v1048_v29 = vmax.f32 %v712_v18, 0.0 }
 0x13c   :  { %v2272_v45 = vpop.f32.mrf.mxu0  ;;  %v2274_v25 = vpop.f32.mrf.mxu1  ;;  %v1047_v23 = vmax.f32 %v710_v40, 0.0  ;;  %v1046_v17 = vmax.f32 %v899_v13, 0.0  ;;  %v694_v40 = vadd.f32 %v2237_v9, %v2248_v30  ;;  %v1045_v18 = vmax.f32 %v897_v39, 0.0 }
 0x13d   :  { %2790 = vst [vmem:[#allocation21_spill] sm:$0xff] %v2272_v45  ;;  %2791 = vst [vmem:[#allocation22_spill] sm:$0xff] %v2274_v25  ;;  %1123 = vmatprep.subr.mxu0 %v1052_v43  ;;  %1200 = vmatprep.subr.mxu1 %v1054_v28  ;;  %v1044_v43 = vmax.f32 %v706_v32, 0.0  ;;  %v1040_v62 = vmax.f32 %v702_v26, 0.0  ;;  %v690_v9 = vadd.f32 %v2229_v5, %v2248_v30  ;;  %v1039_v32 = vmax.f32 %v700_v22, 0.0 }
 0x13e   :  { %v2280_v37 = vpop.f32.mrf.mxu0  ;;  %v2282_v36 = vpop.f32.mrf.mxu1  ;;  %1124 = vmatpush1.msra.mxu0 %v1051_v42  ;;  %1201 = vmatpush1.msra.mxu1 %v1053_v38  ;;  %v883_v10 = vadd.f32 %v2231_v6, %v2250_v33  ;;  %v1041_v13 = vmax.f32 %v893_v19, 0.0  ;;  %v879_v8 = vadd.f32 %v2227_v4, %v2254_v34  ;;  %v1038_v39 = vmax.f32 %v889_v41, 0.0 }
 0x13f   :  { %2792 = vst [vmem:[#allocation23_spill] sm:$0xff] %v2280_v37  ;;  %2793 = vst [vmem:[#allocation24_spill] sm:$0xff] %v2282_v36  ;;  %1125 = vmatprep.subr.mxu0 %v1048_v29  ;;  %1202 = vmatprep.subr.mxu1 %v1050_v21  ;;  %v1042_v29 = vmax.f32 %v895_v27, 0.0  ;;  %v1036_v27 = vmax.f32 %v696_v16, 0.0  ;;  %v684_v5 = vadd.f32 %v2221_v1, %v2248_v30  ;;  %v1035_v38 = vmax.f32 %v694_v40, 0.0 }
 0x140   :  { %v2292_v42 = vpop.f32.mrf.mxu0  ;;  %v2294_v24 = vpop.f32.mrf.mxu1  ;;  %1126 = vmatpush1.msra.mxu0 %v1047_v23  ;;  %1203 = vmatpush1.msra.mxu1 %v1049_v20  ;;  %v877_v6 = vadd.f32 %v2223_v2, %v2250_v33  ;;  %v1037_v26 = vmax.f32 %v887_v14, 0.0  ;;  %v875_v4 = vadd.f32 %v2219_v0, %v2254_v34  ;;  %v1032_v19 = vmax.f32 %v692_v11, 0.0 }
 0x141   :  { %2794 = vst [vmem:[#allocation25_spill] sm:$0xff] %v2292_v42  ;;  %2795 = vst [vmem:[#allocation26_spill] sm:$0xff] %v2294_v24  ;;  %1127 = vmatprep.subr.mxu0 %v1044_v43  ;;  %1204 = vmatprep.subr.mxu1 %v1046_v17  ;;  %v1034_v23 = vmax.f32 %v885_v12, 0.0  ;;  %v680_v1 = vadd.f32 %v2210_v60, %v2248_v30  ;;  %v873_v2 = vadd.f32 %v2212_v61, %v2250_v33 }
 0x142   :  { %v2304_v28 = vpop.f32.mrf.mxu0  ;;  %v2306_v31 = vpop.f32.mrf.mxu1  ;;  %1128 = vmatpush1.msra.mxu0 %v1043_v15  ;;  %1205 = vmatpush1.msra.mxu1 %v1045_v18  ;;  %v1031_v20 = vmax.f32 %v690_v9, 0.0  ;;  %v1033_v16 = vmax.f32 %v883_v10, 0.0  ;;  %v869_v0 = vadd.f32 %v2208_v59, %v2254_v34  ;;  %v1028_v17 = vmax.f32 %v686_v7, 0.0 }
 0x143   :  { %2796 = vst [vmem:[#allocation27_spill] sm:$0xff] %v2304_v28  ;;  %2797 = vst [vmem:[#allocation28_spill] sm:$0xff] %v2306_v31  ;;  %1129 = vmatprep.subr.mxu0 %v1040_v62  ;;  %1206 = vmatprep.subr.mxu1 %v1042_v29  ;;  %v1030_v40 = vmax.f32 %v879_v8, 0.0  ;;  %v674_v60 = vadd.f32 %v2202_v56, %v2248_v30  ;;  %v867_v61 = vadd.f32 %v2204_v57, %v2250_v33 }
 0x144   :  { %v2316_v21 = vpop.f32.mrf.mxu0  ;;  %v2318_v22 = vpop.f32.mrf.mxu1  ;;  %1130 = vmatpush1.msra.mxu0 %v1039_v32  ;;  %1207 = vmatpush1.msra.mxu1 %v1041_v13  ;;  %v1027_v14 = vmax.f32 %v684_v5, 0.0  ;;  %v1029_v15 = vmax.f32 %v877_v6, 0.0  ;;  %v865_v59 = vadd.f32 %v2200_v55, %v2254_v34  ;;  %v1024_v12 = vmax.f32 %v682_v3, 0.0 }
 0x145   :  { %2798 = vst [vmem:[#allocation29_spill] sm:$0xff] %v2316_v21  ;;  %2799 = vst [vmem:[#allocation30_spill] sm:$0xff] %v2318_v22  ;;  %1131 = vmatprep.subr.mxu0 %v1036_v27  ;;  %1208 = vmatprep.subr.mxu1 %v1038_v39  ;;  %v1026_v62 = vmax.f32 %v875_v4, 0.0  ;;  %v670_v56 = vadd.f32 %v2194_v52, %v2248_v30  ;;  %v863_v57 = vadd.f32 %v2196_v53, %v2250_v33 }
 0x146   :  { %v2328_v41 = vpop.f32.mrf.mxu0  ;;  %v2330_v43 = vpop.f32.mrf.mxu1  ;;  %1132 = vmatpush1.msra.mxu0 %v1035_v38  ;;  %1209 = vmatpush1.msra.mxu1 %v1037_v26  ;;  %v1023_v29 = vmax.f32 %v680_v1, 0.0  ;;  %v1025_v9 = vmax.f32 %v873_v2, 0.0  ;;  %v859_v55 = vadd.f32 %v2192_v51, %v2254_v34  ;;  %v1020_v13 = vmax.f32 %v676_v63, 0.0  ;;  %v2807_v1 = vld [vmem:[#allocation17_spill] sm:$0xff] }
 0x147   :  { %2800 = vst [vmem:[#allocation31_spill] sm:$0xff] %v2328_v41  ;;  %2801 = vst [vmem:[#allocation32_spill] sm:$0xff] %v2330_v43  ;;  %1133 = vmatprep.subr.mxu0 %v1032_v19  ;;  %1210 = vmatprep.subr.mxu1 %v1034_v23  ;;  %v1022_v7 = vmax.f32 %v869_v0, 0.0  ;;  %v664_v52 = vadd.f32 %v2186_v48, %v2248_v30  ;;  %v857_v53 = vadd.f32 %v2188_v49, %v2250_v33  ;;  %v2805_v49 = vld [vmem:[#allocation18_spill] sm:$0xff]  ;;  %v2809_v0 = vld [vmem:[#allocation15_spill] sm:$0xff] }
 0x148   :  { %v2340_v18 = vpop.f32.mrf.mxu0  ;;  %v2342_v11 = vpop.f32.mrf.mxu1  ;;  %1134 = vmatpush1.msra.mxu0 %v1031_v20  ;;  %1211 = vmatpush1.msra.mxu1 %v1033_v16  ;;  %v1019_v8 = vmax.f32 %v674_v60, 0.0  ;;  %v1021_v27 = vmax.f32 %v867_v61, 0.0  ;;  %v855_v51 = vadd.f32 %v2184_v47, %v2254_v34  ;;  %v1016_v6 = vmax.f32 %v672_v58, 0.0 }
 0x149   :  { %2802 = vst [vmem:[#allocation33_spill] sm:$0xff] %v2340_v18  ;;  %2803 = vst [vmem:[#allocation34_spill] sm:$0xff] %v2342_v11  ;;  %1135 = vmatprep.subr.mxu0 %v1028_v17  ;;  %1212 = vmatprep.subr.mxu1 %v1030_v40  ;;  %v1018_v38 = vmax.f32 %v865_v59, 0.0  ;;  %v660_v48 = vadd.f32 %v2178_v44, %v2248_v30  ;;  %v853_v26 = vadd.f32 %v2805_v49, %v2250_v33  ;;  %v2808_v44 = vld [vmem:[#allocation14_spill] sm:$0xff]  ;;  %v2811_v59 = vld [vmem:[#allocation13_spill] sm:$0xff] }
 0x14a   :  { %v2352_v10 = vpop.f32.mrf.mxu0  ;;  %v2354_v32 = vpop.f32.mrf.mxu1  ;;  %1136 = vmatpush1.msra.mxu0 %v1027_v14  ;;  %1213 = vmatpush1.msra.mxu1 %v1029_v15  ;;  %v1015_v3 = vmax.f32 %v670_v56, 0.0  ;;  %v1017_v4 = vmax.f32 %v863_v57, 0.0  ;;  %v656_v47 = vadd.f32 %v2806_v46, %v2252_v35  ;;  %v849_v2 = vadd.f32 %v2807_v1, %v2254_v34  ;;  %v2810_v15 = vld [vmem:[#allocation12_spill] sm:$0xff]  ;;  %v2812_v57 = vld [vmem:[#allocation10_spill] sm:$0xff]  ;;  %v2817_v49 = vld [vmem:[#allocation7_spill] sm:$0xff] }
 0x14b   :  { %2804 = vst [vmem:[#allocation35_spill] sm:$0xff] %v2354_v32  ;;  %1137 = vmatprep.subr.mxu0 %v1024_v12  ;;  %1214 = vmatprep.subr.mxu1 %v1026_v62  ;;  %v1012_v20 = vmax.f32 %v666_v54, 0.0  ;;  %v1014_v16 = vmax.f32 %v859_v55, 0.0  ;;  %v654_v63 = vadd.f32 %v2808_v44, %v2248_v30  ;;  %v847_v17 = vadd.f32 %v2809_v0, %v2250_v33 }
 0x14c   :  { %v2364_v39 = vpop.f32.mrf.mxu0  ;;  %v2366_v5 = vpop.f32.mrf.mxu1  ;;  %1138 = vmatpush1.msra.mxu0 %v1023_v29  ;;  %1215 = vmatpush1.msra.mxu1 %v1025_v9  ;;  %v1011_v40 = vmax.f32 %v664_v52, 0.0  ;;  %v1013_v60 = vmax.f32 %v857_v53, 0.0  ;;  %v652_v58 = vadd.f32 %v2810_v15, %v2252_v35  ;;  %v845_v12 = vadd.f32 %v2811_v59, %v2254_v34  ;;  %v2813_v9 = vld [vmem:[#allocation11_spill] sm:$0xff]  ;;  %v2814_v53 = vld [vmem:[#allocation8_spill] sm:$0xff] }
 0x14d   :  { %1139 = vmatprep.subr.mxu0 %v1020_v13  ;;  %1216 = vmatprep.subr.mxu1 %v1022_v7  ;;  %v1008_v62 = vmax.f32 %v662_v50, 0.0  ;;  %v1010_v56 = vmax.f32 %v855_v51, 0.0  ;;  %v650_v29 = vadd.f32 %v2812_v57, %v2248_v30  ;;  %v843_v54 = vadd.f32 %v2813_v9, %v2250_v33 }
 0x14e   :  { %v2376_v19 = vpop.f32.mrf.mxu0  ;;  %v2378_v23 = vpop.f32.mrf.mxu1  ;;  %1140 = vmatpush1.msra.mxu0 %v1019_v8  ;;  %1217 = vmatpush1.msra.mxu1 %v1021_v27  ;;  %v1007_v55 = vmax.f32 %v660_v48, 0.0  ;;  %v1009_v13 = vmax.f32 %v853_v26, 0.0  ;;  %v646_v8 = vadd.f32 %v2814_v53, %v2252_v35  ;;  %v2815_v27 = vld [vmem:[#allocation9_spill] sm:$0xff]  ;;  %v1004_v51 = vmax.f32 %v656_v47, 0.0 }
 0x14f   :  { %1141 = vmatprep.subr.mxu0 %v1016_v6  ;;  %1218 = vmatprep.subr.mxu1 %v1018_v38  ;;  %v839_v50 = vadd.f32 %v2815_v27, %v2254_v34  ;;  %v1006_v6 = vmax.f32 %v849_v2, 0.0  ;;  %v2816_v38 = vld [vmem:[#allocation6_spill] sm:$0xff]  ;;  %v837_v26 = vadd.f32 %v2817_v49, %v2250_v33  ;;  %v2819_v2 = vld [vmem:[#allocation5_spill] sm:$0xff]  ;;  %v1000_v44 = vmax.f32 %v652_v58, 0.0 }
 0x150   :  { %v2388_v61 = vpop.f32.mrf.mxu0  ;;  %v2390_v14 = vpop.f32.mrf.mxu1  ;;  %1142 = vmatpush1.msra.mxu0 %v1015_v3  ;;  %1219 = vmatpush1.msra.mxu1 %v1017_v4  ;;  %v644_v48 = vadd.f32 %v2816_v38, %v2248_v30  ;;  %v1003_v3 = vmax.f32 %v654_v63, 0.0  ;;  %v1005_v4 = vmax.f32 %v847_v17, 0.0  ;;  %v1002_v0 = vmax.f32 %v845_v12, 0.0  ;;  %v2821_v17 = vld [vmem:[#allocation3_spill] sm:$0xff] }
 0x151   :  { %1143 = vmatprep.subr.mxu0 %v1012_v20  ;;  %1220 = vmatprep.subr.mxu1 %v1014_v16  ;;  %v2818_v20 = vld [vmem:[#allocation4_spill] sm:$0xff]  ;;  %v835_v16 = vadd.f32 %v2819_v2, %v2254_v34  ;;  %v999_v15 = vmax.f32 %v650_v29, 0.0  ;;  %v1001_v59 = vmax.f32 %v843_v54, 0.0  ;;  %v996_v57 = vmax.f32 %v646_v8, 0.0 }
 0x152   :  { %v2400_v7 = vpop.f32.mrf.mxu0  ;;  %v2402_v52 = vpop.f32.mrf.mxu1  ;;  %1144 = vmatpush1.msra.mxu0 %v1011_v40  ;;  %1221 = vmatpush1.msra.mxu1 %v1013_v60  ;;  %v642_v47 = vadd.f32 %v2818_v20, %v2252_v35  ;;  %v2820_v40 = vld [vmem:[#allocation2_spill] sm:$0xff]  ;;  %v833_v60 = vadd.f32 %v2821_v17, %v2250_v33  ;;  %v998_v9 = vmax.f32 %v839_v50, 0.0  ;;  %v995_v58 = vmax.f32 %v644_v48, 0.0 }
 0x153   :  { %1145 = vmatprep.subr.mxu0 %v1008_v62  ;;  %1222 = vmatprep.subr.mxu1 %v1010_v56  ;;  %v640_v63 = vadd.f32 %v2820_v40, %v2248_v30  ;;  %v997_v12 = vmax.f32 %v837_v26, 0.0  ;;  %v994_v54 = vmax.f32 %v835_v16, 0.0 }
 0x154   :  { %v2412_v46 = vpop.f32.mrf.mxu0  ;;  %v2414_v1 = vpop.f32.mrf.mxu1  ;;  %1146 = vmatpush1.msra.mxu0 %v1007_v55  ;;  %1223 = vmatpush1.msra.mxu1 %v1009_v13  ;;  %v992_v29 = vmax.f32 %v642_v47, 0.0  ;;  %v993_v27 = vmax.f32 %v833_v60, 0.0 }
 0x155   :  { %1147 = vmatprep.subr.mxu0 %v1004_v51  ;;  %1224 = vmatprep.subr.mxu1 %v1006_v6  ;;  %v991_v53 = vmax.f32 %v640_v63, 0.0 }
 0x156   :  { %v2424_v62 = vpop.f32.mrf.mxu0  ;;  %v2426_v56 = vpop.f32.mrf.mxu1  ;;  %1148 = vmatpush1.msra.mxu0 %v1003_v3  ;;  %1225 = vmatpush1.msra.mxu1 %v1005_v4 }
 0x157   :  { %1149 = vmatprep.subr.mxu0 %v1000_v44  ;;  %1226 = vmatprep.subr.mxu1 %v1002_v0 }
 0x158   :  { %v2428_v55 = vpop.f32.mrf.mxu0  ;;  %v2430_v13 = vpop.f32.mrf.mxu1  ;;  %1150 = vmatpush1.msra.mxu0 %v999_v15  ;;  %1227 = vmatpush1.msra.mxu1 %v1001_v59 }
 0x159   :  { %1151 = vmatprep.subr.mxu0 %v996_v57  ;;  %1228 = vmatprep.subr.mxu1 %v998_v9 }
 0x15a   :  { %v2432_v51 = vpop.f32.mrf.mxu0  ;;  %v2434_v8 = vpop.f32.mrf.mxu1  ;;  %1152 = vmatpush1.msra.mxu0 %v995_v58  ;;  %1229 = vmatpush1.msra.mxu1 %v997_v12 }
 0x15b   :  { %1153 = vmatprep.subr.mxu0 %v992_v29  ;;  %1230 = vmatprep.subr.mxu1 %v994_v54 }
 0x15c   :  { %v2436_v50 = vpop.f32.mrf.mxu0  ;;  %v2438_v6 = vpop.f32.mrf.mxu1  ;;  %1154 = vmatpush1.msra.mxu0 %v991_v53  ;;  %1231 = vmatpush1.msra.mxu1 %v993_v27 }
 0x15e   :  { %v2440_v38 = vpop.f32.mrf.mxu0  ;;  %v2442_v48 = vpop.f32.mrf.mxu1 }
 0x160   :  { %v2444_v49 = vpop.f32.mrf.mxu0  ;;  %v2446_v26 = vpop.f32.mrf.mxu1 }
 0x162   :  { %v2448_v3 = vpop.f32.mrf.mxu0  ;;  %v2450_v4 = vpop.f32.mrf.mxu1 }
 0x164   :  { %v771_v20 = vpop.f32.mrf.mxu0  ;;  %v964_v47 = vpop.f32.mrf.mxu1 }
 0x166   :  { %v773_v2 = vpop.f32.mrf.mxu0  ;;  %v966_v16 = vpop.f32.mrf.mxu1 }
 0x168   :  { %v775_v44 = vpop.f32.mrf.mxu0  ;;  %v968_v0 = vpop.f32.mrf.mxu1 }
 0x16a   :  { %v779_v40 = vpop.f32.mrf.mxu0  ;;  %v972_v63 = vpop.f32.mrf.mxu1 }
 0x16c   :  { %v781_v17 = vpop.f32.mrf.mxu0  ;;  %v974_v60 = vpop.f32.mrf.mxu1 }
 0x16e   :  { %v783_v15 = vpop.f32.mrf.mxu0  ;;  %v976_v59 = vpop.f32.mrf.mxu1 }
 0x16f   :  { %v784_v11 = vadd.f32 %v783_v15, %v2248_v30  ;;  %v776_v15 = vadd.f32 %v775_v44, %v2252_v35 }
 0x170   :  { %v785_v57 = vpop.f32.mrf.mxu0  ;;  %v978_v9 = vpop.f32.mrf.mxu1 }
 0x171   :  { %v786_v43 = vadd.f32 %v785_v57, %v2252_v35  ;;  %v780_v57 = vadd.f32 %v779_v40, %v2248_v30 }
 0x172   :  { %v789_v58 = vpop.f32.mrf.mxu0  ;;  %v982_v12 = vpop.f32.mrf.mxu1 }
 0x173   :  { %v790_v22 = vadd.f32 %v789_v58, %v2248_v30  ;;  %v983_v21 = vadd.f32 %v982_v12, %v2250_v33 }
 0x174   :  { %v791_v29 = vpop.f32.mrf.mxu0  ;;  %v984_v54 = vpop.f32.mrf.mxu1 }
 0x175   :  { %v792_v24 = vadd.f32 %v791_v29, %v2252_v35  ;;  %v985_v42 = vadd.f32 %v984_v54, %v2254_v34  ;;  %v977_v29 = vadd.f32 %v976_v59, %v2250_v33 }
 0x176   :  { %v793_v53 = vpop.f32.mrf.mxu0  ;;  %v986_v27 = vpop.f32.mrf.mxu1 }
 0x177   :  { %v794_v25 = vadd.f32 %v793_v53, %v2248_v30  ;;  %v987_v45 = vadd.f32 %v986_v27, %v2250_v33  ;;  %v979_v53 = vadd.f32 %v978_v9, %v2254_v34  ;;  %v1112_v32 = vmax.f32 %v792_v24, 0.0 }
 0x178   :  { %v795_v36 = vpop.f32.mrf.mxu0  ;;  %v988_v37 = vpop.f32.mrf.mxu1  ;;  %v1114_v58 = vmax.f32 %v985_v42, 0.0  ;;  %v973_v9 = vadd.f32 %v972_v63, %v2250_v33  ;;  %v774_v42 = vadd.f32 %v773_v2, %v2248_v30  ;;  %v967_v24 = vadd.f32 %v966_v16, %v2250_v33 }
 0x179   :  { %v796_v31 = vadd.f32 %v795_v36, %v2252_v35  ;;  %v989_v28 = vadd.f32 %v988_v37, %v2254_v34  ;;  %v1115_v18 = vmax.f32 %v794_v25, 0.0  ;;  %v1117_v54 = vmax.f32 %v987_v45, 0.0 }
 0x17a   :  { %v782_v36 = vadd.f32 %v781_v17, %v2252_v35  ;;  %v975_v37 = vadd.f32 %v974_v60, %v2254_v34  ;;  %v969_v45 = vadd.f32 %v968_v0, %v2254_v34  ;;  %v1108_v25 = vmax.f32 %v786_v43, 0.0 }
 0x17b   :  { %v1116_v41 = vmax.f32 %v796_v31, 0.0  ;;  %v1118_v27 = vmax.f32 %v989_v28, 0.0  ;;  %v1111_v31 = vmax.f32 %v790_v22, 0.0  ;;  %v1113_v28 = vmax.f32 %v983_v21, 0.0 }
 0x17c   :  { %v1110_v17 = vmax.f32 %v979_v53, 0.0  ;;  %v1109_v40 = vmax.f32 %v977_v29, 0.0  ;;  %v772_v21 = vadd.f32 %v771_v20, %v2252_v35  ;;  %v965_v22 = vadd.f32 %v964_v47, %v2254_v34 }
 0x17d   :  { %1155 = vmatprep.subr.mxu0 %v1116_v41  ;;  %1232 = vmatprep.subr.mxu1 %v1118_v27  ;;  %v1107_v41 = vmax.f32 %v784_v11, 0.0  ;;  %v1106_v44 = vmax.f32 %v975_v37, 0.0  ;;  %v770_v43 = vadd.f32 %v2448_v3, %v2248_v30  ;;  %v1103_v2 = vmax.f32 %v780_v57, 0.0 }
 0x17e   :  { %1156 = vmatpush2.msra.mxu0 %v1115_v18  ;;  %1233 = vmatpush2.msra.mxu1 %v1117_v54  ;;  %v1104_v18 = vmax.f32 %v782_v36, 0.0  ;;  %v1105_v16 = vmax.f32 %v973_v9, 0.0  ;;  %v766_v11 = vadd.f32 %v2444_v49, %v2252_v35  ;;  %v959_v20 = vadd.f32 %v2446_v26, %v2254_v34 }
 0x17f   :  { %1157 = vmatprep.subr.mxu0 %v1112_v32  ;;  %1234 = vmatprep.subr.mxu1 %v1114_v58  ;;  %v963_v32 = vadd.f32 %v2450_v4, %v2250_v33  ;;  %v1100_v47 = vmax.f32 %v776_v15, 0.0  ;;  %v1102_v0 = vmax.f32 %v969_v45, 0.0  ;;  %v764_v3 = vadd.f32 %v2440_v38, %v2248_v30 }
 0x180   :  { %1158 = vmatpush2.msra.mxu0 %v1111_v31  ;;  %1235 = vmatpush2.msra.mxu1 %v1113_v28  ;;  %v957_v4 = vadd.f32 %v2442_v48, %v2250_v33  ;;  %v1099_v63 = vmax.f32 %v774_v42, 0.0  ;;  %v1101_v60 = vmax.f32 %v967_v24, 0.0  ;;  %v762_v49 = vadd.f32 %v2436_v50, %v2252_v35  ;;  %v2822_v24 = vld [vmem:[#allocation35_spill] sm:$0xff] }
 0x181   :  { %1159 = vmatprep.subr.mxu0 %v1108_v25  ;;  %1236 = vmatprep.subr.mxu1 %v1110_v17  ;;  %v955_v26 = vadd.f32 %v2438_v6, %v2254_v34  ;;  %v1096_v59 = vmax.f32 %v772_v21, 0.0  ;;  %v1098_v12 = vmax.f32 %v965_v22, 0.0  ;;  %v760_v38 = vadd.f32 %v2432_v51, %v2248_v30  ;;  %v2823_v21 = vld [vmem:[#allocation33_spill] sm:$0xff]  ;;  %v2824_v22 = vld [vmem:[#allocation34_spill] sm:$0xff] }
 0x182   :  { %1160 = vmatpush2.msra.mxu0 %v1107_v41  ;;  %1237 = vmatpush2.msra.mxu1 %v1109_v40  ;;  %v953_v48 = vadd.f32 %v2434_v8, %v2250_v33  ;;  %v1095_v53 = vmax.f32 %v770_v43, 0.0  ;;  %v1097_v27 = vmax.f32 %v963_v32, 0.0  ;;  %v756_v50 = vadd.f32 %v2428_v55, %v2252_v35  ;;  %v2825_v43 = vld [vmem:[#allocation31_spill] sm:$0xff]  ;;  %v2826_v32 = vld [vmem:[#allocation32_spill] sm:$0xff] }
 0x183   :  { %1161 = vmatprep.subr.mxu0 %v1104_v18  ;;  %1238 = vmatprep.subr.mxu1 %v1106_v44  ;;  %v949_v6 = vadd.f32 %v2430_v13, %v2254_v34  ;;  %v1092_v29 = vmax.f32 %v766_v11, 0.0  ;;  %v1094_v54 = vmax.f32 %v959_v20, 0.0  ;;  %v754_v51 = vadd.f32 %v2424_v62, %v2248_v30  ;;  %v2827_v20 = vld [vmem:[#allocation29_spill] sm:$0xff] }
 0x184   :  { %1162 = vmatpush2.msra.mxu0 %v1103_v2  ;;  %1239 = vmatpush2.msra.mxu1 %v1105_v16  ;;  %v947_v8 = vadd.f32 %v2426_v56, %v2250_v33  ;;  %v1091_v36 = vmax.f32 %v764_v3, 0.0  ;;  %v1093_v37 = vmax.f32 %v957_v4, 0.0  ;;  %v752_v55 = vadd.f32 %v2412_v46, %v2252_v35 }
 0x185   :  { %1163 = vmatprep.subr.mxu0 %v1100_v47  ;;  %1240 = vmatprep.subr.mxu1 %v1102_v0  ;;  %v945_v13 = vadd.f32 %v2414_v1, %v2254_v34  ;;  %v1088_v58 = vmax.f32 %v762_v49, 0.0  ;;  %v1090_v57 = vmax.f32 %v955_v26, 0.0  ;;  %v750_v62 = vadd.f32 %v2400_v7, %v2248_v30  ;;  %v2828_v0 = vld [vmem:[#allocation30_spill] sm:$0xff]  ;;  %v2830_v26 = vld [vmem:[#allocation28_spill] sm:$0xff] }
 0x186   :  { %1164 = vmatpush2.msra.mxu0 %v1099_v63  ;;  %1241 = vmatpush2.msra.mxu1 %v1101_v60  ;;  %v943_v56 = vadd.f32 %v2402_v52, %v2250_v33  ;;  %v1087_v9 = vmax.f32 %v760_v38, 0.0  ;;  %v1089_v31 = vmax.f32 %v953_v48, 0.0  ;;  %v746_v46 = vadd.f32 %v2388_v61, %v2252_v35  ;;  %v2829_v60 = vld [vmem:[#allocation27_spill] sm:$0xff]  ;;  %v2831_v48 = vld [vmem:[#allocation25_spill] sm:$0xff] }
 0x187   :  { %1165 = vmatprep.subr.mxu0 %v1096_v59  ;;  %1242 = vmatprep.subr.mxu1 %v1098_v12  ;;  %v939_v1 = vadd.f32 %v2390_v14, %v2254_v34  ;;  %v1084_v28 = vmax.f32 %v756_v50, 0.0  ;;  %v1086_v15 = vmax.f32 %v949_v6, 0.0  ;;  %v744_v7 = vadd.f32 %v2376_v19, %v2248_v30 }
 0x188   :  { %1166 = vmatpush2.msra.mxu0 %v1095_v53  ;;  %1243 = vmatpush2.msra.mxu1 %v1097_v27  ;;  %v937_v52 = vadd.f32 %v2378_v23, %v2250_v33  ;;  %v1083_v45 = vmax.f32 %v754_v51, 0.0  ;;  %v1085_v25 = vmax.f32 %v947_v8, 0.0  ;;  %v742_v61 = vadd.f32 %v2364_v39, %v2252_v35  ;;  %v2832_v27 = vld [vmem:[#allocation26_spill] sm:$0xff]  ;;  %v2834_v8 = vld [vmem:[#allocation24_spill] sm:$0xff] }
 0x189   :  { %1167 = vmatprep.subr.mxu0 %v1092_v29  ;;  %1244 = vmatprep.subr.mxu1 %v1094_v54  ;;  %v935_v14 = vadd.f32 %v2366_v5, %v2254_v34  ;;  %v1080_v17 = vmax.f32 %v752_v55, 0.0  ;;  %v1082_v42 = vmax.f32 %v945_v13, 0.0  ;;  %v740_v19 = vadd.f32 %v2352_v10, %v2248_v30  ;;  %v2833_v54 = vld [vmem:[#allocation23_spill] sm:$0xff]  ;;  %v2835_v13 = vld [vmem:[#allocation21_spill] sm:$0xff] }
 0x18a   :  { %1168 = vmatpush2.msra.mxu0 %v1091_v36  ;;  %1245 = vmatpush2.msra.mxu1 %v1093_v37  ;;  %v933_v23 = vadd.f32 %v2822_v24, %v2250_v33  ;;  %v1079_v41 = vmax.f32 %v750_v62, 0.0  ;;  %v1081_v40 = vmax.f32 %v943_v56, 0.0  ;;  %v736_v39 = vadd.f32 %v2823_v21, %v2252_v35  ;;  %v1292_v24 = vld [vmem:[%s2769_s4 + $0x78] sm:$0xff]  ;;  %v1339_v21 = vld [vmem:[%s2769_s4 + $0x1f0] sm:$0xff] }
 0x18b   :  { %1169 = vmatprep.subr.mxu0 %v1088_v58  ;;  %1246 = vmatprep.subr.mxu1 %v1090_v57  ;;  %v929_v5 = vadd.f32 %v2824_v22, %v2254_v34  ;;  %v1076_v18 = vmax.f32 %v746_v46, 0.0  ;;  %v1078_v44 = vmax.f32 %v939_v1, 0.0  ;;  %v734_v10 = vadd.f32 %v2825_v43, %v2248_v30  ;;  %v2836_v57 = vld [vmem:[#allocation22_spill] sm:$0xff]  ;;  %v2838_v1 = vld [vmem:[#allocation20_spill] sm:$0xff]  ;;  %v1322_v43 = vld [vmem:[%s2769_s4 + $0x168] sm:$0xff] }
 0x18c   :  { %1170 = vmatpush2.msra.mxu0 %v1087_v9  ;;  %1247 = vmatpush2.msra.mxu1 %v1089_v31  ;;  %v927_v2 = vadd.f32 %v2826_v32, %v2250_v33  ;;  %v1075_v16 = vmax.f32 %v744_v7, 0.0  ;;  %v1077_v11 = vmax.f32 %v937_v52, 0.0  ;;  %v732_v47 = vadd.f32 %v2827_v20, %v2252_v35  ;;  %v2837_v31 = vld [vmem:[#allocation19_spill] sm:$0xff]  ;;  %v1323_v22 = vld [vmem:[%s2769_s4 + $0x170] sm:$0xff]  ;;  %v1337_v32 = vld [vmem:[%s2769_s4 + $0x1e0] sm:$0xff] }
 0x18d   :  { %1171 = vmatprep.subr.mxu0 %v1084_v28  ;;  %1248 = vmatprep.subr.mxu1 %v1086_v15  ;;  %v925_v3 = vadd.f32 %v2828_v0, %v2254_v34  ;;  %v1072_v4 = vmax.f32 %v742_v61, 0.0  ;;  %v1074_v63 = vmax.f32 %v935_v14, 0.0  ;;  %v730_v49 = vadd.f32 %v2829_v60, %v2248_v30  ;;  %v1336_v20 = vld [vmem:[%s2769_s4 + $0x1d8] sm:$0xff]  ;;  %v1319_v60 = vld [vmem:[%s2769_s4 + $0x150] sm:$0xff] }
 0x18e   :  { %1172 = vmatpush2.msra.mxu0 %v1083_v45  ;;  %1249 = vmatpush2.msra.mxu1 %v1085_v25  ;;  %v923_v59 = vadd.f32 %v2830_v26, %v2250_v33  ;;  %v1071_v12 = vmax.f32 %v740_v19, 0.0  ;;  %v1073_v38 = vmax.f32 %v933_v23, 0.0  ;;  %v726_v53 = vadd.f32 %v2831_v48, %v2252_v35  ;;  %v1340_v19 = vld [vmem:[%s2769_s4 + $0x1f8] sm:$0xff]  ;;  %v1334_v26 = vld [vmem:[%s2769_s4 + $0x1c8] sm:$0xff]  ;;  %v1333_v48 = vld [vmem:[%s2769_s4 + $0x1c0] sm:$0xff] }
 0x18f   :  { %1173 = vmatprep.subr.mxu0 %v1080_v17  ;;  %1250 = vmatprep.subr.mxu1 %v1082_v42  ;;  %v919_v50 = vadd.f32 %v2832_v27, %v2254_v34  ;;  %v1068_v6 = vmax.f32 %v736_v39, 0.0  ;;  %v1070_v29 = vmax.f32 %v929_v5, 0.0  ;;  %v724_v51 = vadd.f32 %v2833_v54, %v2248_v30  ;;  %v1122_v17 = vld [vmem:[%s2767_s3 + $0x18] sm:$0xff]  ;;  %v1291_v39 = vld [vmem:[%s2769_s4 + $0x70] sm:$0xff]  ;;  %v1306_v5 = vld [vmem:[%s2769_s4 + $0xe8] sm:$0xff] }
 0x190   :  { %1174 = vmatpush2.msra.mxu0 %v1079_v41  ;;  %1251 = vmatpush2.msra.mxu1 %v1081_v40  ;;  %v917_v36 = vadd.f32 %v2834_v8, %v2250_v33  ;;  %v1067_v37 = vmax.f32 %v734_v10, 0.0  ;;  %v1069_v55 = vmax.f32 %v927_v2, 0.0  ;;  %v722_v58 = vadd.f32 %v2835_v13, %v2252_v35  ;;  %v1308_v42 = vld [vmem:[%s2769_s4 + $0xf8] sm:$0xff]  ;;  %v1121_v41 = vld [vmem:[%s2767_s3 + $0x10] sm:$0xff]  ;;  %v1305_v10 = vld [vmem:[%s2769_s4 + $0xe0] sm:$0xff] }
 0x191   :  { %1175 = vmatprep.subr.mxu0 %v1076_v18  ;;  %1252 = vmatprep.subr.mxu1 %v1078_v44  ;;  %v915_v62 = vadd.f32 %v2836_v57, %v2254_v34  ;;  %v1064_v56 = vmax.f32 %v732_v47, 0.0  ;;  %v1066_v9 = vmax.f32 %v925_v3, 0.0  ;;  %v720_v46 = vadd.f32 %v2837_v31, %v2248_v30  ;;  %v1324_v23 = vld [vmem:[%s2769_s4 + $0x178] sm:$0xff]  ;;  %v1307_v40 = vld [vmem:[%s2769_s4 + $0xf0] sm:$0xff]  ;;  %v1338_v18 = vld [vmem:[%s2769_s4 + $0x1e8] sm:$0xff] }
 0x192   :  { %1176 = vmatpush2.msra.mxu0 %v1075_v16  ;;  %1253 = vmatpush2.msra.mxu1 %v1077_v11  ;;  %v913_v28 = vadd.f32 %v2838_v1, %v2250_v33  ;;  %v1063_v15 = vmax.f32 %v730_v49, 0.0  ;;  %v1065_v7 = vmax.f32 %v923_v59, 0.0  ;;  %v1060_v52 = vmax.f32 %v726_v53, 0.0  ;;  %v1119_v33 = vld [vmem:[%s2767_s3] sm:$0xff]  ;;  %v1290_v44 = vld [vmem:[%s2769_s4 + $0x68] sm:$0xff]  ;;  %v1304_v11 = vld [vmem:[%s2769_s4 + $0xd8] sm:$0xff] }
 0x193   :  { %1177 = vmatprep.subr.mxu0 %v1072_v4  ;;  %1254 = vmatprep.subr.mxu1 %v1074_v63  ;;  %v1062_v45 = vmax.f32 %v919_v50, 0.0  ;;  %v1059_v35 = vmax.f32 %v724_v51, 0.0  ;;  %v1061_v34 = vmax.f32 %v917_v36, 0.0  ;;  %v1056_v25 = vmax.f32 %v722_v58, 0.0  ;;  %v1289_v2 = vld [vmem:[%s2769_s4 + $0x60] sm:$0xff]  ;;  %v1288_v47 = vld [vmem:[%s2769_s4 + $0x58] sm:$0xff] }
 0x194   :  { %1178 = vmatpush2.msra.mxu0 %v1071_v12  ;;  %1255 = vmatpush2.msra.mxu1 %v1073_v38  ;;  %v1058_v61 = vmax.f32 %v915_v62, 0.0  ;;  %v1055_v30 = vmax.f32 %v720_v46, 0.0  ;;  %v1057_v14 = vmax.f32 %v913_v28, 0.0  ;;  %v1321_v16 = vld [vmem:[%s2769_s4 + $0x160] sm:$0xff]  ;;  %v1320_v0 = vld [vmem:[%s2769_s4 + $0x158] sm:$0xff]  ;;  %v1303_v3 = vld [vmem:[%s2769_s4 + $0xd0] sm:$0xff] }
 0x195   :  { %1179 = vmatprep.subr.mxu0 %v1068_v6  ;;  %1256 = vmatprep.subr.mxu1 %v1070_v29  ;;  %v1335_v4 = vld [vmem:[%s2769_s4 + $0x1d0] sm:$0xff]  ;;  %v1302_v49 = vld [vmem:[%s2769_s4 + $0xc8] sm:$0xff]  ;;  %v1301_v38 = vld [vmem:[%s2769_s4 + $0xc0] sm:$0xff] }
 0x196   :  { %1180 = vmatpush2.msra.mxu0 %v1067_v37  ;;  %1257 = vmatpush2.msra.mxu1 %v1069_v55  ;;  %v1287_v63 = vld [vmem:[%s2769_s4 + $0x50] sm:$0xff]  ;;  %v1286_v59 = vld [vmem:[%s2769_s4 + $0x48] sm:$0xff]  ;;  %v1285_v53 = vld [vmem:[%s2769_s4 + $0x40] sm:$0xff] }
 0x197   :  { %1181 = vmatprep.subr.mxu0 %v1064_v56  ;;  %1258 = vmatprep.subr.mxu1 %v1066_v9  ;;  %v1318_v12 = vld [vmem:[%s2769_s4 + $0x148] sm:$0xff]  ;;  %v1317_v27 = vld [vmem:[%s2769_s4 + $0x140] sm:$0xff]  ;;  %v1300_v50 = vld [vmem:[%s2769_s4 + $0xb8] sm:$0xff] }
 0x198   :  { %1182 = vmatpush2.msra.mxu0 %v1063_v15  ;;  %1259 = vmatpush2.msra.mxu1 %v1065_v7  ;;  %v1332_v6 = vld [vmem:[%s2769_s4 + $0x1b8] sm:$0xff]  ;;  %v1299_v51 = vld [vmem:[%s2769_s4 + $0xb0] sm:$0xff]  ;;  %v1298_v55 = vld [vmem:[%s2769_s4 + $0xa8] sm:$0xff] }
 0x199   :  { %1183 = vmatprep.subr.mxu0 %v1060_v52  ;;  %1260 = vmatprep.subr.mxu1 %v1062_v45  ;;  %v1284_v29 = vld [vmem:[%s2769_s4 + $0x38] sm:$0xff]  ;;  %v1331_v8 = vld [vmem:[%s2769_s4 + $0x1b0] sm:$0xff]  ;;  %v1330_v13 = vld [vmem:[%s2769_s4 + $0x1a8] sm:$0xff] }
 0x19a   :  { %1184 = vmatpush2.msra.mxu0 %v1059_v35  ;;  %1261 = vmatpush2.msra.mxu1 %v1061_v34  ;;  %v1316_v54 = vld [vmem:[%s2769_s4 + $0x138] sm:$0xff]  ;;  %v1283_v36 = vld [vmem:[%s2769_s4 + $0x30] sm:$0xff]  ;;  %v1282_v58 = vld [vmem:[%s2769_s4 + $0x28] sm:$0xff] }
 0x19b   :  { %1185 = vmatprep.subr.mxu0 %v1056_v25  ;;  %1262 = vmatprep.subr.mxu1 %v1058_v61  ;;  %v1315_v37 = vld [vmem:[%s2769_s4 + $0x130] sm:$0xff]  ;;  %v1314_v57 = vld [vmem:[%s2769_s4 + $0x128] sm:$0xff]  ;;  %v1297_v62 = vld [vmem:[%s2769_s4 + $0xa0] sm:$0xff] }
 0x19c   :  { %1186 = vmatpush2.msra.mxu0 %v1055_v30  ;;  %1263 = vmatpush2.msra.mxu1 %v1057_v14  ;;  %v1329_v56 = vld [vmem:[%s2769_s4 + $0x1a0] sm:$0xff]  ;;  %v1296_v46 = vld [vmem:[%s2769_s4 + $0x98] sm:$0xff]  ;;  %v1295_v7 = vld [vmem:[%s2769_s4 + $0x90] sm:$0xff] }
 0x19d   :  { %1188 = vmatmul.mubr.f32.vlgmr.msra.gmra.mxu0 %v1119_v33  ;;  %1265 = vmatmul.mubr.f32.vlgmr.msra.gmra.mxu1 %v1119_v33  ;;  %v1281_v9 = vld [vmem:[%s2769_s4 + $0x20] sm:$0xff]  ;;  %v1328_v1 = vld [vmem:[%s2769_s4 + $0x198] sm:$0xff]  ;;  %v1327_v52 = vld [vmem:[%s2769_s4 + $0x190] sm:$0xff] }
 0x19e   :  { %1193 = vmatprep.mubr.f32.mxu0 %v1122_v17  ;;  %1270 = vmatprep.mubr.f32.mxu1 %v1122_v17  ;;  %v1313_v31 = vld [vmem:[%s2769_s4 + $0x120] sm:$0xff]  ;;  %v1280_v28 = vld [vmem:[%s2769_s4 + $0x18] sm:$0xff]  ;;  %v1279_v45 = vld [vmem:[%s2769_s4 + $0x10] sm:$0xff] }
 0x19f   :  { %1620 = vmatprep.subr.mxu0 %v1308_v42  ;;  %1658 = vmatprep.subr.mxu1 %v1340_v19  ;;  %v1312_v15 = vld [vmem:[%s2769_s4 + $0x118] sm:$0xff]  ;;  %v1311_v35 = vld [vmem:[%s2769_s4 + $0x110] sm:$0xff]  ;;  %v1294_v34 = vld [vmem:[%s2769_s4 + $0x88] sm:$0xff] }
 0x1a0   :  { %1621 = vmatpush3.msra.mxu0 %v1292_v24  ;;  %1659 = vmatpush3.msra.mxu1 %v1324_v23  ;;  %v1326_v25 = vld [vmem:[%s2769_s4 + $0x188] sm:$0xff]  ;;  %v1293_v14 = vld [vmem:[%s2769_s4 + $0x80] sm:$0xff] }
 0x1a1   :  { %1194 = vmatmul.mubr.f32.gmra.mxu0 %v1121_v41  ;;  %1271 = vmatmul.mubr.f32.gmra.mxu1 %v1121_v41  ;;  %v1278_v61 = vld [vmem:[%s2769_s4 + $0x8] sm:$0xff]  ;;  %v1325_v33 = vld [vmem:[%s2769_s4 + $0x180] sm:$0xff] }
 0x1a2   :  { %1622 = vmatprep.subr.mxu0 %v1307_v40  ;;  %1660 = vmatprep.subr.mxu1 %v1339_v21  ;;  %v1310_v30 = vld [vmem:[%s2769_s4 + $0x108] sm:$0xff]  ;;  %v1277_v17 = vld [vmem:[%s2769_s4] sm:$0xff] }
 0x1a3   :  { %1623 = vmatpush3.msra.mxu0 %v1291_v39  ;;  %1661 = vmatpush3.msra.mxu1 %v1323_v22  ;;  %v1309_v42 = vld [vmem:[%s2769_s4 + $0x100] sm:$0xff] }
 0x1a4   :  { %1624 = vmatprep.subr.mxu0 %v1306_v5  ;;  %1662 = vmatprep.subr.mxu1 %v1338_v18 }
 0x1a5   :  { %1625 = vmatpush3.msra.mxu0 %v1290_v44  ;;  %1663 = vmatpush3.msra.mxu1 %v1322_v43 }
 0x1a6   :  { %1626 = vmatprep.subr.mxu0 %v1305_v10  ;;  %1664 = vmatprep.subr.mxu1 %v1337_v32 }
 0x1a7   :  { %1627 = vmatpush3.msra.mxu0 %v1289_v2  ;;  %1665 = vmatpush3.msra.mxu1 %v1321_v16 }
 0x1a8   :  { %1628 = vmatprep.subr.mxu0 %v1304_v11  ;;  %1666 = vmatprep.subr.mxu1 %v1336_v20 }
 0x1a9   :  { %1629 = vmatpush3.msra.mxu0 %v1288_v47  ;;  %1667 = vmatpush3.msra.mxu1 %v1320_v0 }
 0x1aa   :  { %1630 = vmatprep.subr.mxu0 %v1303_v3  ;;  %1668 = vmatprep.subr.mxu1 %v1335_v4 }
 0x1ab   :  { %1631 = vmatpush3.msra.mxu0 %v1287_v63  ;;  %1669 = vmatpush3.msra.mxu1 %v1319_v60 }
 0x1ac   :  { %1632 = vmatprep.subr.mxu0 %v1302_v49  ;;  %1670 = vmatprep.subr.mxu1 %v1334_v26 }
 0x1ad   :  { %1633 = vmatpush3.msra.mxu0 %v1286_v59  ;;  %1671 = vmatpush3.msra.mxu1 %v1318_v12 }
 0x1ae   :  { %1634 = vmatprep.subr.mxu0 %v1301_v38  ;;  %1672 = vmatprep.subr.mxu1 %v1333_v48 }
 0x1af   :  { %1635 = vmatpush3.msra.mxu0 %v1285_v53  ;;  %1673 = vmatpush3.msra.mxu1 %v1317_v27 }
 0x1b0   :  { %1636 = vmatprep.subr.mxu0 %v1300_v50  ;;  %1674 = vmatprep.subr.mxu1 %v1332_v6 }
 0x1b1   :  { %1637 = vmatpush3.msra.mxu0 %v1284_v29  ;;  %1675 = vmatpush3.msra.mxu1 %v1316_v54 }
 0x1b2   :  { %1638 = vmatprep.subr.mxu0 %v1299_v51  ;;  %1676 = vmatprep.subr.mxu1 %v1331_v8 }
 0x1b3   :  { %1639 = vmatpush3.msra.mxu0 %v1283_v36  ;;  %1677 = vmatpush3.msra.mxu1 %v1315_v37 }
 0x1b4   :  { %1640 = vmatprep.subr.mxu0 %v1298_v55  ;;  %1678 = vmatprep.subr.mxu1 %v1330_v13 }
 0x1b5   :  { %1641 = vmatpush3.msra.mxu0 %v1282_v58  ;;  %1679 = vmatpush3.msra.mxu1 %v1314_v57 }
 0x1b6   :  { %1642 = vmatprep.subr.mxu0 %v1297_v62  ;;  %1680 = vmatprep.subr.mxu1 %v1329_v56 }
 0x1b7   :  { %1643 = vmatpush3.msra.mxu0 %v1281_v9  ;;  %1681 = vmatpush3.msra.mxu1 %v1313_v31 }
 0x1b8   :  { %1644 = vmatprep.subr.mxu0 %v1296_v46  ;;  %1682 = vmatprep.subr.mxu1 %v1328_v1 }
 0x1b9   :  { %1645 = vmatpush3.msra.mxu0 %v1280_v28  ;;  %1683 = vmatpush3.msra.mxu1 %v1312_v15 }
 0x1ba   :  { %1646 = vmatprep.subr.mxu0 %v1295_v7  ;;  %1684 = vmatprep.subr.mxu1 %v1327_v52 }
 0x1bb   :  { %1647 = vmatpush3.msra.mxu0 %v1279_v45  ;;  %1685 = vmatpush3.msra.mxu1 %v1311_v35 }
 0x1bc   :  { %1648 = vmatprep.subr.mxu0 %v1294_v34  ;;  %1686 = vmatprep.subr.mxu1 %v1326_v25 }
 0x1bd   :  { %1649 = vmatpush3.msra.mxu0 %v1278_v61  ;;  %1687 = vmatpush3.msra.mxu1 %v1310_v30 }
 0x1be   :  { %1650 = vmatprep.subr.mxu0 %v1293_v14  ;;  %1688 = vmatprep.subr.mxu1 %v1325_v33 }
 0x1bf   :  { %1651 = vmatpush3.msra.mxu0 %v1277_v17  ;;  %1689 = vmatpush3.msra.mxu1 %v1309_v42 }
 0x25d   :  { %v1189_v19 = vpop.f32.mrf.mxu0  ;;  %v1266_v24 = vpop.f32.mrf.mxu1 }
 0x25f   :  { %v1191_v23 = vpop.f32.mrf.mxu0  ;;  %v1268_v41 = vpop.f32.mrf.mxu1 }
 0x260   :  { %1405 = vmatprep.mubr.f32.mxu0 %v1191_v23  ;;  %1480 = vmatprep.mubr.f32.mxu1 %v1268_v41 }
 0x261   :  { %v1195_v40 = vpop.f32.mrf.mxu0  ;;  %v1272_v21 = vpop.f32.mrf.mxu1  ;;  %1406 = vmatmul.mubr.f32.vlgmr.msra.gmra.mxu0 %v1189_v19  ;;  %1481 = vmatmul.mubr.f32.vlgmr.msra.gmra.mxu1 %v1266_v24 }
 0x263   :  { %v1197_v39 = vpop.f32.mrf.mxu0  ;;  %v1274_v22 = vpop.f32.mrf.mxu1 }
 0x264   :  { %1410 = vmatprep.mubr.f32.mxu0 %v1197_v39  ;;  %1485 = vmatprep.mubr.f32.mxu1 %v1274_v22 }
 0x265   :  { %1411 = vmatmul.mubr.f32.gmra.mxu0 %v1195_v40  ;;  %1486 = vmatmul.mubr.f32.gmra.mxu1 %v1272_v21 }
 0x321   :  { %v1652_v5 = vpop.f32.mrf.mxu0  ;;  %v1690_v18 = vpop.f32.mrf.mxu1 }
 0x323   :  { %v1653_v44 = vpop.f32.mrf.mxu0  ;;  %v1691_v43 = vpop.f32.mrf.mxu1 }
 0x324   :  { %v1654_v10 = vadd.f32 %v1653_v44, %v1652_v5  ;;  %v1692_v32 = vadd.f32 %v1691_v43, %v1690_v18 }
 0x325   :  { %v1655_v2 = vpop.f32.mrf.mxu0  ;;  %v1693_v16 = vpop.f32.mrf.mxu1 }
 0x326   :  { %v1483_v11 = vadd.f32 %v1692_v32, %v1654_v10 }
 0x327   :  { %v1656_v20 = vpop.f32.mrf.mxu0  ;;  %v1694_v47 = vpop.f32.mrf.mxu1 }
 0x328   :  { %1492 = vst.msk [vmem:[%s2770_s5] sm:$0xff] %vm1491_vm2, %v1483_v11  ;;  %v1657_v0 = vadd.f32 %v1656_v20, %v1655_v2  ;;  %v1695_v3 = vadd.f32 %v1694_v47, %v1693_v16 }
 0x32a   :  { %v1488_v4 = vadd.f32 %v1695_v3, %v1657_v0 }
 0x32c   :  { %1493 = vst.msk [vmem:[%s2770_s5 + $0x8] sm:$0xff] %vm1491_vm2, %v1488_v4 }

// kernel: cnn_lstm_forward.3
= control target key start
LH: loop header
LB: loop body
LE: loop exit
PB: predicated region body
PF: predicated region fallthrough
CT: control target
= control target key end

     0   :  { %v1955_v0 = vmov 0.0   ;;  %vm1956_vm0 = vmmov 0   ;;  %vm40_vm1 = vcmask 1041409   ;;  %vm43_vm2 = vcmask 261120   ;;  %s1957_s23 = smov 32   ;;  %s1958_s11 = smov 64   ;;  %s2469_s1 = inlined_call_operand.vmem [shape: bf16[64,128], index: 1, kind: input, shape index: {}]   ;;  %s2470_s0 = inlined_call_operand.vmem [shape: f32[2,8,32], index: 0, kind: input, shape index: {}]   ;;  %s2471_s2 = inlined_call_operand.vmem [shape: f32[1,128], index: 2, kind: input, shape index: {}]   ;;  %s2472_s3 = inlined_call_operand.vmem [shape: bf16[64,128], index: 3, kind: input, shape index: {}]   ;;  %s2473_s4 = inlined_call_operand.vmem [shape: f32[1,128], index: 4, kind: input, shape index: {}]   ;;  %s2474_s5 = inlined_call_operand.vmem [shape: bf16[32,16], index: 5, kind: input, shape index: {}]   ;;  %s2475_s8 = inlined_call_operand.<no memory space> [shape: f32[1,1], index: 8, kind: input, shape index: {}]   ;;  %s2476_s6 = inlined_call_operand.vmem [shape: f32[1,16], index: 6, kind: input, shape index: {}]   ;;  %s2477_s7 = inlined_call_operand.vmem [shape: f32[1,16], index: 7, kind: input, shape index: {}]   ;;  %s2478_s9 = inlined_call_operand.vmem [shape: f32[2,1], index: 9, kind: output, shape index: {}]  }
   0x1   :  { %1601 = vmatprep.subr.bf16.mxu0 %v1955_v0  ;;  %v2014_v1 = vld [vmem:[%s2469_s1 + $0x18] sm:$0xff]   ;;  %1609 = vmatprep.mubr.msk.bf16.mxu0 %vm1956_vm0, %v1955_v0  ;;  %v2025_v2 = vld [vmem:[%s2469_s1 + $0x10] sm:$0xff]   ;;  %v2031_v3 = vld [vmem:[%s2470_s0] sm:$0xff]  ;;  %vm85_vm3 = vcmask 523264   ;;  %s1959_s12 = smov 96   ;;  %vm265_vm4 = vcmask 1042434  }
   0x2   :  { %1613 = vmatprep.subr.bf16.mxu1 %v1955_v0  ;;  %1621 = vmatprep.mubr.msk.bf16.mxu1 %vm1956_vm0, %v1955_v0  ;;  %v36_v4 = vld [vmem:[%s2470_s0 + $0x8] sm:$0xff]  ;;  %v2051_v8 = vld [vmem:[%s2469_s1] sm:$0xff]   ;;  %v2082_v27 = vld [vmem:[%s2472_s3 + $0x18] sm:$0xff]   ;;  %vm425_vm5 = vcmask 1043459   ;;  %vm580_vm6 = vcmask 1044484   ;;  %vm741_vm7 = vcmask 1045509  }
   0x3   :  { %1602 = vmatpush3.bf16.msra.mxu0 %v2014_v1  ;;  %v2036_v5 = vrot.slane %v36_v4, 7  ;;  %v2042_v6 = vld [vmem:[%s2469_s1 + $0x8] sm:$0xff]   ;;  %v2071_v11 = vld [vmem:[%s2471_s2] ss:$0 sm:$0xff]  ;;  %1614 = vmatpush3.bf16.msra.mxu1 %v2082_v27  ;;  %v2088_v28 = vld [vmem:[%s2472_s3 + $0x10] sm:$0xff]   ;;  %vm896_vm8 = vcmask 1046534  }
   0x4   :  { %1603 = vmatprep.subr.bf16.mxu0 %v1955_v0  ;;  %1615 = vmatprep.subr.bf16.mxu1 %v1955_v0  ;;  %v2095_v29 = vld [vmem:[%s2472_s3 + $0x8] sm:$0xff]   ;;  %v2104_v31 = vld [vmem:[%s2472_s3] sm:$0xff]   ;;  %vm1057_vm9 = vcmask 1047559   ;;  %vm1452_vm10 = vcmask 123904   ;;  %vm1464_vm11 = vcmask 1024  }
   0x5   :  { %v41_v7 = vsel %vm40_vm1, %v2036_v5, %v2031_v3  ;;  %v266_v36 = vsel %vm265_vm4, %v2036_v5, %v2031_v3  ;;  %v2139_v46 = vld [vmem:[%s2473_s4] ss:$0 sm:$0xff] }
   0x6   :  { %v44_v9 = vsel %vm43_vm2, %v41_v7, 0.0 }
   0x7   :  { %1604 = vmatpush3.bf16.msra.mxu0 %v2025_v2  ;;  %v45_v10 = vpack.c.bf16 %v44_v9, %v44_v9  ;;  %1616 = vmatpush3.bf16.msra.mxu1 %v2088_v28 }
   0x8   :  { %1605 = vmatprep.subr.bf16.mxu0 %v1955_v0  ;;  %1617 = vmatprep.subr.bf16.mxu1 %v1955_v0 }
   0xb   :  { %1606 = vmatpush3.bf16.msra.mxu0 %v2042_v6  ;;  %1618 = vmatpush3.bf16.msra.mxu1 %v2095_v29 }
   0xc   :  { %1607 = vmatprep.subr.bf16.mxu0 %v1955_v0  ;;  %1619 = vmatprep.subr.bf16.mxu1 %v1955_v0 }
   0xf   :  { %1608 = vmatpush3.bf16.msra.mxu0 %v2051_v8  ;;  %1620 = vmatpush3.bf16.msra.mxu1 %v2104_v31 }
  0x10   :  { %1625 = vmatprep.subr.bf16.mxu0 %v1955_v0  ;;  %1637 = vmatprep.subr.bf16.mxu1 %v1955_v0 }
  0x12   :  { %1610 = vmatmul.mubr.msk.bf16.vlgmr.msra.gmra.mxu0 %vm85_vm3, %v45_v10 }
  0x13   :  { %1626 = vmatpush3.bf16.msra.mxu0 %v2014_v1  ;;  %1633 = vmatprep.mubr.msk.bf16.mxu0 %vm1956_vm0, %v1955_v0 }
  0x14   :  { %1627 = vmatprep.subr.bf16.mxu0 %v1955_v0 }
  0x17   :  { %1628 = vmatpush3.bf16.msra.mxu0 %v2025_v2 }
  0x18   :  { %1629 = vmatprep.subr.bf16.mxu0 %v1955_v0 }
  0x1b   :  { %1630 = vmatpush3.bf16.msra.mxu0 %v2042_v6 }
  0x1c   :  { %1631 = vmatprep.subr.bf16.mxu0 %v1955_v0 }
  0x1f   :  { %1632 = vmatpush3.bf16.msra.mxu0 %v2051_v8 }
  0x20   :  { %1649 = vmatprep.subr.bf16.mxu0 %v1955_v0 }
  0xd2   :  { %v123_v12 = vpop.f32.mrf.mxu0 }
  0xd3   :  { %v124_v13 = vadd.f32 %v2071_v11, %v123_v12 }
  0xd4   :  { %v1611_v14 = vpop.f32.mrf.mxu0 }
  0xd5   :  { %1816 = vtanh.f32 %v124_v13  ;;  %v1476_v18 = vmul.f32 -1.442695, %v124_v13 }
  0xd6   :  { %v126_v15 = vpop.f32.mrf.mxu0 }
  0xd7   :  { %1818 = vpow2.f32 %v1476_v18 }
  0xd8   :  { %v1612_v16 = vpop.f32.mrf.mxu0 }
  0xe2   :  { %v1817_v17 = vpop.eup %1816 }
  0xe3   :  { %138 = vrot.lane.b32.xlu0 %v1817_v17, %s1957_s23 }
  0xe4   :  { %v1819_v19 = vpop.eup %1818 }
  0xe5   :  { %v132_v20 = vadd.f32 1.0, %v1819_v19 }
  0xe7   :  { %1820 = vrcp.f32 %v132_v20 }
  0xf4   :  { %v1821_v21 = vpop.eup %1820 }
  0xf5   :  { %v136_v24 = vmul.f32 0.0, %v1821_v21 }
 0x155   :  { %v139_v22 = vpop.permute.xlu0 %138 }
 0x156   :  { %v141_v23 = vmul.f32 %v1821_v21, %v139_v22 }
 0x158   :  { %143 = vrot.lane.b32.xlu0 %v141_v23, %s1957_s23 }
 0x1ca   :  { %v144_v25 = vpop.permute.xlu0 %143 }
 0x1cb   :  { %v2076_v26 = vadd.f32 %v144_v25, %v136_v24 }
 0x1cd   :  { %1822 = vtanh.f32 %v2076_v26 }
 0x1da   :  { %v1823_v30 = vpop.eup %1822 }
 0x1db   :  { %149 = vrot.lane.b32.xlu1 %v1823_v30, %s1957_s23 }
 0x24d   :  { %v150_v32 = vpop.permute.xlu1 %149 }
 0x24e   :  { %v152_v33 = vmul.f32 %v1821_v21, %v150_v32  ;;  %v426_v32 = vsel %vm425_vm5, %v2036_v5, %v2031_v3 }
 0x250   :  { %v268_v34 = vrot.slane %v152_v33, 7  ;;  %154 = vrot.lane.b32.xlu0 %v152_v33, %s1958_s11 }
 0x252   :  { %269 = vrot.lane.b32.xlu1 %v268_v34, %s1959_s12 }
 0x2c2   :  { %v155_v35 = vpop.permute.xlu0 %154 }
 0x2c3   :  { %v157_v37 = vsel %vm43_vm2, %v155_v35, 0.0 }
 0x2c4   :  { %v158_v38 = vpack.c.bf16 %v157_v37, %v157_v37  ;;  %v270_v39 = vpop.permute.xlu1 %269 }
 0x2c5   :  { %v272_v40 = vsel %vm43_vm2, %v266_v36, %v270_v39 }
 0x2c6   :  { %v273_v41 = vpack.c.bf16 %v272_v40, %v272_v40  ;;  %1622 = vmatmul.mubr.msk.bf16.vlgmr.msra.gmra.mxu1 %vm85_vm3, %v158_v38 }
 0x2c7   :  { %1638 = vmatpush3.bf16.msra.mxu1 %v2082_v27  ;;  %1645 = vmatprep.mubr.msk.bf16.mxu1 %vm1956_vm0, %v1955_v0 }
 0x2c8   :  { %v277_v42 = vshll.u32 %v273_v41, 16  ;;  %1639 = vmatprep.subr.bf16.mxu1 %v1955_v0  ;;  %v275_v43 = vshrl.u32 %v273_v41, 16 }
 0x2ca   :  { %v279_v44 = vrot.slane %v277_v42, 1 }
 0x2cb   :  { %1640 = vmatpush3.bf16.msra.mxu1 %v2088_v28 }
 0x2cc   :  { %v280_v45 = vor.u32 %v279_v44, %v275_v43  ;;  %1641 = vmatprep.subr.bf16.mxu1 %v1955_v0 }
 0x2ce   :  { %1634 = vmatmul.mubr.msk.bf16.vlgmr.msra.gmra.mxu0 %vm85_vm3, %v280_v45 }
 0x2cf   :  { %1650 = vmatpush3.bf16.msra.mxu0 %v2014_v1  ;;  %1642 = vmatpush3.bf16.msra.mxu1 %v2095_v29 }
 0x2d0   :  { %1651 = vmatprep.subr.bf16.mxu0 %v1955_v0  ;;  %1643 = vmatprep.subr.bf16.mxu1 %v1955_v0 }
 0x2d1   :  { %1657 = vmatprep.mubr.msk.bf16.mxu0 %vm1956_vm0, %v1955_v0 }
 0x2d3   :  { %1652 = vmatpush3.bf16.msra.mxu0 %v2025_v2  ;;  %1644 = vmatpush3.bf16.msra.mxu1 %v2104_v31 }
 0x2d4   :  { %1653 = vmatprep.subr.bf16.mxu0 %v1955_v0  ;;  %1661 = vmatprep.subr.bf16.mxu1 %v1955_v0 }
 0x2d7   :  { %1654 = vmatpush3.bf16.msra.mxu0 %v2042_v6 }
 0x2d8   :  { %1655 = vmatprep.subr.bf16.mxu0 %v1955_v0 }
 0x2db   :  { %1656 = vmatpush3.bf16.msra.mxu0 %v2051_v8 }
 0x2dc   :  { %1673 = vmatprep.subr.bf16.mxu0 %v1955_v0 }
 0x386   :  { %v235_v47 = vpop.f32.mrf.mxu1 }
 0x387   :  { %v236_v48 = vadd.f32 %v2139_v46, %v235_v47 }
 0x388   :  { %v1623_v49 = vpop.f32.mrf.mxu1 }
 0x389   :  { %1824 = vtanh.f32 %v236_v48  ;;  %v1483_v59 = vmul.f32 -1.442695, %v236_v48 }
 0x38a   :  { %v238_v50 = vpop.f32.mrf.mxu1 }
 0x38c   :  { %v1624_v51 = vpop.f32.mrf.mxu1 }
 0x38e   :  { %v318_v52 = vpop.f32.mrf.mxu0 }
 0x38f   :  { %v319_v53 = vadd.f32 %v2071_v11, %v318_v52 }
 0x390   :  { %v1635_v54 = vpop.f32.mrf.mxu0 }
 0x391   :  { %1826 = vtanh.f32 %v319_v53  ;;  %v1485_v60 = vmul.f32 -1.442695, %v319_v53 }
 0x392   :  { %v321_v55 = vpop.f32.mrf.mxu0  ;;  %1828 = vpow2.f32 %v1483_v59 }
 0x393   :  { %1830 = vpow2.f32 %v1485_v60 }
 0x394   :  { %v1636_v56 = vpop.f32.mrf.mxu0 }
 0x396   :  { %v1825_v57 = vpop.eup %1824 }
 0x397   :  { %250 = vrot.lane.b32.xlu0 %v1825_v57, %s1957_s23 }
 0x39e   :  { %v1827_v58 = vpop.eup %1826 }
 0x39f   :  { %333 = vrot.lane.b32.xlu1 %v1827_v58, %s1957_s23  ;;  %v1829_v61 = vpop.eup %1828 }
 0x3a0   :  { %v244_v62 = vadd.f32 1.0, %v1829_v61  ;;  %v1831_v63 = vpop.eup %1830 }
 0x3a1   :  { %v327_v4 = vadd.f32 1.0, %v1831_v63 }
 0x3a2   :  { %1832 = vrcp.f32 %v244_v62 }
 0x3a3   :  { %1834 = vrcp.f32 %v327_v4 }
 0x3af   :  { %v1833_v7 = vpop.eup %1832 }
 0x3b0   :  { %v1835_v12 = vpop.eup %1834  ;;  %v248_v15 = vmul.f32 0.0, %v1833_v7 }
 0x3b1   :  { %v331_v18 = vmul.f32 %v1835_v12, %v2076_v26 }
 0x409   :  { %v251_v9 = vpop.permute.xlu0 %250 }
 0x40a   :  { %v253_v10 = vmul.f32 %v1833_v7, %v251_v9 }
 0x40c   :  { %255 = vrot.lane.b32.xlu0 %v253_v10, %s1957_s23 }
 0x411   :  { %v334_v13 = vpop.permute.xlu1 %333 }
 0x412   :  { %v336_v14 = vmul.f32 %v1835_v12, %v334_v13 }
 0x414   :  { %338 = vrot.lane.b32.xlu1 %v336_v14, %s1957_s23 }
 0x47e   :  { %v256_v16 = vpop.permute.xlu0 %255 }
 0x47f   :  { %v2147_v17 = vadd.f32 %v256_v16, %v248_v15 }
 0x481   :  { %1836 = vtanh.f32 %v2147_v17 }
 0x486   :  { %v339_v19 = vpop.permute.xlu1 %338 }
 0x487   :  { %v2151_v20 = vadd.f32 %v339_v19, %v331_v18 }
 0x489   :  { %1838 = vtanh.f32 %v2151_v20 }
 0x48e   :  { %v1837_v21 = vpop.eup %1836 }
 0x48f   :  { %261 = vrot.lane.b32.xlu0 %v1837_v21, %s1957_s23 }
 0x496   :  { %v1839_v22 = vpop.eup %1838 }
 0x497   :  { %344 = vrot.lane.b32.xlu1 %v1839_v22, %s1957_s23 }
 0x501   :  { %v262_v30 = vpop.permute.xlu0 %261 }
 0x502   :  { %v264_v26 = vmul.f32 %v1833_v7, %v262_v30 }
 0x509   :  { %v345_v23 = vpop.permute.xlu1 %344 }
 0x50a   :  { %v347_v24 = vmul.f32 %v1835_v12, %v345_v23  ;;  %v581_v23 = vsel %vm580_vm6, %v2036_v5, %v2031_v3 }
 0x50c   :  { %v428_v25 = vrot.slane %v347_v24, 6  ;;  %349 = vrot.lane.b32.xlu0 %v347_v24, %s1958_s11 }
 0x50e   :  { %429 = vrot.lane.b32.xlu1 %v428_v25, %s1959_s12 }
 0x512   :  { %353 = vrot.lane.b32.xlu1 %v264_v26, %s1959_s12 }
 0x57e   :  { %v350_v36 = vpop.permute.xlu0 %349 }
 0x580   :  { %v430_v33 = vpop.permute.xlu1 %429 }
 0x581   :  { %v432_v34 = vsel %vm43_vm2, %v426_v32, %v430_v33 }
 0x582   :  { %v433_v35 = vpack.c.bf16 %v432_v34, %v432_v34 }
 0x584   :  { %v435_v37 = vrot.slane %v433_v35, 1  ;;  %v354_v38 = vpop.permute.xlu1 %353 }
 0x585   :  { %v356_v39 = vsel %vm43_vm2, %v350_v36, %v354_v38 }
 0x586   :  { %v357_v40 = vpack.c.bf16 %v356_v39, %v356_v39  ;;  %1658 = vmatmul.mubr.msk.bf16.vlgmr.msra.gmra.mxu0 %vm85_vm3, %v435_v37 }
 0x587   :  { %1674 = vmatpush3.bf16.msra.mxu0 %v2014_v1  ;;  %1681 = vmatprep.mubr.msk.bf16.mxu0 %vm1956_vm0, %v1955_v0 }
 0x588   :  { %1646 = vmatmul.mubr.msk.bf16.vlgmr.msra.gmra.mxu1 %vm85_vm3, %v357_v40  ;;  %1675 = vmatprep.subr.bf16.mxu0 %v1955_v0 }
 0x589   :  { %1662 = vmatpush3.bf16.msra.mxu1 %v2082_v27  ;;  %1669 = vmatprep.mubr.msk.bf16.mxu1 %vm1956_vm0, %v1955_v0 }
 0x58a   :  { %1663 = vmatprep.subr.bf16.mxu1 %v1955_v0 }
 0x58b   :  { %1676 = vmatpush3.bf16.msra.mxu0 %v2025_v2 }
 0x58c   :  { %1677 = vmatprep.subr.bf16.mxu0 %v1955_v0 }
 0x58d   :  { %1664 = vmatpush3.bf16.msra.mxu1 %v2088_v28 }
 0x58e   :  { %1665 = vmatprep.subr.bf16.mxu1 %v1955_v0 }
 0x58f   :  { %1678 = vmatpush3.bf16.msra.mxu0 %v2042_v6 }
 0x590   :  { %1679 = vmatprep.subr.bf16.mxu0 %v1955_v0 }
 0x591   :  { %1666 = vmatpush3.bf16.msra.mxu1 %v2095_v29 }
 0x592   :  { %1667 = vmatprep.subr.bf16.mxu1 %v1955_v0 }
 0x593   :  { %1680 = vmatpush3.bf16.msra.mxu0 %v2051_v8 }
 0x594   :  { %1697 = vmatprep.subr.bf16.mxu0 %v1955_v0 }
 0x595   :  { %1668 = vmatpush3.bf16.msra.mxu1 %v2104_v31 }
 0x596   :  { %1685 = vmatprep.subr.bf16.mxu1 %v1955_v0 }
 0x646   :  { %v473_v41 = vpop.f32.mrf.mxu0 }
 0x647   :  { %v474_v42 = vadd.f32 %v2071_v11, %v473_v41 }
 0x648   :  { %v395_v43 = vpop.f32.mrf.mxu1  ;;  %v1659_v44 = vpop.f32.mrf.mxu0 }
 0x649   :  { %1840 = vtanh.f32 %v474_v42  ;;  %v396_v45 = vadd.f32 %v2139_v46, %v395_v43  ;;  %v1489_v54 = vmul.f32 -1.442695, %v474_v42 }
 0x64a   :  { %v1647_v47 = vpop.f32.mrf.mxu1  ;;  %v476_v48 = vpop.f32.mrf.mxu0 }
 0x64b   :  { %1842 = vtanh.f32 %v396_v45  ;;  %v1487_v55 = vmul.f32 -1.442695, %v396_v45 }
 0x64c   :  { %v398_v49 = vpop.f32.mrf.mxu1  ;;  %v1660_v50 = vpop.f32.mrf.mxu0  ;;  %1844 = vpow2.f32 %v1489_v54 }
 0x64d   :  { %1846 = vpow2.f32 %v1487_v55 }
 0x64e   :  { %v1648_v51 = vpop.f32.mrf.mxu1 }
 0x656   :  { %v1841_v52 = vpop.eup %1840 }
 0x657   :  { %488 = vrot.lane.b32.xlu0 %v1841_v52, %s1957_s23 }
 0x658   :  { %v1843_v53 = vpop.eup %1842 }
 0x659   :  { %410 = vrot.lane.b32.xlu1 %v1843_v53, %s1957_s23  ;;  %v1845_v56 = vpop.eup %1844 }
 0x65a   :  { %v1847_v57 = vpop.eup %1846  ;;  %v482_v58 = vadd.f32 1.0, %v1845_v56 }
 0x65b   :  { %v404_v59 = vadd.f32 1.0, %v1847_v57 }
 0x65c   :  { %1848 = vrcp.f32 %v482_v58 }
 0x65d   :  { %1850 = vrcp.f32 %v404_v59 }
 0x669   :  { %v1849_v60 = vpop.eup %1848 }
 0x66a   :  { %v1851_v63 = vpop.eup %1850  ;;  %v486_v9 = vmul.f32 %v1849_v60, %v2151_v20 }
 0x66b   :  { %v408_v13 = vmul.f32 %v1851_v63, %v2147_v17 }
 0x6c9   :  { %v489_v61 = vpop.permute.xlu0 %488 }
 0x6ca   :  { %v491_v62 = vmul.f32 %v1849_v60, %v489_v61 }
 0x6cb   :  { %v411_v4 = vpop.permute.xlu1 %410 }
 0x6cc   :  { %493 = vrot.lane.b32.xlu0 %v491_v62, %s1957_s23  ;;  %v413_v7 = vmul.f32 %v1851_v63, %v411_v4 }
 0x6ce   :  { %415 = vrot.lane.b32.xlu1 %v413_v7, %s1957_s23 }
 0x73e   :  { %v494_v10 = vpop.permute.xlu0 %493 }
 0x73f   :  { %v2192_v12 = vadd.f32 %v494_v10, %v486_v9 }
 0x740   :  { %v416_v14 = vpop.permute.xlu1 %415 }
 0x741   :  { %1852 = vtanh.f32 %v2192_v12  ;;  %v2196_v15 = vadd.f32 %v416_v14, %v408_v13 }
 0x743   :  { %1854 = vtanh.f32 %v2196_v15 }
 0x74e   :  { %v1853_v16 = vpop.eup %1852 }
 0x74f   :  { %499 = vrot.lane.b32.xlu0 %v1853_v16, %s1957_s23 }
 0x750   :  { %v1855_v18 = vpop.eup %1854 }
 0x751   :  { %421 = vrot.lane.b32.xlu1 %v1855_v18, %s1957_s23 }
 0x7c1   :  { %v500_v19 = vpop.permute.xlu0 %499 }
 0x7c2   :  { %v502_v20 = vmul.f32 %v1849_v60, %v500_v19 }
 0x7c3   :  { %v422_v22 = vpop.permute.xlu1 %421 }
 0x7c4   :  { %v583_v21 = vrot.slane %v502_v20, 5  ;;  %504 = vrot.lane.b32.xlu1 %v502_v20, %s1958_s11  ;;  %v424_v17 = vmul.f32 %v1851_v63, %v422_v22 }
 0x7c6   :  { %584 = vrot.lane.b32.xlu0 %v583_v21, %s1959_s12 }
 0x7ca   :  { %508 = vrot.lane.b32.xlu0 %v424_v17, %s1959_s12  ;;  %v742_v17 = vsel %vm741_vm7, %v2036_v5, %v2031_v3 }
 0x836   :  { %v505_v26 = vpop.permute.xlu1 %504 }
 0x838   :  { %v585_v24 = vpop.permute.xlu0 %584 }
 0x839   :  { %v587_v25 = vsel %vm43_vm2, %v581_v23, %v585_v24 }
 0x83a   :  { %v588_v30 = vpack.c.bf16 %v587_v25, %v587_v25 }
 0x83c   :  { %v590_v32 = vshrl.u32 %v588_v30, 16  ;;  %v593_v33 = vshll.u32 %v588_v30, 16  ;;  %v509_v34 = vpop.permute.xlu0 %508 }
 0x83d   :  { %v511_v35 = vsel %vm43_vm2, %v505_v26, %v509_v34 }
 0x83e   :  { %v592_v36 = vrot.slane %v590_v32, 1  ;;  %v595_v37 = vrot.slane %v593_v33, 2  ;;  %v512_v38 = vpack.c.bf16 %v511_v35, %v511_v35 }
 0x840   :  { %v596_v39 = vor.u32 %v595_v37, %v592_v36  ;;  %1670 = vmatmul.mubr.msk.bf16.vlgmr.msra.gmra.mxu1 %vm85_vm3, %v512_v38 }
 0x841   :  { %1686 = vmatpush3.bf16.msra.mxu1 %v2082_v27  ;;  %1693 = vmatprep.mubr.msk.bf16.mxu1 %vm1956_vm0, %v1955_v0 }
 0x842   :  { %1682 = vmatmul.mubr.msk.bf16.vlgmr.msra.gmra.mxu0 %vm85_vm3, %v596_v39  ;;  %1687 = vmatprep.subr.bf16.mxu1 %v1955_v0 }
 0x843   :  { %1698 = vmatpush3.bf16.msra.mxu0 %v2014_v1  ;;  %1705 = vmatprep.mubr.msk.bf16.mxu0 %vm1956_vm0, %v1955_v0 }
 0x844   :  { %1699 = vmatprep.subr.bf16.mxu0 %v1955_v0 }
 0x845   :  { %1688 = vmatpush3.bf16.msra.mxu1 %v2088_v28 }
 0x846   :  { %1689 = vmatprep.subr.bf16.mxu1 %v1955_v0 }
 0x847   :  { %1700 = vmatpush3.bf16.msra.mxu0 %v2025_v2 }
 0x848   :  { %1701 = vmatprep.subr.bf16.mxu0 %v1955_v0 }
 0x849   :  { %1690 = vmatpush3.bf16.msra.mxu1 %v2095_v29 }
 0x84a   :  { %1691 = vmatprep.subr.bf16.mxu1 %v1955_v0 }
 0x84b   :  { %1702 = vmatpush3.bf16.msra.mxu0 %v2042_v6 }
 0x84c   :  { %1703 = vmatprep.subr.bf16.mxu0 %v1955_v0 }
 0x84d   :  { %1692 = vmatpush3.bf16.msra.mxu1 %v2104_v31 }
 0x84e   :  { %1709 = vmatprep.subr.bf16.mxu1 %v1955_v0 }
 0x84f   :  { %1704 = vmatpush3.bf16.msra.mxu0 %v2051_v8 }
 0x850   :  { %1721 = vmatprep.subr.bf16.mxu0 %v1955_v0 }
 0x900   :  { %v550_v40 = vpop.f32.mrf.mxu1 }
 0x901   :  { %v551_v41 = vadd.f32 %v2139_v46, %v550_v40 }
 0x902   :  { %v1671_v42 = vpop.f32.mrf.mxu1  ;;  %v634_v43 = vpop.f32.mrf.mxu0 }
 0x903   :  { %1856 = vtanh.f32 %v551_v41  ;;  %v635_v44 = vadd.f32 %v2071_v11, %v634_v43  ;;  %v1491_v53 = vmul.f32 -1.442695, %v551_v41 }
 0x904   :  { %v553_v45 = vpop.f32.mrf.mxu1  ;;  %v1683_v47 = vpop.f32.mrf.mxu0 }
 0x905   :  { %1858 = vtanh.f32 %v635_v44  ;;  %v1493_v54 = vmul.f32 -1.442695, %v635_v44 }
 0x906   :  { %v1672_v48 = vpop.f32.mrf.mxu1  ;;  %v637_v49 = vpop.f32.mrf.mxu0  ;;  %1860 = vpow2.f32 %v1491_v53 }
 0x907   :  { %1862 = vpow2.f32 %v1493_v54 }
 0x908   :  { %v1684_v50 = vpop.f32.mrf.mxu0 }
 0x910   :  { %v1857_v51 = vpop.eup %1856 }
 0x911   :  { %565 = vrot.lane.b32.xlu0 %v1857_v51, %s1957_s23 }
 0x912   :  { %v1859_v52 = vpop.eup %1858 }
 0x913   :  { %649 = vrot.lane.b32.xlu1 %v1859_v52, %s1957_s23  ;;  %v1861_v55 = vpop.eup %1860 }
 0x914   :  { %v1863_v56 = vpop.eup %1862  ;;  %v559_v57 = vadd.f32 1.0, %v1861_v55 }
 0x915   :  { %v643_v58 = vadd.f32 1.0, %v1863_v56 }
 0x916   :  { %1864 = vrcp.f32 %v559_v57 }
 0x917   :  { %1866 = vrcp.f32 %v643_v58 }
 0x923   :  { %v1865_v59 = vpop.eup %1864 }
 0x924   :  { %v1867_v62 = vpop.eup %1866  ;;  %v563_v7 = vmul.f32 %v1865_v59, %v2196_v15 }
 0x925   :  { %v647_v13 = vmul.f32 %v1867_v62, %v2192_v12 }
 0x983   :  { %v566_v60 = vpop.permute.xlu0 %565 }
 0x984   :  { %v568_v61 = vmul.f32 %v1865_v59, %v566_v60 }
 0x985   :  { %v650_v63 = vpop.permute.xlu1 %649 }
 0x986   :  { %570 = vrot.lane.b32.xlu0 %v568_v61, %s1957_s23  ;;  %v652_v4 = vmul.f32 %v1867_v62, %v650_v63 }
 0x988   :  { %654 = vrot.lane.b32.xlu1 %v652_v4, %s1957_s23 }
 0x9f8   :  { %v571_v9 = vpop.permute.xlu0 %570 }
 0x9f9   :  { %v2237_v10 = vadd.f32 %v571_v9, %v563_v7 }
 0x9fa   :  { %v655_v14 = vpop.permute.xlu1 %654 }
 0x9fb   :  { %1868 = vtanh.f32 %v2237_v10  ;;  %v2241_v16 = vadd.f32 %v655_v14, %v647_v13 }
 0x9fd   :  { %1870 = vtanh.f32 %v2241_v16 }
 0xa08   :  { %v1869_v18 = vpop.eup %1868 }
 0xa09   :  { %576 = vrot.lane.b32.xlu0 %v1869_v18, %s1957_s23 }
 0xa0a   :  { %v1871_v19 = vpop.eup %1870 }
 0xa0b   :  { %660 = vrot.lane.b32.xlu1 %v1871_v19, %s1957_s23 }
 0xa7b   :  { %v577_v22 = vpop.permute.xlu0 %576 }
 0xa7c   :  { %v579_v12 = vmul.f32 %v1865_v59, %v577_v22 }
 0xa7d   :  { %v661_v20 = vpop.permute.xlu1 %660 }
 0xa7e   :  { %v663_v15 = vmul.f32 %v1867_v62, %v661_v20  ;;  %v897_v20 = vsel %vm896_vm8, %v2036_v5, %v2031_v3 }
 0xa80   :  { %v744_v21 = vrot.slane %v663_v15, 4  ;;  %665 = vrot.lane.b32.xlu0 %v663_v15, %s1958_s11 }
 0xa82   :  { %745 = vrot.lane.b32.xlu1 %v744_v21, %s1959_s12 }
 0xa86   :  { %669 = vrot.lane.b32.xlu1 %v579_v12, %s1959_s12 }
 0xaf2   :  { %v666_v30 = vpop.permute.xlu0 %665 }
 0xaf4   :  { %v746_v23 = vpop.permute.xlu1 %745 }
 0xaf5   :  { %v748_v24 = vsel %vm43_vm2, %v742_v17, %v746_v23 }
 0xaf6   :  { %v749_v25 = vpack.c.bf16 %v748_v24, %v748_v24 }
 0xaf8   :  { %v751_v26 = vrot.slane %v749_v25, 2  ;;  %v670_v32 = vpop.permute.xlu1 %669 }
 0xaf9   :  { %v672_v33 = vsel %vm43_vm2, %v666_v30, %v670_v32 }
 0xafa   :  { %v673_v34 = vpack.c.bf16 %v672_v33, %v672_v33  ;;  %1706 = vmatmul.mubr.msk.bf16.vlgmr.msra.gmra.mxu0 %vm85_vm3, %v751_v26 }
 0xafb   :  { %1722 = vmatpush3.bf16.msra.mxu0 %v2014_v1  ;;  %1729 = vmatprep.mubr.msk.bf16.mxu0 %vm1956_vm0, %v1955_v0 }
 0xafc   :  { %1694 = vmatmul.mubr.msk.bf16.vlgmr.msra.gmra.mxu1 %vm85_vm3, %v673_v34  ;;  %1723 = vmatprep.subr.bf16.mxu0 %v1955_v0 }
 0xafd   :  { %1710 = vmatpush3.bf16.msra.mxu1 %v2082_v27  ;;  %1717 = vmatprep.mubr.msk.bf16.mxu1 %vm1956_vm0, %v1955_v0 }
 0xafe   :  { %1711 = vmatprep.subr.bf16.mxu1 %v1955_v0 }
 0xaff   :  { %1724 = vmatpush3.bf16.msra.mxu0 %v2025_v2 }
 0xb00   :  { %1725 = vmatprep.subr.bf16.mxu0 %v1955_v0 }
 0xb01   :  { %1712 = vmatpush3.bf16.msra.mxu1 %v2088_v28 }
 0xb02   :  { %1713 = vmatprep.subr.bf16.mxu1 %v1955_v0 }
 0xb03   :  { %1726 = vmatpush3.bf16.msra.mxu0 %v2042_v6 }
 0xb04   :  { %1727 = vmatprep.subr.bf16.mxu0 %v1955_v0 }
 0xb05   :  { %1714 = vmatpush3.bf16.msra.mxu1 %v2095_v29 }
 0xb06   :  { %1715 = vmatprep.subr.bf16.mxu1 %v1955_v0 }
 0xb07   :  { %1728 = vmatpush3.bf16.msra.mxu0 %v2051_v8 }
 0xb08   :  { %1745 = vmatprep.subr.bf16.mxu0 %v1955_v0 }
 0xb09   :  { %1716 = vmatpush3.bf16.msra.mxu1 %v2104_v31 }
 0xb0a   :  { %1733 = vmatprep.subr.bf16.mxu1 %v1955_v0 }
 0xbba   :  { %v789_v35 = vpop.f32.mrf.mxu0 }
 0xbbb   :  { %v790_v36 = vadd.f32 %v2071_v11, %v789_v35 }
 0xbbc   :  { %v711_v37 = vpop.f32.mrf.mxu1  ;;  %v1707_v38 = vpop.f32.mrf.mxu0 }
 0xbbd   :  { %1872 = vtanh.f32 %v790_v36  ;;  %v712_v39 = vadd.f32 %v2139_v46, %v711_v37  ;;  %v1497_v48 = vmul.f32 -1.442695, %v790_v36 }
 0xbbe   :  { %v1695_v40 = vpop.f32.mrf.mxu1  ;;  %v792_v41 = vpop.f32.mrf.mxu0 }
 0xbbf   :  { %1874 = vtanh.f32 %v712_v39  ;;  %v1495_v49 = vmul.f32 -1.442695, %v712_v39 }
 0xbc0   :  { %v714_v42 = vpop.f32.mrf.mxu1  ;;  %v1708_v43 = vpop.f32.mrf.mxu0  ;;  %1876 = vpow2.f32 %v1497_v48 }
 0xbc1   :  { %1878 = vpow2.f32 %v1495_v49 }
 0xbc2   :  { %v1696_v44 = vpop.f32.mrf.mxu1 }
 0xbca   :  { %v1873_v45 = vpop.eup %1872 }
 0xbcb   :  { %804 = vrot.lane.b32.xlu0 %v1873_v45, %s1957_s23 }
 0xbcc   :  { %v1875_v47 = vpop.eup %1874 }
 0xbcd   :  { %726 = vrot.lane.b32.xlu1 %v1875_v47, %s1957_s23  ;;  %v1877_v50 = vpop.eup %1876 }
 0xbce   :  { %v1879_v51 = vpop.eup %1878  ;;  %v798_v52 = vadd.f32 1.0, %v1877_v50 }
 0xbcf   :  { %v720_v53 = vadd.f32 1.0, %v1879_v51 }
 0xbd0   :  { %1880 = vrcp.f32 %v798_v52 }
 0xbd1   :  { %1882 = vrcp.f32 %v720_v53 }
 0xbdd   :  { %v1881_v54 = vpop.eup %1880 }
 0xbde   :  { %v1883_v57 = vpop.eup %1882  ;;  %v802_v60 = vmul.f32 %v1881_v54, %v2241_v16 }
 0xbdf   :  { %v724_v63 = vmul.f32 %v1883_v57, %v2237_v10 }
 0xc3d   :  { %v805_v55 = vpop.permute.xlu0 %804 }
 0xc3e   :  { %v807_v56 = vmul.f32 %v1881_v54, %v805_v55 }
 0xc3f   :  { %v727_v58 = vpop.permute.xlu1 %726 }
 0xc40   :  { %809 = vrot.lane.b32.xlu0 %v807_v56, %s1957_s23  ;;  %v729_v59 = vmul.f32 %v1883_v57, %v727_v58 }
 0xc42   :  { %731 = vrot.lane.b32.xlu1 %v729_v59, %s1957_s23 }
 0xcb2   :  { %v810_v61 = vpop.permute.xlu0 %809 }
 0xcb3   :  { %v2282_v62 = vadd.f32 %v810_v61, %v802_v60 }
 0xcb4   :  { %v732_v4 = vpop.permute.xlu1 %731 }
 0xcb5   :  { %1884 = vtanh.f32 %v2282_v62  ;;  %v2286_v7 = vadd.f32 %v732_v4, %v724_v63 }
 0xcb7   :  { %1886 = vtanh.f32 %v2286_v7 }
 0xcc2   :  { %v1885_v9 = vpop.eup %1884 }
 0xcc3   :  { %815 = vrot.lane.b32.xlu0 %v1885_v9, %s1957_s23  ;;  %v2342_v9 = vld [vmem:[%s2470_s0] sm:$0xff] }
 0xcc4   :  { %v1887_v13 = vpop.eup %1886 }
 0xcc5   :  { %737 = vrot.lane.b32.xlu1 %v1887_v13, %s1957_s23  ;;  %v1058_v13 = vsel %vm1057_vm9, %v2036_v5, %v2342_v9 }
 0xd35   :  { %v816_v14 = vpop.permute.xlu0 %815 }
 0xd36   :  { %v818_v16 = vmul.f32 %v1881_v54, %v816_v14 }
 0xd37   :  { %v738_v19 = vpop.permute.xlu1 %737 }
 0xd38   :  { %v899_v18 = vrot.slane %v818_v16, 3  ;;  %820 = vrot.lane.b32.xlu1 %v818_v16, %s1958_s11  ;;  %v740_v10 = vmul.f32 %v1883_v57, %v738_v19 }
 0xd3a   :  { %900 = vrot.lane.b32.xlu0 %v899_v18, %s1959_s12 }
 0xd3e   :  { %824 = vrot.lane.b32.xlu0 %v740_v10, %s1959_s12 }
 0xdaa   :  { %v821_v12 = vpop.permute.xlu1 %820 }
 0xdac   :  { %v901_v15 = vpop.permute.xlu0 %900 }
 0xdad   :  { %v903_v21 = vsel %vm43_vm2, %v897_v20, %v901_v15 }
 0xdae   :  { %v904_v22 = vpack.c.bf16 %v903_v21, %v903_v21 }
 0xdb0   :  { %v906_v17 = vshrl.u32 %v904_v22, 16  ;;  %v909_v23 = vshll.u32 %v904_v22, 16  ;;  %v825_v24 = vpop.permute.xlu0 %824  ;;  %v1945_v22 = vld [vmem:[%s2469_s1 + $0x18] sm:$0xff]  }
 0xdb1   :  { %v827_v25 = vsel %vm43_vm2, %v821_v12, %v825_v24  ;;  %v1946_v12 = vld [vmem:[%s2469_s1 + $0x10] sm:$0xff]  }
 0xdb2   :  { %v908_v30 = vrot.slane %v906_v17, 2  ;;  %v911_v26 = vrot.slane %v909_v23, 3  ;;  %v828_v32 = vpack.c.bf16 %v827_v25, %v827_v25  ;;  %v1948_v17 = vld [vmem:[%s2469_s1] sm:$0xff]  }
 0xdb3   :  { %v2381_v23 = vld [vmem:[%s2471_s2] ss:$0 sm:$0xff] }
 0xdb4   :  { %v912_v33 = vor.u32 %v911_v26, %v908_v30  ;;  %1718 = vmatmul.mubr.msk.bf16.vlgmr.msra.gmra.mxu1 %vm85_vm3, %v828_v32 }
 0xdb5   :  { %1734 = vmatpush3.bf16.msra.mxu1 %v2082_v27  ;;  %1741 = vmatprep.mubr.msk.bf16.mxu1 %vm1956_vm0, %v1955_v0 }
 0xdb6   :  { %1730 = vmatmul.mubr.msk.bf16.vlgmr.msra.gmra.mxu0 %vm85_vm3, %v912_v33  ;;  %1735 = vmatprep.subr.bf16.mxu1 %v1955_v0 }
 0xdb7   :  { %1746 = vmatpush3.bf16.msra.mxu0 %v2014_v1  ;;  %1753 = vmatprep.mubr.msk.bf16.mxu0 %vm1956_vm0, %v1955_v0 }
 0xdb8   :  { %1747 = vmatprep.subr.bf16.mxu0 %v1955_v0 }
 0xdb9   :  { %1736 = vmatpush3.bf16.msra.mxu1 %v2088_v28 }
 0xdba   :  { %1737 = vmatprep.subr.bf16.mxu1 %v1955_v0 }
 0xdbb   :  { %1748 = vmatpush3.bf16.msra.mxu0 %v2025_v2 }
 0xdbc   :  { %1749 = vmatprep.subr.bf16.mxu0 %v1955_v0 }
 0xdbd   :  { %1738 = vmatpush3.bf16.msra.mxu1 %v2095_v29 }
 0xdbe   :  { %1739 = vmatprep.subr.bf16.mxu1 %v1955_v0 }
 0xdbf   :  { %1750 = vmatpush3.bf16.msra.mxu0 %v2042_v6 }
 0xdc0   :  { %1751 = vmatprep.subr.bf16.mxu0 %v1955_v0 }
 0xdc1   :  { %1740 = vmatpush3.bf16.msra.mxu1 %v2104_v31 }
 0xdc2   :  { %1757 = vmatprep.subr.bf16.mxu1 %v1955_v0 }
 0xdc3   :  { %1752 = vmatpush3.bf16.msra.mxu0 %v2051_v8 }
 0xdc4   :  { %1769 = vmatprep.subr.bf16.mxu0 %v1955_v0 }
 0xe74   :  { %v866_v1 = vpop.f32.mrf.mxu1 }
 0xe75   :  { %v867_v2 = vadd.f32 %v2139_v46, %v866_v1 }
 0xe76   :  { %v1719_v3 = vpop.f32.mrf.mxu1  ;;  %v950_v34 = vpop.f32.mrf.mxu0 }
 0xe77   :  { %1888 = vtanh.f32 %v867_v2  ;;  %v951_v35 = vadd.f32 %v2071_v11, %v950_v34  ;;  %v1499_v41 = vmul.f32 -1.442695, %v867_v2 }
 0xe78   :  { %v869_v36 = vpop.f32.mrf.mxu1  ;;  %v1731_v6 = vpop.f32.mrf.mxu0 }
 0xe79   :  { %1890 = vtanh.f32 %v951_v35  ;;  %v1501_v42 = vmul.f32 -1.442695, %v951_v35 }
 0xe7a   :  { %v1720_v37 = vpop.f32.mrf.mxu1  ;;  %v953_v38 = vpop.f32.mrf.mxu0  ;;  %1892 = vpow2.f32 %v1499_v41 }
 0xe7b   :  { %1894 = vpow2.f32 %v1501_v42 }
 0xe7c   :  { %v1732_v39 = vpop.f32.mrf.mxu0 }
 0xe84   :  { %v1889_v40 = vpop.eup %1888 }
 0xe85   :  { %881 = vrot.lane.b32.xlu0 %v1889_v40, %s1957_s23 }
 0xe86   :  { %v1891_v8 = vpop.eup %1890 }
 0xe87   :  { %965 = vrot.lane.b32.xlu1 %v1891_v8, %s1957_s23  ;;  %v1893_v43 = vpop.eup %1892 }
 0xe88   :  { %v1895_v44 = vpop.eup %1894  ;;  %v875_v45 = vadd.f32 1.0, %v1893_v43 }
 0xe89   :  { %v959_v11 = vadd.f32 1.0, %v1895_v44 }
 0xe8a   :  { %1896 = vrcp.f32 %v875_v45 }
 0xe8b   :  { %1898 = vrcp.f32 %v959_v11 }
 0xe97   :  { %v1897_v47 = vpop.eup %1896 }
 0xe98   :  { %v1899_v50 = vpop.eup %1898  ;;  %v879_v53 = vmul.f32 %v1897_v47, %v2286_v7 }
 0xe99   :  { %v963_v56 = vmul.f32 %v1899_v50, %v2282_v62 }
 0xef7   :  { %v882_v48 = vpop.permute.xlu0 %881 }
 0xef8   :  { %v884_v49 = vmul.f32 %v1897_v47, %v882_v48 }
 0xef9   :  { %v966_v51 = vpop.permute.xlu1 %965 }
 0xefa   :  { %886 = vrot.lane.b32.xlu0 %v884_v49, %s1957_s23  ;;  %v968_v52 = vmul.f32 %v1899_v50, %v966_v51 }
 0xefc   :  { %970 = vrot.lane.b32.xlu1 %v968_v52, %s1957_s23 }
 0xf6c   :  { %v887_v54 = vpop.permute.xlu0 %886 }
 0xf6d   :  { %v2327_v55 = vadd.f32 %v887_v54, %v879_v53 }
 0xf6e   :  { %v971_v57 = vpop.permute.xlu1 %970 }
 0xf6f   :  { %1900 = vtanh.f32 %v2327_v55  ;;  %v2331_v58 = vadd.f32 %v971_v57, %v963_v56 }
 0xf71   :  { %1902 = vtanh.f32 %v2331_v58 }
 0xf7c   :  { %v1901_v59 = vpop.eup %1900 }
 0xf7d   :  { %892 = vrot.lane.b32.xlu0 %v1901_v59, %s1957_s23 }
 0xf7e   :  { %v1903_v60 = vpop.eup %1902 }
 0xf7f   :  { %976 = vrot.lane.b32.xlu1 %v1903_v60, %s1957_s23 }
 0xfef   :  { %v893_v7 = vpop.permute.xlu0 %892 }
 0xff0   :  { %v895_v62 = vmul.f32 %v1897_v47, %v893_v7 }
 0xff1   :  { %v977_v61 = vpop.permute.xlu1 %976 }
 0xff2   :  { %v979_v63 = vmul.f32 %v1899_v50, %v977_v61 }
 0xff4   :  { %v1060_v4 = vrot.slane %v979_v63, 2  ;;  %981 = vrot.lane.b32.xlu0 %v979_v63, %s1958_s11 }
 0xff6   :  { %1061 = vrot.lane.b32.xlu1 %v1060_v4, %s1959_s12 }
 0xffa   :  { %985 = vrot.lane.b32.xlu1 %v895_v62, %s1959_s12 }
0x1066   :  { %v982_v19 = vpop.permute.xlu0 %981 }
0x1068   :  { %v1062_v14 = vpop.permute.xlu1 %1061 }
0x1069   :  { %v1064_v16 = vsel %vm43_vm2, %v1058_v13, %v1062_v14 }
0x106a   :  { %v1065_v18 = vpack.c.bf16 %v1064_v16, %v1064_v16 }
0x106c   :  { %v1067_v10 = vrot.slane %v1065_v18, 3  ;;  %v986_v20 = vpop.permute.xlu1 %985 }
0x106d   :  { %v988_v15 = vsel %vm43_vm2, %v982_v19, %v986_v20  ;;  %v1952_v19 = vld [vmem:[%s2472_s3 + $0x8] sm:$0xff]  }
0x106e   :  { %v989_v21 = vpack.c.bf16 %v988_v15, %v988_v15  ;;  %1754 = vmatmul.mubr.msk.bf16.vlgmr.msra.gmra.mxu0 %vm85_vm3, %v1067_v10  ;;  %v1953_v10 = vld [vmem:[%s2472_s3] sm:$0xff]  }
0x106f   :  { %1770 = vmatpush3.bf16.msra.mxu0 %v1945_v22  ;;  %1777 = vmatprep.mubr.msk.bf16.mxu0 %vm1956_vm0, %v1955_v0 }
0x1070   :  { %1742 = vmatmul.mubr.msk.bf16.vlgmr.msra.gmra.mxu1 %vm85_vm3, %v989_v21  ;;  %1771 = vmatprep.subr.bf16.mxu0 %v1955_v0 }
0x1071   :  { %1758 = vmatpush3.bf16.msra.mxu1 %v2082_v27  ;;  %1765 = vmatprep.mubr.msk.bf16.mxu1 %vm1956_vm0, %v1955_v0  ;;  %v1947_v27 = vld [vmem:[%s2469_s1 + $0x8] sm:$0xff]  }
0x1072   :  { %1759 = vmatprep.subr.bf16.mxu1 %v1955_v0 }
0x1073   :  { %1772 = vmatpush3.bf16.msra.mxu0 %v1946_v12 }
0x1074   :  { %1773 = vmatprep.subr.bf16.mxu0 %v1955_v0 }
0x1075   :  { %1760 = vmatpush3.bf16.msra.mxu1 %v2088_v28 }
0x1076   :  { %1761 = vmatprep.subr.bf16.mxu1 %v1955_v0 }
0x1077   :  { %1774 = vmatpush3.bf16.msra.mxu0 %v1947_v27 }
0x1078   :  { %1775 = vmatprep.subr.bf16.mxu0 %v1955_v0 }
0x1079   :  { %1762 = vmatpush3.bf16.msra.mxu1 %v2095_v29 }
0x107a   :  { %1763 = vmatprep.subr.bf16.mxu1 %v1955_v0 }
0x107b   :  { %1776 = vmatpush3.bf16.msra.mxu0 %v1948_v17 }
0x107c   :  { %1793 = vmatprep.subr.bf16.mxu0 %v1955_v0 }
0x107d   :  { %1764 = vmatpush3.bf16.msra.mxu1 %v2104_v31 }
0x107e   :  { %1781 = vmatprep.subr.bf16.mxu1 %v1955_v0 }
0x112e   :  { %v1105_v28 = vpop.f32.mrf.mxu0 }
0x112f   :  { %v1106_v29 = vadd.f32 %v2381_v23, %v1105_v28 }
0x1130   :  { %v1027_v24 = vpop.f32.mrf.mxu1  ;;  %v1755_v25 = vpop.f32.mrf.mxu0 }
0x1131   :  { %1904 = vtanh.f32 %v1106_v29  ;;  %v1028_v30 = vadd.f32 %v2139_v46, %v1027_v24  ;;  %v1505_v34 = vmul.f32 -1.442695, %v1106_v29 }
0x1132   :  { %v1743_v26 = vpop.f32.mrf.mxu1  ;;  %v1108_v32 = vpop.f32.mrf.mxu0 }
0x1133   :  { %1906 = vtanh.f32 %v1028_v30  ;;  %v1503_v35 = vmul.f32 -1.442695, %v1028_v30 }
0x1134   :  { %v1030_v33 = vpop.f32.mrf.mxu1  ;;  %v1756_v31 = vpop.f32.mrf.mxu0  ;;  %1908 = vpow2.f32 %v1505_v34 }
0x1135   :  { %1910 = vpow2.f32 %v1503_v35 }
0x1136   :  { %v1744_v1 = vpop.f32.mrf.mxu1 }
0x113e   :  { %v1905_v2 = vpop.eup %1904 }
0x113f   :  { %1120 = vrot.lane.b32.xlu0 %v1905_v2, %s1957_s23 }
0x1140   :  { %v1907_v3 = vpop.eup %1906 }
0x1141   :  { %1042 = vrot.lane.b32.xlu1 %v1907_v3, %s1957_s23  ;;  %v1909_v36 = vpop.eup %1908 }
0x1142   :  { %v1911_v6 = vpop.eup %1910  ;;  %v1114_v37 = vadd.f32 1.0, %v1909_v36 }
0x1143   :  { %v1036_v38 = vadd.f32 1.0, %v1911_v6 }
0x1144   :  { %1912 = vrcp.f32 %v1114_v37 }
0x1145   :  { %1914 = vrcp.f32 %v1036_v38 }
0x1151   :  { %v1913_v39 = vpop.eup %1912 }
0x1152   :  { %v1915_v41 = vpop.eup %1914  ;;  %v1118_v44 = vmul.f32 %v1913_v39, %v2331_v58 }
0x1153   :  { %v1040_v47 = vmul.f32 %v1915_v41, %v2327_v55 }
0x11b1   :  { %v1121_v40 = vpop.permute.xlu0 %1120 }
0x11b2   :  { %v1123_v8 = vmul.f32 %v1913_v39, %v1121_v40 }
0x11b3   :  { %v1043_v42 = vpop.permute.xlu1 %1042 }
0x11b4   :  { %1125 = vrot.lane.b32.xlu0 %v1123_v8, %s1957_s23  ;;  %v1045_v43 = vmul.f32 %v1915_v41, %v1043_v42 }
0x11b6   :  { %1047 = vrot.lane.b32.xlu1 %v1045_v43, %s1957_s23 }
0x1226   :  { %v1126_v45 = vpop.permute.xlu0 %1125 }
0x1227   :  { %v2390_v11 = vadd.f32 %v1126_v45, %v1118_v44 }
0x1228   :  { %v1048_v48 = vpop.permute.xlu1 %1047 }
0x1229   :  { %1916 = vtanh.f32 %v2390_v11  ;;  %v2394_v49 = vadd.f32 %v1048_v48, %v1040_v47 }
0x122b   :  { %1918 = vtanh.f32 %v2394_v49 }
0x1236   :  { %v1917_v50 = vpop.eup %1916 }
0x1237   :  { %1131 = vrot.lane.b32.xlu0 %v1917_v50, %s1957_s23 }
0x1238   :  { %v1919_v51 = vpop.eup %1918 }
0x1239   :  { %1053 = vrot.lane.b32.xlu1 %v1919_v51, %s1957_s23 }
0x12a9   :  { %v1132_v52 = vpop.permute.xlu0 %1131 }
0x12aa   :  { %v1134_v53 = vmul.f32 %v1913_v39, %v1132_v52  ;;  %v1954_v52 = vld [vmem:[%s2473_s4] ss:$0 sm:$0xff] }
0x12ab   :  { %v1054_v56 = vpop.permute.xlu1 %1053 }
0x12ac   :  { %v1214_v54 = vrot.slane %v1134_v53, 1  ;;  %1136 = vrot.lane.b32.xlu1 %v1134_v53, %s1958_s11  ;;  %v1056_v55 = vmul.f32 %v1915_v41, %v1054_v56 }
0x12ae   :  { %1215 = vrot.lane.b32.xlu0 %v1214_v54, %s1959_s12 }
0x12b2   :  { %1140 = vrot.lane.b32.xlu0 %v1056_v55, %s1959_s12 }
0x131e   :  { %v1137_v61 = vpop.permute.xlu1 %1136 }
0x1320   :  { %v1216_v57 = vpop.permute.xlu0 %1215 }
0x1321   :  { %v1218_v58 = vsel %vm43_vm2, %v2342_v9, %v1216_v57  ;;  %v1219_v59 = vsel %vm43_vm2, %v2036_v5, %v1216_v57  ;;  %v1950_v9 = vld [vmem:[%s2472_s3 + $0x18] sm:$0xff]   ;;  %v1951_v5 = vld [vmem:[%s2472_s3 + $0x10] sm:$0xff]  }
0x1322   :  { %v1220_v60 = vpack.c.bf16 %v1219_v59, %v1218_v58 }
0x1324   :  { %v1222_v63 = vshrl.u32 %v1220_v60, 16  ;;  %v1225_v4 = vshll.u32 %v1220_v60, 16  ;;  %v1141_v7 = vpop.permute.xlu0 %1140 }
0x1325   :  { %v1143_v62 = vsel %vm43_vm2, %v1137_v61, %v1141_v7 }
0x1326   :  { %v1224_v13 = vrot.slane %v1222_v63, 3  ;;  %v1227_v14 = vrot.slane %v1225_v4, 4  ;;  %v1144_v16 = vpack.c.bf16 %v1143_v62, %v1143_v62 }
0x1328   :  { %v1228_v18 = vor.u32 %v1227_v14, %v1224_v13  ;;  %1766 = vmatmul.mubr.msk.bf16.vlgmr.msra.gmra.mxu1 %vm85_vm3, %v1144_v16  ;;  %v1814_v14 = vld [vmem:[%s2474_s5 + $0x8] sm:$0xff]   ;;  %v1815_v16 = vld [vmem:[%s2474_s5] sm:$0xff]  }
0x1329   :  { %1782 = vmatpush3.bf16.msra.mxu1 %v1950_v9  ;;  %1789 = vmatprep.mubr.msk.bf16.mxu1 %vm1956_vm0, %v1955_v0 }
0x132a   :  { %1778 = vmatmul.mubr.msk.bf16.vlgmr.msra.gmra.mxu0 %vm85_vm3, %v1228_v18  ;;  %1783 = vmatprep.subr.bf16.mxu1 %v1955_v0 }
0x132b   :  { %1797 = vmatprep.mubr.msk.bf16.mxu0 %vm1956_vm0, %v1955_v0  ;;  %1794 = vmatpush3.bf16.msra.mxu0 %v1814_v14 }
0x132c   :  { %1795 = vmatprep.subr.bf16.mxu0 %v1955_v0 }
0x132d   :  { %1784 = vmatpush3.bf16.msra.mxu1 %v1951_v5 }
0x132e   :  { %1785 = vmatprep.subr.bf16.mxu1 %v1955_v0 }
0x132f   :  { %1796 = vmatpush3.bf16.msra.mxu0 %v1815_v16 }
0x1331   :  { %1786 = vmatpush3.bf16.msra.mxu1 %v1952_v19 }
0x1332   :  { %1787 = vmatprep.subr.bf16.mxu1 %v1955_v0  ;;  %v1512_v0 = vld [vmem:[%s2476_s6] ss:$0 sm:$0xff] }
0x1335   :  { %1788 = vmatpush3.bf16.msra.mxu1 %v1953_v10 }
0x13e8   :  { %v1182_v20 = vpop.f32.mrf.mxu1 }
0x13e9   :  { %v1183_v15 = vadd.f32 %v2139_v46, %v1182_v20  ;;  %v14_v20 = vstv %s2475_s8 }
0x13ea   :  { %v1767_v21 = vpop.f32.mrf.mxu1  ;;  %v1266_v22 = vpop.f32.mrf.mxu0  ;;  %15 = vst [vmem:[#allocation2] sm:$0x1] %v14_v20 }
0x13eb   :  { %1920 = vtanh.f32 %v1183_v15  ;;  %v1267_v12 = vadd.f32 %v2381_v23, %v1266_v22  ;;  %v1507_v26 = vmul.f32 -1.442695, %v1183_v15 }
0x13ec   :  { %v1185_v27 = vpop.f32.mrf.mxu1  ;;  %v1779_v17 = vpop.f32.mrf.mxu0 }
0x13ed   :  { %1922 = vtanh.f32 %v1267_v12  ;;  %v1509_v32 = vmul.f32 -1.442695, %v1267_v12  ;;  %v1516_v12 = vld [vmem:[%s2477_s7] ss:$0 sm:$0xff] }
0x13ee   :  { %v1768_v28 = vpop.f32.mrf.mxu1  ;;  %v1269_v29 = vpop.f32.mrf.mxu0  ;;  %1924 = vpow2.f32 %v1507_v26 }
0x13ef   :  { %1926 = vpow2.f32 %v1509_v32 }
0x13f0   :  { %v1780_v24 = vpop.f32.mrf.mxu0 }
0x13f8   :  { %v1921_v25 = vpop.eup %1920 }
0x13f9   :  { %1197 = vrot.lane.b32.xlu1 %v1921_v25, %s1957_s23  ;;  %v1517_v25 = vld [vmem:[#allocation2] ss:$0 sm:$0xff] }
0x13fa   :  { %v1923_v30 = vpop.eup %1922 }
0x13fb   :  { %1281 = vrot.lane.b32.xlu0 %v1923_v30, %s1957_s23  ;;  %v1925_v46 = vpop.eup %1924 }
0x13fc   :  { %v1927_v33 = vpop.eup %1926  ;;  %v1191_v31 = vadd.f32 1.0, %v1925_v46 }
0x13fd   :  { %v1275_v23 = vadd.f32 1.0, %v1927_v33 }
0x13fe   :  { %1928 = vrcp.f32 %v1191_v31 }
0x13ff   :  { %1930 = vrcp.f32 %v1275_v23 }
0x140b   :  { %v1929_v1 = vpop.eup %1928 }
0x140c   :  { %v1931_v34 = vpop.eup %1930  ;;  %v1195_v6 = vmul.f32 %v1929_v1, %v2394_v49 }
0x140d   :  { %v1279_v39 = vmul.f32 %v1931_v34, %v2390_v11 }
0x146b   :  { %v1198_v2 = vpop.permute.xlu1 %1197 }
0x146c   :  { %v1200_v3 = vmul.f32 %v1929_v1, %v1198_v2 }
0x146d   :  { %v1282_v35 = vpop.permute.xlu0 %1281 }
0x146e   :  { %1202 = vrot.lane.b32.xlu1 %v1200_v3, %s1957_s23  ;;  %v1284_v36 = vmul.f32 %v1931_v34, %v1282_v35 }
0x1470   :  { %1286 = vrot.lane.b32.xlu0 %v1284_v36, %s1957_s23 }
0x14e0   :  { %v1203_v37 = vpop.permute.xlu1 %1202 }
0x14e1   :  { %v1205_v38 = vadd.f32 %v1203_v37, %v1195_v6 }
0x14e2   :  { %v1287_v40 = vpop.permute.xlu0 %1286 }
0x14e3   :  { %1932 = vtanh.f32 %v1205_v38  ;;  %v1289_v8 = vadd.f32 %v1287_v40, %v1279_v39 }
0x14e5   :  { %1934 = vtanh.f32 %v1289_v8 }
0x14f0   :  { %v1933_v41 = vpop.eup %1932 }
0x14f1   :  { %1208 = vrot.lane.b32.xlu1 %v1933_v41, %s1957_s23 }
0x14f2   :  { %v1935_v42 = vpop.eup %1934 }
0x14f3   :  { %1292 = vrot.lane.b32.xlu0 %v1935_v42, %s1957_s23 }
0x1563   :  { %v1209_v43 = vpop.permute.xlu1 %1208 }
0x1564   :  { %v1211_v44 = vmul.f32 %v1929_v1, %v1209_v43 }
0x1565   :  { %v1293_v45 = vpop.permute.xlu0 %1292 }
0x1566   :  { %1301 = vrot.lane.b32.xlu0 %v1211_v44, %s1959_s12  ;;  %v1295_v47 = vmul.f32 %v1931_v34, %v1293_v45 }
0x1568   :  { %1297 = vrot.lane.b32.xlu1 %v1295_v47, %s1958_s11 }
0x15d8   :  { %v1302_v48 = vpop.permute.xlu0 %1301 }
0x15da   :  { %v1298_v11 = vpop.permute.xlu1 %1297 }
0x15db   :  { %v1304_v49 = vsel %vm43_vm2, %v1298_v11, %v1302_v48 }
0x15dc   :  { %v1305_v50 = vpack.c.bf16 %v1304_v49, %v1304_v49 }
0x15de   :  { %1790 = vmatmul.mubr.msk.bf16.vlgmr.msra.gmra.mxu1 %vm85_vm3, %v1305_v50 }
0x169e   :  { %v1343_v51 = vpop.f32.mrf.mxu1 }
0x169f   :  { %v1344_v53 = vadd.f32 %v1954_v52, %v1343_v51 }
0x16a0   :  { %v1791_v54 = vpop.f32.mrf.mxu1 }
0x16a1   :  { %1936 = vtanh.f32 %v1344_v53  ;;  %v1511_v58 = vmul.f32 -1.442695, %v1344_v53 }
0x16a2   :  { %v1346_v56 = vpop.f32.mrf.mxu1 }
0x16a3   :  { %1938 = vpow2.f32 %v1511_v58 }
0x16a4   :  { %v1792_v55 = vpop.f32.mrf.mxu1 }
0x16ae   :  { %v1937_v57 = vpop.eup %1936 }
0x16af   :  { %1358 = vrot.lane.b32.xlu1 %v1937_v57, %s1957_s23 }
0x16b0   :  { %v1939_v59 = vpop.eup %1938 }
0x16b1   :  { %v1352_v60 = vadd.f32 1.0, %v1939_v59 }
0x16b3   :  { %1940 = vrcp.f32 %v1352_v60 }
0x16c0   :  { %v1941_v61 = vpop.eup %1940 }
0x16c1   :  { %v1356_v7 = vmul.f32 %v1941_v61, %v1205_v38 }
0x1721   :  { %v1359_v63 = vpop.permute.xlu1 %1358 }
0x1722   :  { %v1361_v4 = vmul.f32 %v1941_v61, %v1359_v63 }
0x1724   :  { %1363 = vrot.lane.b32.xlu0 %v1361_v4, %s1957_s23 }
0x1796   :  { %v1364_v62 = vpop.permute.xlu0 %1363 }
0x1797   :  { %v1366_v13 = vadd.f32 %v1364_v62, %v1356_v7 }
0x1799   :  { %1942 = vtanh.f32 %v1366_v13 }
0x17a6   :  { %v1943_v18 = vpop.eup %1942 }
0x17a7   :  { %1369 = vrot.lane.b32.xlu1 %v1943_v18, %s1957_s23 }
0x1819   :  { %v1370_v9 = vpop.permute.xlu1 %1369 }
0x181a   :  { %v1372_v5 = vmul.f32 %v1941_v61, %v1370_v9 }
0x181c   :  { %v1373_v19 = vpack.c.bf16 %v1372_v5, %v1372_v5 }
0x181e   :  { %1386 = vrot.lane.b32.xlu0 %v1373_v19, %s1958_s11 }
0x1890   :  { %v1387_v10 = vpop.permute.xlu0 %1386 }
0x1891   :  { %1798 = vmatmul.mubr.msk.bf16.vlgmr.msra.gmra.mxu0 %vm43_vm2, %v1387_v10 }
0x1951   :  { %v1437_v15 = vpop.f32.mrf.mxu0 }
0x1952   :  { %v1438_v21 = vadd.f32 %v1512_v0, %v1437_v15 }
0x1953   :  { %v1799_v22 = vpop.f32.mrf.mxu0 }
0x1954   :  { %v1443_v27 = vmax.f32 %v1438_v21, 0.0 }
0x1955   :  { %v1440_v17 = vpop.f32.mrf.mxu0 }
0x1956   :  { %v1451_v28 = vmul.f32 %v1516_v12, %v1443_v27 }
0x1957   :  { %v1800_v29 = vpop.f32.mrf.mxu0 }
0x1958   :  { %v1453_v24 = vsel %vm1452_vm10, %v1451_v28, 0.0 }
0x1959   :  { %1454 = vadd.xlane.f32.xlu1 %v1453_v24 }
0x19e2   :  { %v1455_v30 = vpop.xlane.xlu1 %1454 }
0x19e3   :  { %v1463_v26 = vadd.f32 %v1517_v25, %v1455_v30 }
0x19e5   :  { %1465 = vst.msk [vmem:[%s2478_s9] sm:$0x3] %vm1464_vm11, %v1463_v26 }

</bundles_post_ra>
